<compile_context>
chip_gen: v7x
topology: tpu7x:2x2x1
jax: 0.10.0
libtpu: 0.0.40
codegen_flags: <defaults>
</compile_context>

<pallas_src>
import jax
import jax.numpy as jnp
from jax.experimental import pallas as pl
from jax.experimental.pallas import tpu as pltpu


CP = 128          # lane-padded channel width (MXU/vreg lane count)


# --------------------------------------------------------------------------
# Fused Pallas kernel: stem conv -> residual block -> add+ReLU -> pool -> fc1
# (one grid step == one image; everything stays VMEM/vreg-resident)
# --------------------------------------------------------------------------
def _make_kernel(W, S, pad):
    f32, bf16 = jnp.float32, jnp.bfloat16

    def kernel(a_ref, ws_ref, bs_ref, w1_ref, b1_ref, w2_ref, b2_ref,
               wf_ref, bf_ref, o_ref, xpad_ref):
        # x-coordinate of every output row (row index = y*W + x).  Masks kill the
        # dx = -1 / +1 taps whose flat row-shift would otherwise wrap across image rows.
        xcoord = jax.lax.broadcasted_iota(jnp.int32, (S, CP), 0) % W
        mask_l = xcoord >= 1          # valid rows for the dx = -1 taps
        mask_r = xcoord <= W - 2      # valid rows for the dx = +1 taps

        # Zero the top/bottom borders of the shift scratch (handles the dy boundary).
        zeros_pad = jnp.zeros((pad, CP), f32)
        xpad_ref[pl.ds(0, pad), :] = zeros_pad
        xpad_ref[pl.ds(pad + S, pad), :] = zeros_pad

        # --- stem conv (+ folded BN) + ReLU: im2col'd input (K padded 36->128) ----
        h = jnp.dot(a_ref[...], ws_ref[...], preferred_element_type=f32)   # (S, CP)
        h = jnp.maximum(h + bs_ref[...], 0.0)

        # --- 3x3 'same' conv: 9 statically shifted copies of the VMEM-resident ----
        # activation, concatenated to (S, 9*CP) bf16 and fed to ONE K=9*CP matmul.
        def conv3x3(x_f32, w_ref, b_ref):
            xpad_ref[pl.ds(pad, S), :] = x_f32
            taps = []
            for dy in (-1, 0, 1):
                for dx in (-1, 0, 1):
                    t = xpad_ref[pl.ds(pad + dy * W + dx, S), :]
                    if dx == -1:
                        t = jnp.where(mask_l, t, 0.0)
                    elif dx == 1:
                        t = jnp.where(mask_r, t, 0.0)
                    taps.append(t.astype(bf16))
            cols = jnp.concatenate(taps, axis=1)                 # (S, 9*CP) bf16
            return jnp.dot(cols, w_ref[...], preferred_element_type=f32) + b_ref[...]

        # residual block: conv1 + BN + ReLU, conv2 + BN, residual add + ReLU
        y1 = jnp.maximum(conv3x3(h, w1_ref, b1_ref), 0.0)
        y2 = conv3x3(y1, w2_ref, b2_ref)
        hout = jnp.maximum(y2 + h, 0.0)                          # (S, CP) f32

        # --- global average pool (per image) + fc1 --------------------------------
        pooled = jnp.sum(hout, axis=0, keepdims=True) * (1.0 / S)    # (1, CP) f32
        out = jnp.dot(pooled.astype(bf16), wf_ref[...], preferred_element_type=f32)
        o_ref[0] = (out + bf_ref[...]).astype(o_ref.dtype)

    return kernel


def embedding_net_forward(x_nchw, prep):
    """EmbeddingNet.forward: features(x) -> flatten -> fc1, one fused pallas_call."""
    B, _, H, W = x_nchw.shape
    S = H * W
    pad = -(-(W + 1) // 8) * 8            # >= W+1, sublane-aligned
    fc_out = prep["w_fc"].shape[1]

    # Glue: NCHW -> NHWC and im2col of the *input* only (tiny; later activations
    # never leave VMEM).  Pad K: 9*C_in -> 128 lanes (stem weight rows padded to match).
    x = jnp.transpose(x_nchw, (0, 2, 3, 1)).astype(jnp.float32)
    a = im2col_3x3_same(x)                                        # (B*S, 9*C_in)
    a = jnp.pad(a, ((0, 0), (0, CP - a.shape[1]))).astype(jnp.bfloat16)

    weights = (prep["w_stem"], prep["b_stem"], prep["w1"], prep["b1"],
               prep["w2"], prep["b2"], prep["w_fc"], prep["b_fc"])

    def const_spec(arr):
        nd = arr.ndim
        return pl.BlockSpec(tuple(arr.shape), lambda b, _nd=nd: (0,) * _nd)

    out = pl.pallas_call(
        _make_kernel(W, S, pad),
        out_shape=jax.ShapeDtypeStruct((B, 1, fc_out), jnp.float32),
        grid_spec=pltpu.PrefetchScalarGridSpec(
            num_scalar_prefetch=0,
            grid=(B,),
            in_specs=[pl.BlockSpec((S, CP), lambda b: (b, 0))]     # per-image im2col block
                     + [const_spec(w) for w in weights],
            out_specs=pl.BlockSpec((1, 1, fc_out), lambda b: (b, 0, 0)),
            scratch_shapes=[pltpu.VMEM((S + 2 * pad, CP), jnp.float32)]),
        compiler_params=pltpu.CompilerParams(
            dimension_semantics=("parallel",),
            vmem_limit_bytes=32 * 1024 * 1024),
    )(a, *weights)
    return out.reshape(B, fc_out)


# --------------------------------------------------------------------------
# Glue (plain JAX): im2col of the input, BN folding, one-time parameter packing
# --------------------------------------------------------------------------
def im2col_3x3_same(x_nhwc):
    """3x3, stride 1, padding 1 patches. (B,H,W,C) -> (B*H*W, 9*C), (ky,kx,c) column order."""
    B, H, W, C = x_nhwc.shape
    xp = jnp.pad(x_nhwc, ((0, 0), (1, 1), (1, 1), (0, 0)))
    cols = []
    for i in range(3):
        for j in range(3):
            cols.append(xp[:, i:i + H, j:j + W, :])
    return jnp.concatenate(cols, axis=-1).reshape(B * H * W, 9 * C)


def fold_bn(w_ocij, gamma, beta, mean, var, eps=1e-5):
    """Fold inference BatchNorm into a conv weight (torch (O,C,kh,kw) layout) + bias."""
    scale = gamma / jnp.sqrt(var + eps)
    return w_ocij * scale[:, None, None, None], beta - mean * scale


def make_raw_params(key, c_in, c_mid, fc_out):
    """Deterministic raw parameters (torch-style layouts) for the synthetic backbone."""
    ks = jax.random.split(key, 8)

    def conv_w(k, cin, cout):
        return jax.random.normal(k, (cout, cin, 3, 3), jnp.float32) * 0.1

    def bn(k, c):
        g = 1.0 + 0.1 * jax.random.normal(k, (c,), jnp.float32)
        b = 0.1 * jax.random.normal(jax.random.fold_in(k, 1), (c,), jnp.float32)
        m = 0.05 * jax.random.normal(jax.random.fold_in(k, 2), (c,), jnp.float32)
        v = jnp.abs(1.0 + 0.1 * jax.random.normal(jax.random.fold_in(k, 3), (c,), jnp.float32))
        return g, b, m, v

    return {
        "w_stem": conv_w(ks[0], c_in, c_mid), "bn_stem": bn(ks[1], c_mid),
        "w_b1": conv_w(ks[2], c_mid, c_mid), "bn_b1": bn(ks[3], c_mid),
        "w_b2": conv_w(ks[4], c_mid, c_mid), "bn_b2": bn(ks[5], c_mid),
        # fc1 = Linear(num_ftrs, 1024), stored already transposed as (num_ftrs, 1024)
        "w_fc": jax.random.normal(ks[6], (c_mid, fc_out), jnp.float32) * 0.05,
        "b_fc": 0.01 * jax.random.normal(ks[7], (fc_out,), jnp.float32),
    }


def prepare_params(raw, c_in, c_mid, fc_out):
    """One-time packing: fold BN, pad channels to CP=128 lanes, bf16 weights."""
    bf16 = jnp.bfloat16

    # stem: (O,C,3,3) -> im2col column order (ky,kx,c) -> (9*c_in, c_mid);
    # pad K (9*c_in -> CP, matches the zero-padded im2col input) and O -> CP.
    ws, bs = fold_bn(raw["w_stem"], *raw["bn_stem"])
    ws = jnp.transpose(ws, (2, 3, 1, 0)).reshape(9 * c_in, c_mid)
    ws = jnp.pad(ws, ((0, CP - 9 * c_in), (0, CP - c_mid)))
    bs = jnp.pad(bs, (0, CP - c_mid)).reshape(1, CP).astype(jnp.float32)

    def block_w(w_raw, bn_raw):
        w, b = fold_bn(w_raw, *bn_raw)
        w = jnp.transpose(w, (2, 3, 1, 0)).reshape(9, c_mid, c_mid)     # (tap, c_in, c_out)
        w = jnp.pad(w, ((0, 0), (0, CP - c_mid), (0, CP - c_mid)))
        w = w.reshape(9 * CP, CP)                                       # one K=9*CP matmul
        b = jnp.pad(b, (0, CP - c_mid)).reshape(1, CP).astype(jnp.float32)
        return w, b

    w1, b1 = block_w(raw["w_b1"], raw["bn_b1"])
    w2, b2 = block_w(raw["w_b2"], raw["bn_b2"])

    # fc1: zero rows for the padded channels keep the padded output exact
    wf = jnp.pad(raw["w_fc"], ((0, CP - c_mid), (0, 0)))
    bf = raw["b_fc"].reshape(1, fc_out).astype(jnp.float32)

    return {"w_stem": ws.astype(bf16), "b_stem": bs,
            "w1": w1.astype(bf16), "b1": b1,
            "w2": w2.astype(bf16), "b2": b2,
            "w_fc": wf.astype(bf16), "b_fc": bf}


# --------------------------------------------------------------------------
# Pure-JAX reference (independent im2col path; mirrors the bf16 operand casts)
# --------------------------------------------------------------------------
def _ref_forward(x_nchw, raw):
    bf16 = jnp.bfloat16

    def mm(a, b):
        return jnp.dot(a.astype(bf16), b.astype(bf16), preferred_element_type=jnp.float32)

    x = jnp.transpose(x_nchw, (0, 2, 3, 1)).astype(jnp.float32)
    B, H, W, _ = x.shape

    def conv(z_img, w_raw, bn_raw, relu):
        w, b = fold_bn(w_raw, *bn_raw)
        cin = w.shape[1]
        w_col = jnp.transpose(w, (2, 3, 1, 0)).reshape(9 * cin, -1)
        o = mm(im2col_3x3_same(z_img), w_col) + b[None, :]
        if relu:
            o = jnp.maximum(o, 0.0)
        return o.reshape(B, H, W, -1)

    h = conv(x, raw["w_stem"], raw["bn_stem"], True)
    y = conv(conv(h, raw["w_b1"], raw["bn_b1"], True), raw["w_b2"], raw["bn_b2"], False)
    hout = jnp.maximum(y + h, 0.0)
    pooled = jnp.mean(hout, axis=(1, 2))
    return mm(pooled, raw["w_fc"]) + raw["b_fc"][None, :]


# --------------------------------------------------------------------------
if __name__ == "__main__":
    key = jax.random.PRNGKey(0)
    k_x, k_p = jax.random.split(key)

    B, C_IN, HW = 2, 4, 16        # small NCHW input, like the PyTorch module expects
    C_MID, FC_OUT = 16, 1024      # num_ftrs = 16, fc1 -> 1024

    x = jax.random.normal(k_x, (B, C_IN, HW, HW), jnp.float32)
    raw = make_raw_params(k_p, C_IN, C_MID, FC_OUT)
    prep = prepare_params(raw, C_IN, C_MID, FC_OUT)   # hoisted out of the hot path

    fwd = jax.jit(embedding_net_forward)
    out = jax.block_until_ready(fwd(x, prep))
    assert out.shape == (B, FC_OUT), out.shape

    ref = _ref_forward(x, raw)
    max_err = float(jnp.max(jnp.abs(out - ref)))
    assert jnp.allclose(out, ref, atol=2e-3, rtol=2e-3), f"mismatch vs reference, max_err={max_err}"

    print("KERNEL_OK")
</pallas_src>

<mosaic_0001>
module attributes {stable_mosaic.version = 11 : i64} {
  func.func @kernel(%arg0: i32, %arg1: memref<256x128xbf16, #tpu.memory_space<vmem>>, %arg2: memref<128x128xbf16, #tpu.memory_space<vmem>>, %arg3: memref<1x128xf32, #tpu.memory_space<vmem>>, %arg4: memref<1152x128xbf16, #tpu.memory_space<vmem>>, %arg5: memref<1x128xf32, #tpu.memory_space<vmem>>, %arg6: memref<1152x128xbf16, #tpu.memory_space<vmem>>, %arg7: memref<1x128xf32, #tpu.memory_space<vmem>>, %arg8: memref<128x1024xbf16, #tpu.memory_space<vmem>>, %arg9: memref<1x1024xf32, #tpu.memory_space<vmem>>, %arg10: memref<1x1x1024xf32, #tpu.memory_space<vmem>>, %arg11: memref<304x128xf32, #tpu.memory_space<vmem>>) attributes {dimension_semantics = [#tpu.dimension_semantics<parallel>], iteration_bounds = array<i64: 2>, scalar_prefetch = 0 : i64, scratch_operands = 1 : i64, tpu.core_type = #tpu.core_type<tc>, window_params = [{transform_indices = @transform_0, window_bounds = array<i64: 256, 128>}, {pipeline_mode = #tpu.pipeline_mode<synchronous>, transform_indices = @transform_1, window_bounds = array<i64: 128, 128>}, {pipeline_mode = #tpu.pipeline_mode<synchronous>, transform_indices = @transform_2, window_bounds = array<i64: 1, 128>}, {pipeline_mode = #tpu.pipeline_mode<synchronous>, transform_indices = @transform_3, window_bounds = array<i64: 1152, 128>}, {pipeline_mode = #tpu.pipeline_mode<synchronous>, transform_indices = @transform_4, window_bounds = array<i64: 1, 128>}, {pipeline_mode = #tpu.pipeline_mode<synchronous>, transform_indices = @transform_5, window_bounds = array<i64: 1152, 128>}, {pipeline_mode = #tpu.pipeline_mode<synchronous>, transform_indices = @transform_6, window_bounds = array<i64: 1, 128>}, {pipeline_mode = #tpu.pipeline_mode<synchronous>, transform_indices = @transform_7, window_bounds = array<i64: 128, 1024>}, {pipeline_mode = #tpu.pipeline_mode<synchronous>, transform_indices = @transform_8, window_bounds = array<i64: 1, 1024>}, {transform_indices = @transform_9, window_bounds = array<i64: 1, 1, 1024>}]} {
    %0 = tpu.iota {dimensions = array<i32: 0>} : vector<256x128xi32>
    %c16_i32 = arith.constant 16 : i32
    %c0_i32 = arith.constant 0 : i32
    %1 = arith.cmpi eq, %c16_i32, %c0_i32 : i32
    %c1_i32 = arith.constant 1 : i32
    %2 = arith.select %1, %c1_i32, %c16_i32 : i32
    %3 = vector.broadcast %2 : i32 to vector<256x128xi32>
    %4 = arith.remsi %0, %3 : vector<256x128xi32>
    %c0_i32_0 = arith.constant 0 : i32
    %5 = vector.broadcast %c0_i32_0 : i32 to vector<256x128xi32>
    %6 = arith.cmpi ne, %4, %5 : vector<256x128xi32>
    %c0_i32_1 = arith.constant 0 : i32
    %7 = vector.broadcast %c0_i32_1 : i32 to vector<256x128xi32>
    %8 = arith.cmpi slt, %4, %7 : vector<256x128xi32>
    %c0_i32_2 = arith.constant 0 : i32
    %9 = arith.cmpi slt, %2, %c0_i32_2 : i32
    %10 = vector.broadcast %9 : i1 to vector<256x128xi1>
    %11 = vector.broadcast %10 : vector<256x128xi1> to vector<256x128xi1>
    %12 = arith.xori %8, %11 : vector<256x128xi1>
    %13 = arith.andi %12, %6 : vector<256x128xi1>
    %14 = vector.broadcast %2 : i32 to vector<256x128xi32>
    %15 = arith.addi %4, %14 : vector<256x128xi32>
    %16 = arith.select %13, %15, %4 : vector<256x128xi1>, vector<256x128xi32>
    %c1_i32_3 = arith.constant 1 : i32
    %17 = vector.broadcast %c1_i32_3 : i32 to vector<256x128xi32>
    %18 = arith.cmpi sge, %16, %17 : vector<256x128xi32>
    %c14_i32 = arith.constant 14 : i32
    %19 = vector.broadcast %c14_i32 : i32 to vector<256x128xi32>
    %20 = arith.cmpi sle, %16, %19 : vector<256x128xi32>
    %cst = arith.constant 0.000000e+00 : f32
    %21 = vector.broadcast %cst : f32 to vector<24x128xf32>
    %c0 = arith.constant 0 : index
    %c0_4 = arith.constant 0 : index
    %22 = vector.load %arg11[%c0, %c0_4] : memref<304x128xf32, #tpu.memory_space<vmem>>, vector<24x128xf32>
    tpu.vector_store %arg11[%c0, %c0_4], %21 {strides = array<i32>} : memref<304x128xf32, #tpu.memory_space<vmem>>, vector<24x128xf32>,
    %c280 = arith.constant 280 : index
    %c0_5 = arith.constant 0 : index
    %23 = vector.load %arg11[%c280, %c0_5] : memref<304x128xf32, #tpu.memory_space<vmem>>, vector<24x128xf32>
    tpu.vector_store %arg11[%c280, %c0_5], %21 {strides = array<i32>} : memref<304x128xf32, #tpu.memory_space<vmem>>, vector<24x128xf32>,
    %c0_6 = arith.constant 0 : index
    %c0_7 = arith.constant 0 : index
    %24 = vector.load %arg1[%c0_6, %c0_7] : memref<256x128xbf16, #tpu.memory_space<vmem>>, vector<256x128xbf16>
    %c0_8 = arith.constant 0 : index
    %c0_9 = arith.constant 0 : index
    %25 = vector.load %arg2[%c0_8, %c0_9] : memref<128x128xbf16, #tpu.memory_space<vmem>>, vector<128x128xbf16>
    %cst_10 = arith.constant dense<0.000000e+00> : vector<256x128xf32>
    %26 = tpu.matmul %24, %25, %cst_10 {dimension_numbers = #tpu.dot_dimension_numbers<[1], [0], [0], [1], [0, 0, 1, 1], [], []>} : vector<256x128xbf16>, vector<128x128xbf16>, vector<256x128xf32> -> vector<256x128xf32>
    %c0_11 = arith.constant 0 : index
    %c0_12 = arith.constant 0 : index
    %27 = vector.load %arg3[%c0_11, %c0_12] : memref<1x128xf32, #tpu.memory_space<vmem>>, vector<1x128xf32>
    %28 = vector.broadcast %27 : vector<1x128xf32> to vector<256x128xf32>
    %29 = arith.addf %26, %28 : vector<256x128xf32>
    %cst_13 = arith.constant 0.000000e+00 : f32
    %30 = vector.broadcast %cst_13 : f32 to vector<256x128xf32>
    %31 = arith.maximumf %29, %30 : vector<256x128xf32>
    %c24 = arith.constant 24 : index
    %c0_14 = arith.constant 0 : index
    %32 = vector.load %arg11[%c24, %c0_14] : memref<304x128xf32, #tpu.memory_space<vmem>>, vector<256x128xf32>
    tpu.vector_store %arg11[%c24, %c0_14], %31 {strides = array<i32>} : memref<304x128xf32, #tpu.memory_space<vmem>>, vector<256x128xf32>,
    %c7 = arith.constant 7 : index
    %c0_15 = arith.constant 0 : index
    %33 = vector.load %arg11[%c7, %c0_15] : memref<304x128xf32, #tpu.memory_space<vmem>>, vector<256x128xf32>
    %cst_16 = arith.constant 0.000000e+00 : f32
    %34 = vector.broadcast %cst_16 : f32 to vector<256x128xf32>
    %35 = arith.select %18, %33, %34 : vector<256x128xi1>, vector<256x128xf32>
    %36 = arith.truncf %35 : vector<256x128xf32> to vector<256x128xbf16>
    %c8 = arith.constant 8 : index
    %c0_17 = arith.constant 0 : index
    %37 = vector.load %arg11[%c8, %c0_17] : memref<304x128xf32, #tpu.memory_space<vmem>>, vector<256x128xf32>
    %38 = arith.truncf %37 : vector<256x128xf32> to vector<256x128xbf16>
    %c9 = arith.constant 9 : index
    %c0_18 = arith.constant 0 : index
    %39 = vector.load %arg11[%c9, %c0_18] : memref<304x128xf32, #tpu.memory_space<vmem>>, vector<256x128xf32>
    %cst_19 = arith.constant 0.000000e+00 : f32
    %40 = vector.broadcast %cst_19 : f32 to vector<256x128xf32>
    %41 = arith.select %20, %39, %40 : vector<256x128xi1>, vector<256x128xf32>
    %42 = arith.truncf %41 : vector<256x128xf32> to vector<256x128xbf16>
    %c23 = arith.constant 23 : index
    %c0_20 = arith.constant 0 : index
    %43 = vector.load %arg11[%c23, %c0_20] : memref<304x128xf32, #tpu.memory_space<vmem>>, vector<256x128xf32>
    %cst_21 = arith.constant 0.000000e+00 : f32
    %44 = vector.broadcast %cst_21 : f32 to vector<256x128xf32>
    %45 = arith.select %18, %43, %44 : vector<256x128xi1>, vector<256x128xf32>
    %46 = arith.truncf %45 : vector<256x128xf32> to vector<256x128xbf16>
    %c24_22 = arith.constant 24 : index
    %c0_23 = arith.constant 0 : index
    %47 = vector.load %arg11[%c24_22, %c0_23] : memref<304x128xf32, #tpu.memory_space<vmem>>, vector<256x128xf32>
    %48 = arith.truncf %47 : vector<256x128xf32> to vector<256x128xbf16>
    %c25 = arith.constant 25 : index
    %c0_24 = arith.constant 0 : index
    %49 = vector.load %arg11[%c25, %c0_24] : memref<304x128xf32, #tpu.memory_space<vmem>>, vector<256x128xf32>
    %cst_25 = arith.constant 0.000000e+00 : f32
    %50 = vector.broadcast %cst_25 : f32 to vector<256x128xf32>
    %51 = arith.select %20, %49, %50 : vector<256x128xi1>, vector<256x128xf32>
    %52 = arith.truncf %51 : vector<256x128xf32> to vector<256x128xbf16>
    %c39 = arith.constant 39 : index
    %c0_26 = arith.constant 0 : index
    %53 = vector.load %arg11[%c39, %c0_26] : memref<304x128xf32, #tpu.memory_space<vmem>>, vector<256x128xf32>
    %cst_27 = arith.constant 0.000000e+00 : f32
    %54 = vector.broadcast %cst_27 : f32 to vector<256x128xf32>
    %55 = arith.select %18, %53, %54 : vector<256x128xi1>, vector<256x128xf32>
    %56 = arith.truncf %55 : vector<256x128xf32> to vector<256x128xbf16>
    %c40 = arith.constant 40 : index
    %c0_28 = arith.constant 0 : index
    %57 = vector.load %arg11[%c40, %c0_28] : memref<304x128xf32, #tpu.memory_space<vmem>>, vector<256x128xf32>
    %58 = arith.truncf %57 : vector<256x128xf32> to vector<256x128xbf16>
    %c41 = arith.constant 41 : index
    %c0_29 = arith.constant 0 : index
    %59 = vector.load %arg11[%c41, %c0_29] : memref<304x128xf32, #tpu.memory_space<vmem>>, vector<256x128xf32>
    %cst_30 = arith.constant 0.000000e+00 : f32
    %60 = vector.broadcast %cst_30 : f32 to vector<256x128xf32>
    %61 = arith.select %20, %59, %60 : vector<256x128xi1>, vector<256x128xf32>
    %62 = arith.truncf %61 : vector<256x128xf32> to vector<256x128xbf16>
    %63 = tpu.concatenate %36, %38, %42, %46, %48, %52, %56, %58, %62 in 1 : vector<256x128xbf16>, vector<256x128xbf16>, vector<256x128xbf16>, vector<256x128xbf16>, vector<256x128xbf16>, vector<256x128xbf16>, vector<256x128xbf16>, vector<256x128xbf16>, vector<256x128xbf16> -> vector<256x1152xbf16>
    %c0_31 = arith.constant 0 : index
    %c0_32 = arith.constant 0 : index
    %64 = vector.load %arg4[%c0_31, %c0_32] : memref<1152x128xbf16, #tpu.memory_space<vmem>>, vector<1152x128xbf16>
    %cst_33 = arith.constant dense<0.000000e+00> : vector<256x128xf32>
    %65 = tpu.matmul %63, %64, %cst_33 {dimension_numbers = #tpu.dot_dimension_numbers<[1], [0], [0], [1], [0, 0, 1, 1], [], []>} : vector<256x1152xbf16>, vector<1152x128xbf16>, vector<256x128xf32> -> vector<256x128xf32>
    %c0_34 = arith.constant 0 : index
    %c0_35 = arith.constant 0 : index
    %66 = vector.load %arg5[%c0_34, %c0_35] : memref<1x128xf32, #tpu.memory_space<vmem>>, vector<1x128xf32>
    %67 = vector.broadcast %66 : vector<1x128xf32> to vector<256x128xf32>
    %68 = arith.addf %65, %67 : vector<256x128xf32>
    %cst_36 = arith.constant 0.000000e+00 : f32
    %69 = vector.broadcast %cst_36 : f32 to vector<256x128xf32>
    %70 = arith.maximumf %68, %69 : vector<256x128xf32>
    %c24_37 = arith.constant 24 : index
    %c0_38 = arith.constant 0 : index
    %71 = vector.load %arg11[%c24_37, %c0_38] : memref<304x128xf32, #tpu.memory_space<vmem>>, vector<256x128xf32>
    tpu.vector_store %arg11[%c24_37, %c0_38], %70 {strides = array<i32>} : memref<304x128xf32, #tpu.memory_space<vmem>>, vector<256x128xf32>,
    %c7_39 = arith.constant 7 : index
    %c0_40 = arith.constant 0 : index
    %72 = vector.load %arg11[%c7_39, %c0_40] : memref<304x128xf32, #tpu.memory_space<vmem>>, vector<256x128xf32>
    %cst_41 = arith.constant 0.000000e+00 : f32
    %73 = vector.broadcast %cst_41 : f32 to vector<256x128xf32>
    %74 = arith.select %18, %72, %73 : vector<256x128xi1>, vector<256x128xf32>
    %75 = arith.truncf %74 : vector<256x128xf32> to vector<256x128xbf16>
    %c8_42 = arith.constant 8 : index
    %c0_43 = arith.constant 0 : index
    %76 = vector.load %arg11[%c8_42, %c0_43] : memref<304x128xf32, #tpu.memory_space<vmem>>, vector<256x128xf32>
    %77 = arith.truncf %76 : vector<256x128xf32> to vector<256x128xbf16>
    %c9_44 = arith.constant 9 : index
    %c0_45 = arith.constant 0 : index
    %78 = vector.load %arg11[%c9_44, %c0_45] : memref<304x128xf32, #tpu.memory_space<vmem>>, vector<256x128xf32>
    %cst_46 = arith.constant 0.000000e+00 : f32
    %79 = vector.broadcast %cst_46 : f32 to vector<256x128xf32>
    %80 = arith.select %20, %78, %79 : vector<256x128xi1>, vector<256x128xf32>
    %81 = arith.truncf %80 : vector<256x128xf32> to vector<256x128xbf16>
    %c23_47 = arith.constant 23 : index
    %c0_48 = arith.constant 0 : index
    %82 = vector.load %arg11[%c23_47, %c0_48] : memref<304x128xf32, #tpu.memory_space<vmem>>, vector<256x128xf32>
    %cst_49 = arith.constant 0.000000e+00 : f32
    %83 = vector.broadcast %cst_49 : f32 to vector<256x128xf32>
    %84 = arith.select %18, %82, %83 : vector<256x128xi1>, vector<256x128xf32>
    %85 = arith.truncf %84 : vector<256x128xf32> to vector<256x128xbf16>
    %c24_50 = arith.constant 24 : index
    %c0_51 = arith.constant 0 : index
    %86 = vector.load %arg11[%c24_50, %c0_51] : memref<304x128xf32, #tpu.memory_space<vmem>>, vector<256x128xf32>
    %87 = arith.truncf %86 : vector<256x128xf32> to vector<256x128xbf16>
    %c25_52 = arith.constant 25 : index
    %c0_53 = arith.constant 0 : index
    %88 = vector.load %arg11[%c25_52, %c0_53] : memref<304x128xf32, #tpu.memory_space<vmem>>, vector<256x128xf32>
    %cst_54 = arith.constant 0.000000e+00 : f32
    %89 = vector.broadcast %cst_54 : f32 to vector<256x128xf32>
    %90 = arith.select %20, %88, %89 : vector<256x128xi1>, vector<256x128xf32>
    %91 = arith.truncf %90 : vector<256x128xf32> to vector<256x128xbf16>
    %c39_55 = arith.constant 39 : index
    %c0_56 = arith.constant 0 : index
    %92 = vector.load %arg11[%c39_55, %c0_56] : memref<304x128xf32, #tpu.memory_space<vmem>>, vector<256x128xf32>
    %cst_57 = arith.constant 0.000000e+00 : f32
    %93 = vector.broadcast %cst_57 : f32 to vector<256x128xf32>
    %94 = arith.select %18, %92, %93 : vector<256x128xi1>, vector<256x128xf32>
    %95 = arith.truncf %94 : vector<256x128xf32> to vector<256x128xbf16>
    %c40_58 = arith.constant 40 : index
    %c0_59 = arith.constant 0 : index
    %96 = vector.load %arg11[%c40_58, %c0_59] : memref<304x128xf32, #tpu.memory_space<vmem>>, vector<256x128xf32>
    %97 = arith.truncf %96 : vector<256x128xf32> to vector<256x128xbf16>
    %c41_60 = arith.constant 41 : index
    %c0_61 = arith.constant 0 : index
    %98 = vector.load %arg11[%c41_60, %c0_61] : memref<304x128xf32, #tpu.memory_space<vmem>>, vector<256x128xf32>
    %cst_62 = arith.constant 0.000000e+00 : f32
    %99 = vector.broadcast %cst_62 : f32 to vector<256x128xf32>
    %100 = arith.select %20, %98, %99 : vector<256x128xi1>, vector<256x128xf32>
    %101 = arith.truncf %100 : vector<256x128xf32> to vector<256x128xbf16>
    %102 = tpu.concatenate %75, %77, %81, %85, %87, %91, %95, %97, %101 in 1 : vector<256x128xbf16>, vector<256x128xbf16>, vector<256x128xbf16>, vector<256x128xbf16>, vector<256x128xbf16>, vector<256x128xbf16>, vector<256x128xbf16>, vector<256x128xbf16>, vector<256x128xbf16> -> vector<256x1152xbf16>
    %c0_63 = arith.constant 0 : index
    %c0_64 = arith.constant 0 : index
    %103 = vector.load %arg6[%c0_63, %c0_64] : memref<1152x128xbf16, #tpu.memory_space<vmem>>, vector<1152x128xbf16>
    %cst_65 = arith.constant dense<0.000000e+00> : vector<256x128xf32>
    %104 = tpu.matmul %102, %103, %cst_65 {dimension_numbers = #tpu.dot_dimension_numbers<[1], [0], [0], [1], [0, 0, 1, 1], [], []>} : vector<256x1152xbf16>, vector<1152x128xbf16>, vector<256x128xf32> -> vector<256x128xf32>
    %c0_66 = arith.constant 0 : index
    %c0_67 = arith.constant 0 : index
    %105 = vector.load %arg7[%c0_66, %c0_67] : memref<1x128xf32, #tpu.memory_space<vmem>>, vector<1x128xf32>
    %106 = vector.broadcast %105 : vector<1x128xf32> to vector<256x128xf32>
    %107 = arith.addf %104, %106 : vector<256x128xf32>
    %108 = arith.addf %107, %31 : vector<256x128xf32>
    %cst_68 = arith.constant 0.000000e+00 : f32
    %109 = vector.broadcast %cst_68 : f32 to vector<256x128xf32>
    %110 = arith.maximumf %108, %109 : vector<256x128xf32>
    %cst_69 = arith.constant dense<0.000000e+00> : vector<128xf32>
    %111 = vector.multi_reduction <add>, %110, %cst_69 [0] : vector<256x128xf32> to vector<128xf32>
    %112 = vector.shape_cast %111 : vector<128xf32> to vector<1x128xf32>
    %cst_70 = arith.constant 3.906250e-03 : f32
    %113 = vector.broadcast %cst_70 : f32 to vector<1x128xf32>
    %114 = arith.mulf %112, %113 : vector<1x128xf32>
    %115 = arith.truncf %114 : vector<1x128xf32> to vector<1x128xbf16>
    %c0_71 = arith.constant 0 : index
    %c0_72 = arith.constant 0 : index
    %116 = vector.load %arg8[%c0_71, %c0_72] : memref<128x1024xbf16, #tpu.memory_space<vmem>>, vector<128x1024xbf16>
    %cst_73 = arith.constant dense<0.000000e+00> : vector<1x1024xf32>
    %117 = tpu.matmul %115, %116, %cst_73 {dimension_numbers = #tpu.dot_dimension_numbers<[1], [0], [0], [1], [0, 0, 1, 1], [], []>} : vector<1x128xbf16>, vector<128x1024xbf16>, vector<1x1024xf32> -> vector<1x1024xf32>
    %c0_74 = arith.constant 0 : index
    %c0_75 = arith.constant 0 : index
    %118 = vector.load %arg9[%c0_74, %c0_75] : memref<1x1024xf32, #tpu.memory_space<vmem>>, vector<1x1024xf32>
    %119 = arith.addf %117, %118 : vector<1x1024xf32>
    %c0_76 = arith.constant 0 : index
    %c0_77 = arith.constant 0 : index
    %c0_78 = arith.constant 0 : index
    %120 = vector.load %arg10[%c0_76, %c0_77, %c0_78] : memref<1x1x1024xf32, #tpu.memory_space<vmem>>, vector<1x1x1024xf32>
    %121 = vector.shape_cast %120 : vector<1x1x1024xf32> to vector<1x1024xf32>
    %122 = vector.shape_cast %119 : vector<1x1024xf32> to vector<1x1x1024xf32>
    tpu.vector_store %arg10[%c0_76, %c0_77, %c0_78], %122 {strides = array<i32>} : memref<1x1x1024xf32, #tpu.memory_space<vmem>>, vector<1x1x1024xf32>,
    return
  }
  func.func @transform_0(%arg0: i32) -> (i32, i32) {
    %c0_i32 = arith.constant 0 : i32
    %c0_i32_0 = arith.constant 0 : i32
    return %arg0, %c0_i32 : i32, i32
  }
  func.func @transform_1(%arg0: i32) -> (i32, i32) {
    %c0_i32 = arith.constant 0 : i32
    %c0_i32_0 = arith.constant 0 : i32
    %c0_i32_1 = arith.constant 0 : i32
    return %c0_i32, %c0_i32_0 : i32, i32
  }
  func.func @transform_2(%arg0: i32) -> (i32, i32) {
    %c0_i32 = arith.constant 0 : i32
    %c0_i32_0 = arith.constant 0 : i32
    %c0_i32_1 = arith.constant 0 : i32
    return %c0_i32, %c0_i32_0 : i32, i32
  }
  func.func @transform_3(%arg0: i32) -> (i32, i32) {
    %c0_i32 = arith.constant 0 : i32
    %c0_i32_0 = arith.constant 0 : i32
    %c0_i32_1 = arith.constant 0 : i32
    return %c0_i32, %c0_i32_0 : i32, i32
  }
  func.func @transform_4(%arg0: i32) -> (i32, i32) {
    %c0_i32 = arith.constant 0 : i32
    %c0_i32_0 = arith.constant 0 : i32
    %c0_i32_1 = arith.constant 0 : i32
    return %c0_i32, %c0_i32_0 : i32, i32
  }
  func.func @transform_5(%arg0: i32) -> (i32, i32) {
    %c0_i32 = arith.constant 0 : i32
    %c0_i32_0 = arith.constant 0 : i32
    %c0_i32_1 = arith.constant 0 : i32
    return %c0_i32, %c0_i32_0 : i32, i32
  }
  func.func @transform_6(%arg0: i32) -> (i32, i32) {
    %c0_i32 = arith.constant 0 : i32
    %c0_i32_0 = arith.constant 0 : i32
    %c0_i32_1 = arith.constant 0 : i32
    return %c0_i32, %c0_i32_0 : i32, i32
  }
  func.func @transform_7(%arg0: i32) -> (i32, i32) {
    %c0_i32 = arith.constant 0 : i32
    %c0_i32_0 = arith.constant 0 : i32
    %c0_i32_1 = arith.constant 0 : i32
    return %c0_i32, %c0_i32_0 : i32, i32
  }
  func.func @transform_8(%arg0: i32) -> (i32, i32) {
    %c0_i32 = arith.constant 0 : i32
    %c0_i32_0 = arith.constant 0 : i32
    %c0_i32_1 = arith.constant 0 : i32
    return %c0_i32, %c0_i32_0 : i32, i32
  }
  func.func @transform_9(%arg0: i32) -> (i32, i32, i32) {
    %c0_i32 = arith.constant 0 : i32
    %c0_i32_0 = arith.constant 0 : i32
    %c0_i32_1 = arith.constant 0 : i32
    return %arg0, %c0_i32, %c0_i32_0 : i32, i32, i32
  }
}

</mosaic_0001>

<bundles_post_ra>
// kernel: embedding_net_forward.1
= control target key start
LH: loop header
LB: loop body
LE: loop exit
PB: predicated region body
PF: predicated region fallthrough
CT: control target
= control target key end

     0   :  { %s7896_s30 = smov 0   ;;  %s10354_s0 = inlined_call_operand.vmem [shape: bf16[512,128], index: 0, kind: input, shape index: {}]   ;;  %s10355_s1 = inlined_call_operand.vmem [shape: bf16[128,128], index: 1, kind: input, shape index: {}]   ;;  %s10356_s2 = inlined_call_operand.vmem [shape: f32[1,128], index: 2, kind: input, shape index: {}]   ;;  %s10357_s3 = inlined_call_operand.vmem [shape: bf16[1152,128], index: 3, kind: input, shape index: {}]   ;;  %s10358_s4 = inlined_call_operand.vmem [shape: f32[1,128], index: 4, kind: input, shape index: {}]   ;;  %s10359_s5 = inlined_call_operand.vmem [shape: bf16[1152,128], index: 5, kind: input, shape index: {}]   ;;  %s10360_s6 = inlined_call_operand.vmem [shape: f32[1,128], index: 6, kind: input, shape index: {}]   ;;  %s10361_s7 = inlined_call_operand.vmem [shape: bf16[128,1024], index: 7, kind: input, shape index: {}]   ;;  %s10362_s8 = inlined_call_operand.vmem [shape: f32[1,1024], index: 8, kind: input, shape index: {}]   ;;  %s10363_s9 = inlined_call_operand.vmem [shape: f32[2,1,1024], index: 9, kind: output, shape index: {}]  }
   0x1 LB: > { %s7902_s10 = sadd.s32 4294967295, %s7839_s30   ;;  %p5722_p0 = scmp.ge.s32.totalorder %s7839_s30, 1  ;;  %s7839_s30 = sphi %s7896_s30, %s19_s30  }
   0x2   : > { %p288_p1 = scmp.lt.s32.totalorder %s7839_s30, 3 }
   0x4   : > { %p289_p2 = pnand %p5722_p0, %p288_p1 }
   0x6   : > { %292 = sbr.rel (%p289_p2) target bundleno = 1589 (0x635), region = 56 }
   0xd   : > { %v7663_v0 = vld [vmem:[%s10355_s1] sm:$0xff]   ;;  %s5723_s13 = sshll.u32 %s7902_s10, 5  ;;  %v7664_v1 = vld [vmem:[%s10355_s1 + $0x8] sm:$0xff]   ;;  %v7665_v2 = vld [vmem:[%s10355_s1 + $0x10] sm:$0xff]   ;;  %v7841_v44 = vmov 0.0   ;;  %v334_v47 = vlaneseq  ;;  %v7842_v58 = vmov 0.0|0.0  }
   0xe   : > { %p324_p3 = scmp.lt.s32.totalorder %s5723_s13, 63  ;;  %7507 = vmatprep.subr.bf16.mxu0 %v7663_v0  ;;  %v7666_v3 = vld [vmem:[%s10355_s1 + $0x18] sm:$0xff]   ;;  %v7667_v5 = vld [vmem:[%s10355_s1 + $0x20] sm:$0xff]   ;;  %v7668_v6 = vld [vmem:[%s10355_s1 + $0x28] sm:$0xff]   ;;  %816 = vst [vmem:[#allocation2 + $0x8] sm:$0xff] %v7841_v44  ;;  %2274 = vmatprep.mubr.bf16.mxu1 %v7842_v58  ;;  %vm7843_vm1 = vmmov 1  }
   0xf   : > { %7508 = vmatpush3.bf16.msra.mxu0 %v7663_v0  ;;  %v7669_v7 = vld [vmem:[%s10355_s1 + $0x30] sm:$0xff]   ;;  %v7670_v8 = vld [vmem:[%s10355_s1 + $0x38] sm:$0xff]   ;;  %v7687_v9 = vld [vmem:[%s10357_s3 + $0x40] sm:$0xff]   ;;  %817 = vst [vmem:[#allocation2 + $0x10] sm:$0xff] %v7841_v44  ;;  %v8024_v50 = vshrl.u32 %v334_v47, 7  ;;  %v10555_v59 = vmov 0 }
  0x10   : > { %s10861_s13 = smov (!%p324_p3, %s5723_s13), 63  ;;  %7509 = vmatprep.subr.bf16.mxu0 %v7664_v1  ;;  %v7688_v10 = vld [vmem:[%s10357_s3] sm:$0xff]   ;;  %6563 = vmatprep.subr.bf16.mxu1 %v7687_v9  ;;  %v7689_v11 = vld [vmem:[%s10357_s3 + $0x48] sm:$0xff]   ;;  %v7691_v14 = vld [vmem:[%s10357_s3 + $0x50] sm:$0xff]   ;;  %815 = vst [vmem:[#allocation2] sm:$0xff] %v7841_v44  ;;  %p329_p4 = scmp.lt.s32.totalorder %s7902_s10, 1 }
  0x11   : > { %s5724_s18 = sshll.u32 %s10861_s13, 2  ;;  %6564 = vmatpush3.bf16.msra.mxu1 %v7688_v10  ;;  %v7690_v12 = vld [vmem:[%s10357_s3 + $0x8] sm:$0xff]   ;;  %v7692_v16 = vld [vmem:[%s10357_s3 + $0x10] sm:$0xff]   ;;  %v7693_v17 = vld [vmem:[%s10357_s3 + $0xc0] sm:$0xff]   ;;  %818 = vst [vmem:[#allocation2 + $0x118] sm:$0xff] %v7841_v44  ;;  %v371_v53 = vand.u32 15, %v8024_v50 }
  0x12   : > { %s7919_s21 = scalar_lea.vmem %s10354_s0, %s5724_s18  ;;  %6565 = vmatprep.subr.bf16.mxu1 %v7689_v11  ;;  %v7694_v18 = vld [vmem:[%s10357_s3 + $0x58] sm:$0xff]   ;;  %v7695_v19 = vld [vmem:[%s10357_s3 + $0x80] sm:$0xff]   ;;  %v7697_v21 = vld [vmem:[%s10357_s3 + $0xc8] sm:$0xff]   ;;  %819 = vst [vmem:[#allocation2 + $0x120] sm:$0xff] %v7841_v44  ;;  %v339_v47 = vadd.s32 32, %v8024_v50  ;;  %s10863_s10 = smov (!%p329_p4, %s7902_s10), 1 }
  0x13   : > { %7510 = vmatpush3.bf16.msra.mxu0 %v7664_v1  ;;  %v7671_v4 = vld [vmem:[%s7919_s21] sm:$0xff]   ;;  %v7672_v13 = vld [vmem:[%s7919_s21 + $0x8] sm:$0xff]   ;;  %v7673_v15 = vld [vmem:[%s7919_s21 + $0x10] sm:$0xff]   ;;  %820 = vst [vmem:[#allocation2 + $0x128] sm:$0xff] %v7841_v44  ;;  %vm751_vm0 = vcmp.ge.s32.totalorder %v371_v53, 1 }
  0x14   : > { %7511 = vmatprep.subr.bf16.mxu0 %v7665_v2  ;;  %7523 = vmatprep.mubr.bf16.mxu0 %v7671_v4  ;;  %v7696_v20 = vld [vmem:[%s10357_s3 + $0x18] sm:$0xff]   ;;  %v7698_v22 = vld [vmem:[%s10357_s3 + $0x60] sm:$0xff]   ;;  %v7699_v24 = vld [vmem:[%s10357_s3 + $0x88] sm:$0xff]   ;;  %10554 = vst [vmem:[#allocation3_spill] sm:$0xff] %v8024_v50 }
  0x15   : > { %6566 = vmatpush3.bf16.msra.mxu1 %v7690_v12  ;;  %v7674_v23 = vld [vmem:[%s7919_s21 + $0x18] sm:$0xff]   ;;  %v7675_v25 = vld [vmem:[%s7919_s21 + $0x20] sm:$0xff]   ;;  %v7701_v27 = vld [vmem:[%s10357_s3 + $0xd0] sm:$0xff]  }
  0x16   : > { %6567 = vmatprep.subr.bf16.mxu1 %v7691_v14  ;;  %v7700_v26 = vld [vmem:[%s10357_s3 + $0x20] sm:$0xff]   ;;  %v7702_v28 = vld [vmem:[%s10357_s3 + $0x68] sm:$0xff]   ;;  %v7703_v29 = vld [vmem:[%s10357_s3 + $0x90] sm:$0xff]  }
  0x17   : > { %7512 = vmatpush3.bf16.msra.mxu0 %v7665_v2  ;;  %v7704_v30 = vld [vmem:[%s10357_s3 + $0x28] sm:$0xff]   ;;  %v7705_v31 = vld [vmem:[%s10357_s3 + $0xd8] sm:$0xff]   ;;  %v7677_v33 = vld [vmem:[%s7919_s21 + $0x30] sm:$0xff]  }
  0x18   : > { %7513 = vmatprep.subr.bf16.mxu0 %v7666_v3  ;;  %v7676_v32 = vld [vmem:[%s7919_s21 + $0x28] sm:$0xff]   ;;  %v7678_v34 = vld [vmem:[%s7919_s21 + $0x38] sm:$0xff]   ;;  %v7679_v35 = vld [vmem:[%s7919_s21 + $0x40] sm:$0xff]  }
  0x19   : > { %6568 = vmatpush3.bf16.msra.mxu1 %v7692_v16  ;;  %v7680_v36 = vld [vmem:[%s7919_s21 + $0x48] sm:$0xff]   ;;  %v7681_v37 = vld [vmem:[%s7919_s21 + $0x50] sm:$0xff]   ;;  %v7682_v38 = vld [vmem:[%s7919_s21 + $0x58] sm:$0xff]  }
  0x1a   : > { %6569 = vmatprep.subr.bf16.mxu1 %v7694_v18  ;;  %v7683_v39 = vld [vmem:[%s7919_s21 + $0x60] sm:$0xff]   ;;  %v7684_v40 = vld [vmem:[%s7919_s21 + $0x68] sm:$0xff]   ;;  %v7685_v41 = vld [vmem:[%s7919_s21 + $0x70] sm:$0xff]  }
  0x1b   : > { %7514 = vmatpush3.bf16.msra.mxu0 %v7666_v3  ;;  %v7686_v42 = vld [vmem:[%s7919_s21 + $0x78] sm:$0xff]   ;;  %v7706_v43 = vld [vmem:[%s10357_s3 + $0x70] sm:$0xff]   ;;  %v7709_v48 = vld [vmem:[%s10357_s3 + $0xe0] sm:$0xff]   ;;  %s5725_s21 = sshll.u32 %s10863_s10, 3 }
  0x1c   : > { %7515 = vmatprep.subr.bf16.mxu0 %v7667_v5  ;;  %v7707_v45 = vld [vmem:[%s10357_s3 + $0x98] sm:$0xff]   ;;  %v7708_v46 = vld [vmem:[%s10357_s3 + $0x30] sm:$0xff]   ;;  %v7711_v51 = vld [vmem:[%s10357_s3 + $0xa0] sm:$0xff]   ;;  %s332_s24 = scalar_lea.vmem %s10363_s9, %s5725_s21 }
  0x1d   : > { %6570 = vmatpush3.bf16.msra.mxu1 %v7696_v20  ;;  %v7710_v49 = vld [vmem:[%s10357_s3 + $0x78] sm:$0xff]   ;;  %v1245_v54 = vld [vmem:[#allocation2 + $0x7] sm:$0xff]  ;;  %v1246_v55 = vld [vmem:[#allocation2 + $0xf] sm:$0xff] }
  0x1e   : > { %6571 = vmatprep.subr.bf16.mxu1 %v7698_v22  ;;  %v7712_v52 = vld [vmem:[%s10357_s3 + $0x38] sm:$0xff]   ;;  %v7713_v56 = vld [vmem:[%s10357_s3 + $0xe8] sm:$0xff]   ;;  %v5825_v57 = vpack.c.bf16 %v1246_v55, %v1245_v54  ;;  %vm8037_vm2 = vmpackc.low %vm7843_vm1, %vm751_vm0  ;;  %v10567_v55 = vmov 0 }
  0x1f   : > { %7516 = vmatpush3.bf16.msra.mxu0 %v7667_v5  ;;  %v10556_v59 = vsel %vm8037_vm2, 4294967295, %v10555_v59  ;;  %v7714_v60 = vld [vmem:[%s10357_s3 + $0xa8] sm:$0xff]   ;;  %v7716_v61 = vld [vmem:[%s10357_s3 + $0xf0] sm:$0xff]   ;;  %v7719_v63 = vld [vmem:[%s10357_s3 + $0xf8] sm:$0xff]  }
  0x20   : > { %7517 = vmatprep.subr.bf16.mxu0 %v7668_v6  ;;  %v7718_v62 = vld [vmem:[%s10357_s3 + $0xb0] sm:$0xff]   ;;  %v7720_v0 = vld [vmem:[%s10357_s3 + $0xb8] sm:$0xff]   ;;  %v7715_v1 = vld [vmem:[%s10357_s3 + $0x140] sm:$0xff]  }
  0x21   : > { %6572 = vmatpush3.bf16.msra.mxu1 %v7700_v26  ;;  %v7717_v2 = vld [vmem:[%s10357_s3 + $0x100] sm:$0xff]   ;;  %v7721_v3 = vld [vmem:[%s10357_s3 + $0x148] sm:$0xff]   ;;  %v7723_v5 = vld [vmem:[%s10357_s3 + $0x150] sm:$0xff]  }
  0x22   : > { %6573 = vmatprep.subr.bf16.mxu1 %v7702_v28  ;;  %v7722_v4 = vld [vmem:[%s10357_s3 + $0x108] sm:$0xff]   ;;  %v7727_v9 = vld [vmem:[%s10357_s3 + $0x160] sm:$0xff]   ;;  %v7732_v14 = vld [vmem:[%s10357_s3 + $0x130] sm:$0xff]  }
  0x23   : > { %7518 = vmatpush3.bf16.msra.mxu0 %v7668_v6  ;;  %v7724_v6 = vld [vmem:[%s10357_s3 + $0x110] sm:$0xff]   ;;  %v7728_v10 = vld [vmem:[%s10357_s3 + $0x120] sm:$0xff]   ;;  %v7729_v11 = vld [vmem:[%s10357_s3 + $0x168] sm:$0xff]  }
  0x24   : > { %7519 = vmatprep.subr.bf16.mxu0 %v7669_v7  ;;  %v7730_v12 = vld [vmem:[%s10357_s3 + $0x128] sm:$0xff]   ;;  %v7737_v16 = vld [vmem:[%s10357_s3 + $0x178] sm:$0xff]   ;;  %v8112_v18 = vld [vmem:[%s10356_s2] ss:$0 sm:$0xff] }
  0x25   : > { %6574 = vmatpush3.bf16.msra.mxu1 %v7704_v30  ;;  %v8126_v30 = vld [vmem:[%s10357_s3 + $0x200] sm:$0xff]  }
  0x26   : > { %6575 = vmatprep.subr.bf16.mxu1 %v7706_v43 }
  0x27   : > { %7520 = vmatpush3.bf16.msra.mxu0 %v7669_v7  ;;  %v7725_v7 = vld [vmem:[%s10357_s3 + $0x158] sm:$0xff]  }
  0x28   : > { %7521 = vmatprep.subr.bf16.mxu0 %v7670_v8 }
  0x29   : > { %6576 = vmatpush3.bf16.msra.mxu1 %v7708_v46 }
  0x2a   : > { %6577 = vmatprep.subr.bf16.mxu1 %v7710_v49 }
  0x2b   : > { %7522 = vmatpush3.bf16.msra.mxu0 %v7670_v8  ;;  %v7726_v8 = vld [vmem:[%s10357_s3 + $0x118] sm:$0xff]  }
  0x2c   : > { %6675 = vmatprep.subr.bf16.mxu0 %v7693_v17  ;;  %v7738_v17 = vld [vmem:[%s10357_s3 + $0x138] sm:$0xff]  }
  0x2d   : > { %6578 = vmatpush3.bf16.msra.mxu1 %v7712_v52  ;;  %v338_v52 = vadd.s32 24, %v8024_v50 }
  0x2e   : > { %7524 = vmatmul.mubr.bf16.vlgmr.msra.gmra.mrb[0].mxu0 %v7672_v13  ;;  %6787 = vmatprep.subr.bf16.mxu1 %v7715_v1  ;;  %v7731_v13 = vld [vmem:[%s10357_s3 + $0x170] sm:$0xff]   ;;  %v7734_v1 = vld [vmem:[%s10357_s3 + $0x180] sm:$0xff]  }
  0x2f   : > { %7527 = vmatprep.mubr.bf16.mxu0 %v7673_v15  ;;  %6676 = vmatpush3.bf16.msra.mxu0 %v7695_v19  ;;  %v7733_v15 = vld [vmem:[%s10357_s3 + $0x1c0] sm:$0xff]  }
  0x30   : > { %6677 = vmatprep.subr.bf16.mxu0 %v7697_v21  ;;  %5826 = vmatmul.mubr.msk.bf16.vlgmr.msra.gmra.mrb[0].mxu1 %vm8037_vm2, %v5825_v57 }
  0x31   : > { %6788 = vmatpush3.bf16.msra.mxu1 %v7717_v2 }
  0x32   : > { %6789 = vmatprep.subr.bf16.mxu1 %v7721_v3 }
  0x33   : > { %6678 = vmatpush3.bf16.msra.mxu0 %v7699_v24 }
  0x34   : > { %6679 = vmatprep.subr.bf16.mxu0 %v7701_v27  ;;  %v337_v27 = vadd.s32 16, %v8024_v50 }
  0x35   : > { %6790 = vmatpush3.bf16.msra.mxu1 %v7722_v4 }
  0x36   : > { %7528 = vmatmul.mubr.bf16.gmra.mrb[4].mxu0 %v7674_v23  ;;  %6791 = vmatprep.subr.bf16.mxu1 %v7723_v5 }
  0x37   : > { %7531 = vmatprep.mubr.bf16.mxu0 %v7675_v25  ;;  %6680 = vmatpush3.bf16.msra.mxu0 %v7703_v29 }
  0x38   : > { %6681 = vmatprep.subr.bf16.mxu0 %v7705_v31 }
  0x39   : > { %6792 = vmatpush3.bf16.msra.mxu1 %v7724_v6  ;;  %v392_v6 = vand.u32 15, %v338_v52 }
  0x3a   : > { %6793 = vmatprep.subr.bf16.mxu1 %v7725_v7  ;;  %v7735_v7 = vld [vmem:[%s10357_s3 + $0x1c8] sm:$0xff]  }
  0x3b   : > { %6682 = vmatpush3.bf16.msra.mxu0 %v7707_v45  ;;  %vm786_vm8 = vcmp.le.s32.totalorder %v392_v6, 14 }
  0x3c   : > { %6683 = vmatprep.subr.bf16.mxu0 %v7709_v48  ;;  %vm8235_vm10 = vmpackc.low %vm786_vm8, %vm7843_vm1 }
  0x3d   : > { %6794 = vmatpush3.bf16.msra.mxu1 %v7726_v8 }
  0x3e   : > { %7532 = vmatmul.mubr.bf16.gmra.mrb[8].mxu0 %v7676_v32  ;;  %6795 = vmatprep.subr.bf16.mxu1 %v7727_v9  ;;  %v336_v32 = vadd.s32 8, %v8024_v50 }
  0x3f   : > { %7535 = vmatprep.mubr.bf16.mxu0 %v7677_v33  ;;  %6684 = vmatpush3.bf16.msra.mxu0 %v7711_v51  ;;  %v1373_v51 = vld [vmem:[#allocation2 + $0x9] sm:$0xff] }
  0x40   : > { %6685 = vmatprep.subr.bf16.mxu0 %v7713_v56 }
  0x41   : > { %6796 = vmatpush3.bf16.msra.mxu1 %v7728_v10 }
  0x42   : > { %6797 = vmatprep.subr.bf16.mxu1 %v7729_v11 }
  0x43   : > { %6686 = vmatpush3.bf16.msra.mxu0 %v7714_v60 }
  0x44   : > { %6687 = vmatprep.subr.bf16.mxu0 %v7716_v61 }
  0x45   : > { %6798 = vmatpush3.bf16.msra.mxu1 %v7730_v12 }
  0x46   : > { %7536 = vmatmul.mubr.bf16.gmra.mrb[12].mxu0 %v7678_v34  ;;  %6799 = vmatprep.subr.bf16.mxu1 %v7731_v13  ;;  %v385_v34 = vand.u32 15, %v337_v27  ;;  %v10577_v27 = vmov 0 }
  0x47   : > { %7539 = vmatprep.mubr.bf16.mxu0 %v7679_v35  ;;  %6688 = vmatpush3.bf16.msra.mxu0 %v7718_v62 }
  0x48   : > { %6689 = vmatprep.subr.bf16.mxu0 %v7719_v63  ;;  %vm753_vm3 = vcmp.ge.s32.totalorder %v385_v34, 1 }
  0x49   : > { %6800 = vmatpush3.bf16.msra.mxu1 %v7732_v14  ;;  %vm8164_vm5 = vmpackc.low %vm7843_vm1, %vm753_vm3 }
  0x4a   : > { %6801 = vmatprep.subr.bf16.mxu1 %v7737_v16  ;;  %v10568_v55 = vsel %vm8164_vm5, 4294967295, %v10567_v55 }
  0x4b   : > { %6690 = vmatpush3.bf16.msra.mxu0 %v7720_v0  ;;  %v399_v0 = vand.u32 15, %v339_v47 }
  0x4c   : > { %6899 = vmatprep.subr.bf16.mxu0 %v7733_v15 }
  0x4d   : > { %6802 = vmatpush3.bf16.msra.mxu1 %v7738_v17  ;;  %vm8207_vm7 = vcmp.ge.s32.totalorder %v399_v0, 1  ;;  %v341_v17 = vadd.s32 48, %v8024_v50  ;;  %v342_v0 = vadd.s32 56, %v8024_v50 }
  0x4e   : > { %7540 = vmatmul.mubr.bf16.gmra.mrb[16].mxu0 %v7680_v36  ;;  %7555 = vmatprep.subr.bf16.mxu1 %v8126_v30  ;;  %vm8229_vm9 = vmpackc.low %vm7843_vm1, %vm8207_vm7 }
  0x4f   : > { %7543 = vmatprep.mubr.bf16.mxu0 %v7681_v37  ;;  %v10578_v27 = vsel %vm8229_vm9, 4294967295, %v10577_v27 }
  0x50   : > { %10579 = vst [vmem:[#allocation16_spill] sm:$0xff] %v10578_v27 }
  0x56   : > { %7544 = vmatmul.mubr.bf16.gmra.mrb[20].mxu0 %v7682_v38 }
  0x57   : > { %7547 = vmatprep.mubr.bf16.mxu0 %v7683_v39  ;;  %v378_v39 = vand.u32 15, %v336_v32 }
  0x59   : > { %vm8155_vm4 = vcmp.le.s32.totalorder %v378_v39, 14 }
  0x5a   : > { %vm8173_vm6 = vmpackc.low %vm8155_vm4, %vm7843_vm1 }
  0x5e   : > { %7548 = vmatmul.mubr.bf16.gmra.mrb[24].mxu0 %v7684_v40 }
  0x5f   : > { %7551 = vmatprep.mubr.bf16.mxu0 %v7685_v41 }
  0x66   : > { %7552 = vmatmul.mubr.bf16.gmra.mrb[28].mxu0 %v7686_v42 }
 0x101   : > { %v7525_v19 = vpop.f32.mrb[0].mxu0 }
 0x102   : > { %v1063_v20 = vadd.f32 %v7525_v19, %v8112_v18  ;;  %v1054_v21 = vpop.f32.mrb[1].mxu0  ;;  %v7736_v19 = vld [vmem:[%s10357_s3 + $0x188] sm:$0xff]  }
 0x103   : > { %v1055_v22 = vadd.f32 %v8112_v18, %v1054_v21  ;;  %v7526_v23 = vpop.f32.mrb[2].mxu0  ;;  %v340_v21 = vadd.s32 40, %v8024_v50 }
 0x104   : > { %v8116_v24 = vmax.f32 %v1063_v20, 0.0  ;;  %v1066_v25 = vadd.f32 %v7526_v23, %v8112_v18  ;;  %v1057_v26 = vpop.f32.mrb[3].mxu0 }
 0x105   : > { %v8120_v28 = vmax.f32 %v1055_v22, 0.0  ;;  %v1058_v29 = vadd.f32 %v8112_v18, %v1057_v26  ;;  %v7739_v22 = vld [vmem:[%s10357_s3 + $0x1d0] sm:$0xff]  }
 0x106   : > { %10557 = vst [vmem:[#allocation4_spill] sm:$0xff] %v8116_v24  ;;  %1215 = vst [vmem:[#allocation2 + $0x28] sm:$0xff] %v8116_v24  ;;  %v8129_v31 = vmax.f32 %v1066_v25, 0.0 }
 0x107   : > { %10558 = vst [vmem:[#allocation5_spill] sm:$0xff] %v8120_v28  ;;  %1213 = vst [vmem:[#allocation2 + $0x18] sm:$0xff] %v8120_v28  ;;  %v8133_v33 = vmax.f32 %v1058_v29, 0.0 }
 0x108   : > { %10559 = vst [vmem:[#allocation6_spill] sm:$0xff] %v8129_v31  ;;  %1216 = vst [vmem:[#allocation2 + $0x30] sm:$0xff] %v8129_v31  ;;  %v8183_v5 = vpack.c.bf16 %v8129_v31, %v8116_v24 }
 0x109   : > { %10560 = vst [vmem:[#allocation7_spill] sm:$0xff] %v8133_v33  ;;  %1214 = vst [vmem:[#allocation2 + $0x20] sm:$0xff] %v8133_v33  ;;  %v7529_v35 = vpop.f32.mrb[4].mxu0  ;;  %v8140_v36 = vpack.c.bf16 %v8133_v33, %v8120_v28 }
 0x10a   : > { %v1079_v37 = vadd.f32 %v7529_v35, %v8112_v18  ;;  %v1070_v38 = vpop.f32.mrb[5].mxu0  ;;  %v413_v35 = vand.u32 15, %v341_v17 }
 0x10b   : > { %v1071_v40 = vadd.f32 %v8112_v18, %v1070_v38  ;;  %v7530_v41 = vpop.f32.mrb[6].mxu0  ;;  %2282 = vmatprep.mubr.bf16.mxu1 %v8140_v36 }
 0x10c   : > { %v8145_v42 = vmax.f32 %v1079_v37, 0.0  ;;  %v1082_v43 = vadd.f32 %v7530_v41, %v8112_v18  ;;  %v1073_v44 = vpop.f32.mrb[7].mxu0  ;;  %v7740_v37 = vld [vmem:[%s10357_s3 + $0x190] sm:$0xff]   ;;  %vm757_vm11 = vcmp.ge.s32.totalorder %v413_v35, 1 }
 0x10d   : > { %v8148_v45 = vmax.f32 %v1071_v40, 0.0  ;;  %v1074_v46 = vadd.f32 %v8112_v18, %v1073_v44  ;;  %v406_v44 = vand.u32 15, %v340_v21  ;;  %vm8287_vm13 = vmpackc.low %vm7843_vm1, %vm757_vm11 }
 0x10e   : > { %10561 = vst [vmem:[#allocation8_spill] sm:$0xff] %v8145_v42  ;;  %1219 = vst [vmem:[#allocation2 + $0x48] sm:$0xff] %v8145_v42  ;;  %v8153_v48 = vmax.f32 %v1082_v43, 0.0  ;;  %v1247_v54 = vld [vmem:[#allocation2 + $0x17] sm:$0xff] }
 0x10f   : > { %10562 = vst [vmem:[#allocation9_spill] sm:$0xff] %v8148_v45  ;;  %1217 = vst [vmem:[#allocation2 + $0x38] sm:$0xff] %v8148_v45  ;;  %v8161_v53 = vmax.f32 %v1074_v46, 0.0  ;;  %v1374_v56 = vld [vmem:[#allocation2 + $0x11] sm:$0xff]  ;;  %vm788_vm12 = vcmp.le.s32.totalorder %v406_v44, 14 }
 0x110   : > { %10563 = vst [vmem:[#allocation10_spill] sm:$0xff] %v8153_v48  ;;  %1220 = vst [vmem:[#allocation2 + $0x50] sm:$0xff] %v8153_v48  ;;  %v1248_v57 = vld [vmem:[#allocation2 + $0x1f] sm:$0xff]  ;;  %v1249_v58 = vld [vmem:[#allocation2 + $0x27] sm:$0xff]  ;;  %v5876_v4 = vpack.c.bf16 %v1374_v56, %v1373_v51  ;;  %v8304_v17 = vpack.c.bf16 %v8153_v48, %v8145_v42 }
 0x111   : > { %10566 = vst [vmem:[#allocation11_spill] sm:$0xff] %v8161_v53  ;;  %v1250_v60 = vld [vmem:[#allocation2 + $0x2f] sm:$0xff]  ;;  %1218 = vst [vmem:[#allocation2 + $0x40] sm:$0xff] %v8161_v53  ;;  %v7533_v61 = vpop.f32.mrb[8].mxu0  ;;  %v5828_v62 = vpack.c.bf16 %v1248_v57, %v1247_v54  ;;  %v1375_v25 = vld [vmem:[#allocation2 + $0x19] sm:$0xff]  ;;  %v8247_v43 = vpack.c.bf16 %v8161_v53, %v8148_v45 }
 0x112   : > { %v1095_v2 = vadd.f32 %v7533_v61, %v8112_v18  ;;  %v1086_v3 = vpop.f32.mrb[9].mxu0  ;;  %v8193_v10 = vpack.c.bf16 %v1250_v60, %v1249_v58  ;;  %v1376_v26 = vld [vmem:[#allocation2 + $0x21] sm:$0xff]  ;;  %v7741_v46 = vld [vmem:[%s10357_s3 + $0x1d8] sm:$0xff]   ;;  %v343_v60 = vadd.s32 64, %v8024_v50  ;;  %vm8293_vm14 = vmpackc.low %vm788_vm12, %vm7843_vm1 }
 0x113   : > { %v1087_v8 = vadd.f32 %v8112_v18, %v1086_v3  ;;  %v7534_v9 = vpop.f32.mrb[10].mxu0  ;;  %5874 = vmatprep.mubr.msk.bf16.mxu0 %vm8037_vm2, %v5828_v62  ;;  %5829 = vmatmul.mubr.msk.bf16.gmra.mrb[4].mxu1 %vm8164_vm5, %v5828_v62  ;;  %v8242_v38 = vpack.c.bf16 %v1376_v26, %v1375_v25  ;;  %v7742_v61 = vld [vmem:[%s10357_s3 + $0x198] sm:$0xff]   ;;  %v7745_v25 = vld [vmem:[%s10357_s3 + $0x1e8] sm:$0xff]  }
 0x114   : > { %v8195_v11 = vmax.f32 %v1095_v2, 0.0  ;;  %v1098_v12 = vadd.f32 %v7534_v9, %v8112_v18  ;;  %v1089_v13 = vpop.f32.mrb[11].mxu0  ;;  %5877 = vmatmul.mubr.msk.bf16.vlgmr.msra.gmra.mrb[32].mxu0 %vm8173_vm6, %v5876_v4  ;;  %2290 = vmatprep.mubr.bf16.mxu1 %v8183_v5  ;;  %v10586_v4 = vmov 0  ;;  %v10589_v9 = vmov 0 }
 0x115   : > { %v8201_v14 = vmax.f32 %v1087_v8, 0.0  ;;  %v1090_v15 = vadd.f32 %v8112_v18, %v1089_v13  ;;  %5880 = vmatprep.mubr.msk.bf16.mxu0 %vm8164_vm5, %v8193_v10  ;;  %6900 = vmatpush3.bf16.msra.mxu0 %v7734_v1  ;;  %v7743_v1 = vld [vmem:[%s10357_s3 + $0x1e0] sm:$0xff]   ;;  %v10587_v4 = vsel %vm8287_vm13, 4294967295, %v10586_v4  ;;  %v1377_v8 = vld [vmem:[#allocation2 + $0x29] sm:$0xff]  ;;  %v10590_v9 = vsel %vm8293_vm14, 4294967295, %v10589_v9 }
 0x116   : > { %10571 = vst [vmem:[#allocation12_spill] sm:$0xff] %v8195_v11  ;;  %1223 = vst [vmem:[#allocation2 + $0x68] sm:$0xff] %v8195_v11  ;;  %v8216_v20 = vmax.f32 %v1098_v12, 0.0  ;;  %6901 = vmatprep.subr.bf16.mxu0 %v7735_v7  ;;  %v1251_v39 = vld [vmem:[#allocation2 + $0x37] sm:$0xff]  ;;  %v427_v12 = vand.u32 15, %v343_v60 }
 0x117   : > { %10572 = vst [vmem:[#allocation13_spill] sm:$0xff] %v8201_v14  ;;  %1221 = vst [vmem:[#allocation2 + $0x58] sm:$0xff] %v8201_v14  ;;  %v8223_v23 = vmax.f32 %v1090_v15, 0.0  ;;  %v1378_v3 = vld [vmem:[#allocation2 + $0x31] sm:$0xff]  ;;  %v7744_v15 = vld [vmem:[%s10357_s3 + $0x1a0] sm:$0xff]  }
 0x118   : > { %10575 = vst [vmem:[#allocation14_spill] sm:$0xff] %v8216_v20  ;;  %1224 = vst [vmem:[#allocation2 + $0x70] sm:$0xff] %v8216_v20  ;;  %v1252_v29 = vld [vmem:[#allocation2 + $0x3f] sm:$0xff]  ;;  %v1253_v6 = vld [vmem:[#allocation2 + $0x47] sm:$0xff]  ;;  %v8300_v16 = vpack.c.bf16 %v1378_v3, %v1377_v8  ;;  %vm8326_vm15 = vcmp.ge.s32.totalorder %v427_v12, 1  ;;  %v10600_v3 = vmov 0 }
 0x119   : > { %10576 = vst [vmem:[#allocation15_spill] sm:$0xff] %v8223_v23  ;;  %1222 = vst [vmem:[#allocation2 + $0x60] sm:$0xff] %v8223_v23  ;;  %v7537_v34 = vpop.f32.mrb[12].mxu0  ;;  %6902 = vmatpush3.bf16.msra.mxu0 %v7736_v19  ;;  %v8255_v47 = vpack.c.bf16 %v1252_v29, %v1251_v39  ;;  %v1254_v7 = vld [vmem:[#allocation2 + $0x4f] sm:$0xff]  ;;  %v420_v19 = vand.u32 15, %v342_v0  ;;  %v1380_v60 = vld [vmem:[#allocation2 + $0x41] sm:$0xff] }
 0x11a   : > { %v1111_v40 = vadd.f32 %v7537_v34, %v8112_v18  ;;  %v1102_v41 = vpop.f32.mrb[13].mxu0  ;;  %6903 = vmatprep.subr.bf16.mxu0 %v7739_v22  ;;  %10588 = vst [vmem:[#allocation21_spill] sm:$0xff] %v10587_v4  ;;  %v8313_v26 = vpack.c.bf16 %v1254_v7, %v1253_v6  ;;  %vm8350_vm3 = vmpackc.low %vm7843_vm1, %vm8326_vm15  ;;  %v10597_v0 = vmov 0  ;;  %v7749_v8 = vld [vmem:[%s10357_s3 + $0x1b0] sm:$0xff]  }
 0x11b   : > { %5832 = vmatmul.mubr.msk.bf16.gmra.mrb[8].mxu1 %vm8229_vm9, %v8193_v10  ;;  %v1103_v49 = vadd.f32 %v8112_v18, %v1102_v41  ;;  %v7538_v51 = vpop.f32.mrb[14].mxu0  ;;  %vm790_vm0 = vcmp.le.s32.totalorder %v420_v19, 14  ;;  %v10598_v0 = vsel %vm8350_vm3, 4294967295, %v10597_v0 }
 0x11c   : > { %5883 = vmatmul.mubr.msk.bf16.gmra.mrb[36].mxu0 %vm8235_vm10, %v8242_v38  ;;  %v8261_v52 = vmax.f32 %v1111_v40, 0.0  ;;  %v1114_v54 = vadd.f32 %v7538_v51, %v8112_v18  ;;  %2298 = vmatprep.mubr.bf16.mxu1 %v8247_v43  ;;  %v1105_v56 = vpop.f32.mrb[15].mxu0  ;;  %10599 = vst [vmem:[#allocation26_spill] sm:$0xff] %v10598_v0  ;;  %vm8356_vm4 = vmpackc.low %vm790_vm0, %vm7843_vm1 }
 0x11d   : > { %5886 = vmatprep.mubr.msk.bf16.mxu0 %vm8229_vm9, %v8255_v47  ;;  %v8268_v57 = vmax.f32 %v1103_v49, 0.0  ;;  %v1106_v58 = vadd.f32 %v8112_v18, %v1105_v56  ;;  %6904 = vmatpush3.bf16.msra.mxu0 %v7740_v37  ;;  %v7746_v49 = vld [vmem:[%s10357_s3 + $0x1a8] sm:$0xff]   ;;  %v7748_v56 = vld [vmem:[%s10357_s3 + $0x1f0] sm:$0xff]   ;;  %v10601_v3 = vsel %vm8356_vm4, 4294967295, %v10600_v3 }
 0x11e   : > { %10582 = vst [vmem:[#allocation17_spill] sm:$0xff] %v8261_v52  ;;  %1227 = vst [vmem:[#allocation2 + $0x88] sm:$0xff] %v8261_v52  ;;  %v8276_v62 = vmax.f32 %v1114_v54, 0.0  ;;  %6905 = vmatprep.subr.bf16.mxu0 %v7741_v46  ;;  %v345_v46 = vadd.s32 80, %v8024_v50  ;;  %v344_v54 = vadd.s32 72, %v8024_v50 }
 0x11f   : > { %10583 = vst [vmem:[#allocation18_spill] sm:$0xff] %v8268_v57  ;;  %1225 = vst [vmem:[#allocation2 + $0x78] sm:$0xff] %v8268_v57  ;;  %v8283_v2 = vmax.f32 %v1106_v58, 0.0  ;;  %v1379_v58 = vld [vmem:[#allocation2 + $0x39] sm:$0xff] }
 0x120   : > { %10584 = vst [vmem:[#allocation19_spill] sm:$0xff] %v8276_v62  ;;  %1228 = vst [vmem:[#allocation2 + $0x90] sm:$0xff] %v8276_v62  ;;  %v441_v6 = vand.u32 15, %v345_v46  ;;  %v8364_v12 = vpack.c.bf16 %v1380_v60, %v1379_v58  ;;  %v434_v19 = vand.u32 15, %v344_v54  ;;  %v7751_v58 = vld [vmem:[%s10357_s3 + $0x1b8] sm:$0xff]   ;;  %v346_v60 = vadd.s32 88, %v8024_v50 }
 0x121   : > { %10585 = vst [vmem:[#allocation20_spill] sm:$0xff] %v8283_v2  ;;  %1226 = vst [vmem:[#allocation2 + $0x80] sm:$0xff] %v8283_v2  ;;  %v7541_v13 = vpop.f32.mrb[16].mxu0  ;;  %6906 = vmatpush3.bf16.msra.mxu0 %v7742_v61  ;;  %v8472_v48 = vpack.c.bf16 %v8283_v2, %v8268_v57 }
 0x122   : > { %v1127_v21 = vadd.f32 %v7541_v13, %v8112_v18  ;;  %v1118_v22 = vpop.f32.mrb[17].mxu0  ;;  %6907 = vmatprep.subr.bf16.mxu0 %v7743_v1  ;;  %v1256_v1 = vld [vmem:[#allocation2 + $0x5f] sm:$0xff]  ;;  %v1255_v13 = vld [vmem:[#allocation2 + $0x57] sm:$0xff]  ;;  %vm8390_vm7 = vcmp.ge.s32.totalorder %v441_v6, 1  ;;  %vm792_vm8 = vcmp.le.s32.totalorder %v434_v19, 14  ;;  %v1381_v6 = vld [vmem:[#allocation2 + $0x49] sm:$0xff] }
 0x123   : > { %5835 = vmatmul.mubr.msk.bf16.gmra.mrb[12].mxu1 %vm8287_vm13, %v8255_v47  ;;  %v1119_v29 = vadd.f32 %v8112_v18, %v1118_v22  ;;  %v7542_v34 = vpop.f32.mrb[18].mxu0  ;;  %vm8411_vm11 = vmpackc.low %vm7843_vm1, %vm8390_vm7  ;;  %v1257_v19 = vld [vmem:[#allocation2 + $0x67] sm:$0xff] }
 0x124   : > { %5889 = vmatmul.mubr.msk.bf16.gmra.mrb[40].mxu0 %vm8293_vm14, %v8300_v16  ;;  %2306 = vmatprep.mubr.bf16.mxu1 %v8304_v17  ;;  %v8320_v35 = vmax.f32 %v1127_v21, 0.0  ;;  %v1130_v37 = vadd.f32 %v7542_v34, %v8112_v18  ;;  %v1121_v39 = vpop.f32.mrb[19].mxu0  ;;  %vm8417_vm12 = vmpackc.low %vm792_vm8, %vm7843_vm1 }
 0x125   : > { %5892 = vmatprep.mubr.msk.bf16.mxu0 %vm8287_vm13, %v8313_v26  ;;  %v8330_v41 = vmax.f32 %v1119_v29, 0.0  ;;  %v1122_v44 = vadd.f32 %v8112_v18, %v1121_v39  ;;  %6908 = vmatpush3.bf16.msra.mxu0 %v7744_v15  ;;  %v8368_v15 = vpack.c.bf16 %v8223_v23, %v8201_v14  ;;  %v8377_v29 = vpack.c.bf16 %v1256_v1, %v1255_v13 }
 0x126   : > { %10591 = vst [vmem:[#allocation22_spill] sm:$0xff] %v8320_v35  ;;  %1231 = vst [vmem:[#allocation2 + $0xa8] sm:$0xff] %v8320_v35  ;;  %v8338_v51 = vmax.f32 %v1130_v37, 0.0  ;;  %6909 = vmatprep.subr.bf16.mxu0 %v7745_v25  ;;  %v7750_v25 = vld [vmem:[%s10357_s3 + $0x1f8] sm:$0xff]  }
 0x127   : > { %10594 = vst [vmem:[#allocation23_spill] sm:$0xff] %v8330_v41  ;;  %1229 = vst [vmem:[#allocation2 + $0x98] sm:$0xff] %v8330_v41  ;;  %v8345_v61 = vmax.f32 %v1122_v44, 0.0  ;;  %v1386_v2 = vld [vmem:[#allocation2 + $0x71] sm:$0xff] }
 0x128   : > { %10595 = vst [vmem:[#allocation24_spill] sm:$0xff] %v8338_v51  ;;  %1232 = vst [vmem:[#allocation2 + $0xb0] sm:$0xff] %v8338_v51 }
 0x129   : > { %10596 = vst [vmem:[#allocation25_spill] sm:$0xff] %v8345_v61  ;;  %1230 = vst [vmem:[#allocation2 + $0xa0] sm:$0xff] %v8345_v61  ;;  %v7545_v7 = vpop.f32.mrb[20].mxu0  ;;  %6910 = vmatpush3.bf16.msra.mxu0 %v7746_v49  ;;  %v347_v49 = vadd.s32 96, %v8024_v50 }
 0x12a   : > { %v1143_v21 = vadd.f32 %v7545_v7, %v8112_v18  ;;  %v1134_v22 = vpop.f32.mrb[21].mxu0  ;;  %6911 = vmatprep.subr.bf16.mxu0 %v7748_v56  ;;  %v1382_v7 = vld [vmem:[#allocation2 + $0x51] sm:$0xff] }
 0x12b   : > { %5838 = vmatmul.mubr.msk.bf16.gmra.mrb[16].mxu1 %vm8350_vm3, %v8313_v26  ;;  %v1135_v34 = vadd.f32 %v8112_v18, %v1134_v22  ;;  %v7546_v37 = vpop.f32.mrb[22].mxu0 }
 0x12c   : > { %5895 = vmatmul.mubr.msk.bf16.gmra.mrb[44].mxu0 %vm8356_vm4, %v8364_v12  ;;  %2314 = vmatprep.mubr.bf16.mxu1 %v8368_v15  ;;  %v8384_v39 = vmax.f32 %v1143_v21, 0.0  ;;  %v1146_v40 = vadd.f32 %v7546_v37, %v8112_v18  ;;  %v1137_v44 = vpop.f32.mrb[23].mxu0  ;;  %v1258_v21 = vld [vmem:[#allocation2 + $0x6f] sm:$0xff]  ;;  %v8422_v37 = vpack.c.bf16 %v1382_v7, %v1381_v6  ;;  %v349_v7 = vadd.s32 112, %v8024_v50 }
 0x12d   : > { %5898 = vmatprep.mubr.msk.bf16.mxu0 %vm8350_vm3, %v8377_v29  ;;  %v8395_v54 = vmax.f32 %v1135_v34, 0.0  ;;  %v1138_v56 = vadd.f32 %v8112_v18, %v1137_v44  ;;  %6912 = vmatpush3.bf16.msra.mxu0 %v7749_v8  ;;  %v10608_v8 = vmov 0  ;;  %v448_v44 = vand.u32 15, %v346_v60 }
 0x12e   : > { %10602 = vst [vmem:[#allocation27_spill] sm:$0xff] %v8384_v39  ;;  %1235 = vst [vmem:[#allocation2 + $0xc8] sm:$0xff] %v8384_v39  ;;  %v8403_v1 = vmax.f32 %v1146_v40, 0.0  ;;  %6913 = vmatprep.subr.bf16.mxu0 %v7750_v25  ;;  %v10609_v8 = vsel %vm8411_vm11, 4294967295, %v10608_v8  ;;  %v455_v25 = vand.u32 15, %v347_v49  ;;  %v8426_v40 = vpack.c.bf16 %v8216_v20, %v8195_v11 }
 0x12f   : > { %10605 = vst [vmem:[#allocation28_spill] sm:$0xff] %v8395_v54  ;;  %1233 = vst [vmem:[#allocation2 + $0xb8] sm:$0xff] %v8395_v54  ;;  %v8406_v13 = vmax.f32 %v1138_v56, 0.0  ;;  %v8432_v23 = vpack.c.bf16 %v1258_v21, %v1257_v19  ;;  %vm794_vm0 = vcmp.le.s32.totalorder %v448_v44, 14  ;;  %v10620_v44 = vmov 0 }
 0x130   : > { %10606 = vst [vmem:[#allocation29_spill] sm:$0xff] %v8403_v1  ;;  %10610 = vst [vmem:[#allocation31_spill] sm:$0xff] %v10609_v8  ;;  %vm763_vm15 = vcmp.ge.s32.totalorder %v455_v25, 1  ;;  %v10617_v25 = vmov 0 }
 0x131   : > { %10607 = vst [vmem:[#allocation30_spill] sm:$0xff] %v8406_v13  ;;  %1236 = vst [vmem:[#allocation2 + $0xd0] sm:$0xff] %v8403_v1  ;;  %v7549_v34 = vpop.f32.mrb[24].mxu0  ;;  %6914 = vmatpush3.bf16.msra.mxu0 %v7751_v58 }
 0x132   : > { %1234 = vst [vmem:[#allocation2 + $0xc0] sm:$0xff] %v8406_v13  ;;  %v1159_v46 = vadd.f32 %v7549_v34, %v8112_v18  ;;  %v1150_v56 = vpop.f32.mrb[25].mxu0  ;;  %v348_v34 = vadd.s32 104, %v8024_v50  ;;  %vm8457_vm7 = vmpackc.low %vm7843_vm1, %vm763_vm15 }
 0x133   : > { %5841 = vmatmul.mubr.msk.bf16.gmra.mrb[20].mxu1 %vm8411_vm11, %v8377_v29  ;;  %v1151_v49 = vadd.f32 %v8112_v18, %v1150_v56  ;;  %v7550_v14 = vpop.f32.mrb[26].mxu0  ;;  %v1384_v56 = vld [vmem:[#allocation2 + $0x61] sm:$0xff]  ;;  %v10618_v25 = vsel %vm8457_vm7, 4294967295, %v10617_v25  ;;  %vm8463_vm8 = vmpackc.low %vm794_vm0, %vm7843_vm1 }
 0x134   : > { %5901 = vmatmul.mubr.msk.bf16.gmra.mrb[48].mxu0 %vm8417_vm12, %v8422_v37  ;;  %2322 = vmatprep.mubr.bf16.mxu1 %v8426_v40  ;;  %v8439_v58 = vmax.f32 %v1159_v46, 0.0  ;;  %v1162_v60 = vadd.f32 %v7550_v14, %v8112_v18  ;;  %v1153_v6 = vpop.f32.mrb[27].mxu0  ;;  %v1383_v14 = vld [vmem:[#allocation2 + $0x59] sm:$0xff]  ;;  %10619 = vst [vmem:[#allocation36_spill] sm:$0xff] %v10618_v25  ;;  %v10621_v44 = vsel %vm8463_vm8, 4294967295, %v10620_v44  ;;  %v462_v53 = vand.u32 15, %v348_v34 }
 0x135   : > { %5904 = vmatprep.mubr.msk.bf16.mxu0 %vm8411_vm11, %v8432_v23  ;;  %v8446_v19 = vmax.f32 %v1151_v49, 0.0  ;;  %v1154_v21 = vadd.f32 %v8112_v18, %v1153_v6  ;;  %v1259_v49 = vld [vmem:[#allocation2 + $0x77] sm:$0xff]  ;;  %v1260_v6 = vld [vmem:[#allocation2 + $0x7f] sm:$0xff] }
 0x136   : > { %10613 = vst [vmem:[#allocation32_spill] sm:$0xff] %v8439_v58  ;;  %1239 = vst [vmem:[#allocation2 + $0xe8] sm:$0xff] %v8439_v58  ;;  %v8451_v46 = vmax.f32 %v1162_v60, 0.0  ;;  %v469_v60 = vand.u32 15, %v349_v7  ;;  %v8478_v31 = vpack.c.bf16 %v1260_v6, %v1259_v49  ;;  %vm796_vm0 = vcmp.le.s32.totalorder %v462_v53, 14 }
 0x137   : > { %10614 = vst [vmem:[#allocation33_spill] sm:$0xff] %v8446_v19  ;;  %1237 = vst [vmem:[#allocation2 + $0xd8] sm:$0xff] %v8446_v19  ;;  %v8454_v20 = vmax.f32 %v1154_v21, 0.0  ;;  %v8468_v21 = vpack.c.bf16 %v1384_v56, %v1383_v14  ;;  %v351_v56 = vadd.s32 128, %v8024_v50  ;;  %v350_v6 = vadd.s32 120, %v8024_v50 }
 0x138   : > { %10615 = vst [vmem:[#allocation34_spill] sm:$0xff] %v8451_v46  ;;  %1240 = vst [vmem:[#allocation2 + $0xf0] sm:$0xff] %v8451_v46  ;;  %vm765_vm15 = vcmp.ge.s32.totalorder %v469_v60, 1  ;;  %v10626_v60 = vmov 0  ;;  %v10629_v53 = vmov 0 }
 0x139   : > { %10616 = vst [vmem:[#allocation35_spill] sm:$0xff] %v8454_v20  ;;  %1238 = vst [vmem:[#allocation2 + $0xe0] sm:$0xff] %v8454_v20  ;;  %v7553_v11 = vpop.f32.mrb[28].mxu0  ;;  %v476_v24 = vand.u32 15, %v350_v6  ;;  %v1387_v6 = vld [vmem:[#allocation2 + $0x79] sm:$0xff] }
 0x13a   : > { %v1175_v42 = vadd.f32 %v7553_v11, %v8112_v18  ;;  %v1166_v45 = vpop.f32.mrb[29].mxu0  ;;  %vm8509_vm11 = vmpackc.low %vm796_vm0, %vm7843_vm1 }
 0x13b   : > { %5844 = vmatmul.mubr.msk.bf16.gmra.mrb[24].mxu1 %vm8457_vm7, %v8432_v23  ;;  %v1167_v7 = vadd.f32 %v8112_v18, %v1166_v45  ;;  %v7554_v33 = vpop.f32.mrb[30].mxu0  ;;  %v10630_v53 = vsel %vm8509_vm11, 4294967295, %v10629_v53  ;;  %vm798_vm0 = vcmp.le.s32.totalorder %v476_v24, 14  ;;  %v8548_v24 = vpack.c.bf16 %v8345_v61, %v8330_v41  ;;  %v1266_v61 = vld [vmem:[#allocation2 + $0xaf] sm:$0xff] }
 0x13c   : > { %5907 = vmatmul.mubr.msk.bf16.gmra.mrb[52].mxu0 %vm8463_vm8, %v8468_v21  ;;  %2330 = vmatprep.mubr.bf16.mxu1 %v8472_v48  ;;  %v8485_v14 = vmax.f32 %v1175_v42, 0.0  ;;  %v1178_v11 = vadd.f32 %v7554_v33, %v8112_v18  ;;  %v1169_v34 = vpop.f32.mrb[31].mxu0  ;;  %v1385_v33 = vld [vmem:[#allocation2 + $0x69] sm:$0xff]  ;;  %v10641_v41 = vmov 0 }
 0x13d   : > { %5910 = vmatprep.mubr.msk.bf16.mxu0 %vm8457_vm7, %v8478_v31  ;;  %v8492_v45 = vmax.f32 %v1167_v7, 0.0  ;;  %v1170_v49 = vadd.f32 %v8112_v18, %v1169_v34  ;;  %vm8503_vm7 = vmpackc.low %vm7843_vm1, %vm765_vm15  ;;  %v1261_v7 = vld [vmem:[#allocation2 + $0x87] sm:$0xff]  ;;  %v1262_v18 = vld [vmem:[#allocation2 + $0x8f] sm:$0xff]  ;;  %v8514_v34 = vpack.c.bf16 %v1386_v2, %v1385_v33  ;;  %v353_v2 = vadd.s32 144, %v8024_v50  ;;  %10636 = vst [vmem:[#allocation43_spill] sm:$0xff] %v8548_v24 }
 0x13e   : > { %10622 = vst [vmem:[#allocation37_spill] sm:$0xff] %v8485_v14  ;;  %1243 = vst [vmem:[#allocation2 + $0x108] sm:$0xff] %v8485_v14  ;;  %v8497_v42 = vmax.f32 %v1178_v11, 0.0  ;;  %v10627_v60 = vsel %vm8503_vm7, 4294967295, %v10626_v60  ;;  %v483_v11 = vand.u32 15, %v351_v56  ;;  %v8523_v28 = vpack.c.bf16 %v1262_v18, %v1261_v7  ;;  %v1388_v33 = vld [vmem:[#allocation2 + $0x81] sm:$0xff] }
 0x13f   : > { %10623 = vst [vmem:[#allocation38_spill] sm:$0xff] %v8492_v45  ;;  %1241 = vst [vmem:[#allocation2 + $0xf8] sm:$0xff] %v8492_v45  ;;  %v8500_v57 = vmax.f32 %v1170_v49, 0.0  ;;  %v8518_v49 = vpack.c.bf16 %v8276_v62, %v8261_v52  ;;  %v352_v56 = vadd.s32 136, %v8024_v50  ;;  %v10631_v7 = vmov 0  ;;  %v1263_v18 = vld [vmem:[#allocation2 + $0x97] sm:$0xff] }
 0x140   : > { %10624 = vst [vmem:[#allocation39_spill] sm:$0xff] %v8497_v42  ;;  %10628 = vst [vmem:[#allocation41_spill] sm:$0xff] %v10627_v60  ;;  %vm767_vm15 = vcmp.ge.s32.totalorder %v483_v11, 1  ;;  %v1264_v62 = vld [vmem:[#allocation2 + $0x9f] sm:$0xff]  ;;  %v10634_v52 = vmov 0  ;;  %v497_v11 = vand.u32 15, %v353_v2 }
 0x141   : > { %10625 = vst [vmem:[#allocation40_spill] sm:$0xff] %v8500_v57  ;;  %1244 = vst [vmem:[#allocation2 + $0x110] sm:$0xff] %v8497_v42  ;;  %v8544_v42 = vpack.c.bf16 %v1388_v33, %v1387_v6  ;;  %v490_v14 = vand.u32 15, %v352_v56  ;;  %v8553_v60 = vpack.c.bf16 %v1264_v62, %v1263_v18  ;;  %v355_v2 = vadd.s32 160, %v8024_v50  ;;  %v1389_v6 = vld [vmem:[#allocation2 + $0x89] sm:$0xff]  ;;  %v1390_v33 = vld [vmem:[#allocation2 + $0x91] sm:$0xff] }
 0x142   : > { %1242 = vst [vmem:[#allocation2 + $0x100] sm:$0xff] %v8500_v57  ;;  %vm8535_vm3 = vmpackc.low %vm7843_vm1, %vm767_vm15  ;;  %vm769_vm15 = vcmp.ge.s32.totalorder %v497_v11, 1  ;;  %v354_v56 = vadd.s32 152, %v8024_v50  ;;  %v10638_v62 = vmov 0  ;;  %v1265_v18 = vld [vmem:[#allocation2 + $0xa7] sm:$0xff] }
 0x143   : > { %5847 = vmatmul.mubr.msk.bf16.gmra.mrb[28].mxu1 %vm8503_vm7, %v8478_v31  ;;  %v10632_v7 = vsel %vm8535_vm3, 4294967295, %v10631_v7  ;;  %10637 = vst [vmem:[#allocation44_spill] sm:$0xff] %v8553_v60  ;;  %v511_v11 = vand.u32 15, %v355_v2  ;;  %v8583_v25 = vpack.c.bf16 %v1266_v61, %v1265_v18  ;;  %v357_v2 = vadd.s32 176, %v8024_v50  ;;  %v1267_v18 = vld [vmem:[#allocation2 + $0xb7] sm:$0xff] }
 0x144   : > { %5913 = vmatmul.mubr.msk.bf16.gmra.mrb[56].mxu0 %vm8509_vm11, %v8514_v34  ;;  %2338 = vmatprep.mubr.bf16.mxu1 %v8518_v49  ;;  %10633 = vst [vmem:[#allocation42_spill] sm:$0xff] %v10632_v7  ;;  %vm8540_vm11 = vmpackc.low %vm798_vm0, %vm7843_vm1  ;;  %vm800_vm0 = vcmp.le.s32.totalorder %v490_v14, 14  ;;  %v8574_v7 = vpack.c.bf16 %v1390_v33, %v1389_v6  ;;  %v8578_v14 = vpack.c.bf16 %v8338_v51, %v8320_v35  ;;  %v1391_v6 = vld [vmem:[#allocation2 + $0x99] sm:$0xff]  ;;  %v1392_v33 = vld [vmem:[#allocation2 + $0xa1] sm:$0xff]  ;;  %v10646_v61 = vmov 0 }
 0x145   : > { %5916 = vmatprep.mubr.msk.bf16.mxu0 %vm8503_vm7, %v8523_v28  ;;  %v10635_v52 = vsel %vm8540_vm11, 4294967295, %v10634_v52  ;;  %vm8565_vm7 = vmpackc.low %vm7843_vm1, %vm769_vm15  ;;  %10645 = vst [vmem:[#allocation48_spill] sm:$0xff] %v8583_v25  ;;  %vm771_vm15 = vcmp.ge.s32.totalorder %v511_v11, 1  ;;  %v1268_v51 = vld [vmem:[#allocation2 + $0xbf] sm:$0xff]  ;;  %v10649_v35 = vmov 0  ;;  %v525_v11 = vand.u32 15, %v357_v2 }
 0x146   : > { %v10639_v62 = vsel %vm8565_vm7, 4294967295, %v10638_v62  ;;  %10644 = vst [vmem:[#allocation47_spill] sm:$0xff] %v8578_v14 }
 0x147   : > { %10640 = vst [vmem:[#allocation45_spill] sm:$0xff] %v10639_v62  ;;  %v8604_v62 = vpack.c.bf16 %v1392_v33, %v1391_v6 }
 0x14b   : > { %5850 = vmatmul.mubr.msk.bf16.gmra.mrb[32].mxu1 %vm8535_vm3, %v8523_v28 }
 0x14c   : > { %5919 = vmatmul.mubr.msk.bf16.gmra.mrb[60].mxu0 %vm8540_vm11, %v8544_v42  ;;  %2346 = vmatprep.mubr.bf16.mxu1 %v8548_v24  ;;  %vm8570_vm11 = vmpackc.low %vm800_vm0, %vm7843_vm1  ;;  %v504_v24 = vand.u32 15, %v354_v56  ;;  %v356_v56 = vadd.s32 168, %v8024_v50 }
 0x14d   : > { %5922 = vmatprep.mubr.msk.bf16.mxu0 %vm8535_vm3, %v8553_v60  ;;  %v10642_v41 = vsel %vm8570_vm11, 4294967295, %v10641_v41  ;;  %vm8595_vm3 = vmpackc.low %vm7843_vm1, %vm771_vm15  ;;  %vm773_vm15 = vcmp.ge.s32.totalorder %v525_v11, 1  ;;  %v1270_v11 = vld [vmem:[#allocation2 + $0xcf] sm:$0xff] }
 0x14e   : > { %10643 = vst [vmem:[#allocation46_spill] sm:$0xff] %v10642_v41  ;;  %vm802_vm0 = vcmp.le.s32.totalorder %v504_v24, 14  ;;  %v10647_v61 = vsel %vm8595_vm3, 4294967295, %v10646_v61  ;;  %v8608_v24 = vpack.c.bf16 %v8406_v13, %v8395_v54  ;;  %v6579_v41 = vpop.f32.mrb[0].mxu1  ;;  %v1393_v13 = vld [vmem:[#allocation2 + $0xa9] sm:$0xff]  ;;  %v1394_v54 = vld [vmem:[#allocation2 + $0xb1] sm:$0xff] }
 0x14f   : > { %10648 = vst [vmem:[#allocation49_spill] sm:$0xff] %v10647_v61  ;;  %v6580_v2 = vpop.f32.mrb[1].mxu1  ;;  %v1269_v61 = vld [vmem:[#allocation2 + $0xc7] sm:$0xff] }
 0x150   : > { %10652 = vst [vmem:[#allocation51_spill] sm:$0xff] %v8608_v24  ;;  %v8623_v6 = vadd.f32 %v6580_v2, %v6579_v41  ;;  %v6582_v33 = vpop.f32.mrb[2].mxu1  ;;  %v10658_v41 = vmov 0  ;;  %v8638_v2 = vpack.c.bf16 %v1394_v54, %v1393_v13  ;;  %v361_v54 = vadd.s32 208, %v8024_v50 }
 0x151   : > { %v360_v13 = vadd.s32 200, %v8024_v50 }
 0x152   : > { %10653 = vst [vmem:[#allocation52_spill] sm:$0xff] %v8623_v6  ;;  %v8642_v6 = vpack.c.bf16 %v8403_v1, %v8384_v39  ;;  %v1272_v1 = vld [vmem:[#allocation2 + $0xdf] sm:$0xff]  ;;  %v10666_v39 = vmov 0 }
 0x153   : > { %5853 = vmatmul.mubr.msk.bf16.gmra.mrb[36].mxu1 %vm8565_vm7, %v8553_v60  ;;  %v8613_v60 = vpack.c.bf16 %v1268_v51, %v1267_v18  ;;  %v358_v51 = vadd.s32 184, %v8024_v50  ;;  %v6583_v18 = vpop.f32.mrb[3].mxu1 }
 0x154   : > { %5925 = vmatmul.mubr.msk.bf16.gmra.mrb[64].mxu0 %vm8570_vm11, %v8574_v7  ;;  %2354 = vmatprep.mubr.bf16.mxu1 %v8578_v14  ;;  %vm8600_vm11 = vmpackc.low %vm802_vm0, %vm7843_vm1  ;;  %v518_v14 = vand.u32 15, %v356_v56  ;;  %v359_v56 = vadd.s32 192, %v8024_v50  ;;  %10661 = vst [vmem:[#allocation56_spill] sm:$0xff] %v8642_v6 }
 0x155   : > { %5928 = vmatprep.mubr.msk.bf16.mxu0 %vm8565_vm7, %v8583_v25  ;;  %v10650_v35 = vsel %vm8600_vm11, 4294967295, %v10649_v35  ;;  %vm8629_vm7 = vmpackc.low %vm7843_vm1, %vm773_vm15 }
 0x156   : > { %10651 = vst [vmem:[#allocation50_spill] sm:$0xff] %v10650_v35  ;;  %vm804_vm0 = vcmp.le.s32.totalorder %v518_v14, 14  ;;  %v539_v14 = vand.u32 15, %v359_v56  ;;  %v1395_v56 = vld [vmem:[#allocation2 + $0xb9] sm:$0xff] }
 0x158   : > { %vm775_vm15 = vcmp.ge.s32.totalorder %v539_v14, 1  ;;  %v553_v14 = vand.u32 15, %v361_v54  ;;  %v363_v54 = vadd.s32 224, %v8024_v50 }
 0x15b   : > { %5856 = vmatmul.mubr.msk.bf16.gmra.mrb[40].mxu1 %vm8595_vm3, %v8583_v25  ;;  %v8626_v25 = vadd.f32 %v6583_v18, %v6582_v33  ;;  %v532_v33 = vand.u32 15, %v358_v51  ;;  %v8647_v18 = vpack.c.bf16 %v1270_v11, %v1269_v61  ;;  %v1396_v51 = vld [vmem:[#allocation2 + $0xc1] sm:$0xff]  ;;  %v10663_v61 = vmov 0  ;;  %v1271_v11 = vld [vmem:[#allocation2 + $0xd7] sm:$0xff] }
 0x15c   : > { %5931 = vmatmul.mubr.msk.bf16.gmra.mrb[68].mxu0 %vm8600_vm11, %v8604_v62  ;;  %2362 = vmatprep.mubr.bf16.mxu1 %v8608_v24  ;;  %v10655_v24 = vmov 0  ;;  %vm8659_vm11 = vmpackc.low %vm7843_vm1, %vm775_vm15  ;;  %vm777_vm15 = vcmp.ge.s32.totalorder %v553_v14, 1  ;;  %v567_v14 = vand.u32 15, %v363_v54  ;;  %v365_v54 = vadd.s32 240, %v8024_v50 }
 0x15d   : > { %5934 = vmatprep.mubr.msk.bf16.mxu0 %vm8595_vm3, %v8613_v60  ;;  %10654 = vst [vmem:[#allocation53_spill] sm:$0xff] %v8626_v25  ;;  %v10656_v24 = vsel %vm8629_vm7, 4294967295, %v10655_v24  ;;  %vm8634_vm3 = vmpackc.low %vm804_vm0, %vm7843_vm1  ;;  %vm806_vm0 = vcmp.le.s32.totalorder %v532_v33, 14  ;;  %v10664_v61 = vsel %vm8659_vm11, 4294967295, %v10663_v61  ;;  %v8672_v33 = vpack.c.bf16 %v8454_v20, %v8446_v19  ;;  %v1274_v20 = vld [vmem:[#allocation2 + $0xef] sm:$0xff] }
 0x15e   : > { %10657 = vst [vmem:[#allocation54_spill] sm:$0xff] %v10656_v24  ;;  %v10659_v41 = vsel %vm8634_vm3, 4294967295, %v10658_v41  ;;  %10662 = vst [vmem:[#allocation57_spill] sm:$0xff] %v8647_v18  ;;  %v8668_v24 = vpack.c.bf16 %v1396_v51, %v1395_v56  ;;  %v546_v25 = vand.u32 15, %v360_v13  ;;  %v362_v13 = vadd.s32 216, %v8024_v50  ;;  %v1397_v56 = vld [vmem:[#allocation2 + $0xc9] sm:$0xff] }
 0x15f   : > { %10660 = vst [vmem:[#allocation55_spill] sm:$0xff] %v10659_v41  ;;  %10665 = vst [vmem:[#allocation58_spill] sm:$0xff] %v10664_v61  ;;  %v1398_v51 = vld [vmem:[#allocation2 + $0xd1] sm:$0xff]  ;;  %v10674_v19 = vmov 0 }
 0x160   : > { %10669 = vst [vmem:[#allocation60_spill] sm:$0xff] %v8672_v33  ;;  %v8698_v61 = vpack.c.bf16 %v1398_v51, %v1397_v56  ;;  %v1399_v56 = vld [vmem:[#allocation2 + $0xd9] sm:$0xff]  ;;  %v1400_v51 = vld [vmem:[#allocation2 + $0xe1] sm:$0xff] }
 0x163   : > { %5859 = vmatmul.mubr.msk.bf16.gmra.mrb[44].mxu1 %vm8629_vm7, %v8613_v60 }
 0x164   : > { %5937 = vmatmul.mubr.msk.bf16.gmra.mrb[72].mxu0 %vm8634_vm3, %v8638_v2  ;;  %2370 = vmatprep.mubr.bf16.mxu1 %v8642_v6  ;;  %vm8664_vm3 = vmpackc.low %vm806_vm0, %vm7843_vm1  ;;  %v8677_v6 = vpack.c.bf16 %v1272_v1, %v1271_v11  ;;  %vm808_vm0 = vcmp.le.s32.totalorder %v546_v25, 14  ;;  %v10671_v1 = vmov 0  ;;  %v1273_v11 = vld [vmem:[#allocation2 + $0xe7] sm:$0xff]  ;;  %v8702_v25 = vpack.c.bf16 %v8451_v46, %v8439_v58  ;;  %v1276_v46 = vld [vmem:[#allocation2 + $0xff] sm:$0xff] }
 0x165   : > { %5940 = vmatprep.mubr.msk.bf16.mxu0 %vm8629_vm7, %v8647_v18  ;;  %v10667_v39 = vsel %vm8664_vm3, 4294967295, %v10666_v39  ;;  %vm8689_vm7 = vmpackc.low %vm7843_vm1, %vm777_vm15  ;;  %vm779_vm15 = vcmp.ge.s32.totalorder %v567_v14, 1  ;;  %v10681_v58 = vmov 0  ;;  %v581_v14 = vand.u32 15, %v365_v54 }
 0x166   : > { %10668 = vst [vmem:[#allocation59_spill] sm:$0xff] %v10667_v39  ;;  %10670 = vst [vmem:[#allocation61_spill] sm:$0xff] %v8677_v6  ;;  %v10672_v1 = vsel %vm8689_vm7, 4294967295, %v10671_v1  ;;  %v366_v54 = vadd.s32 248, %v8024_v50 }
 0x167   : > { %10673 = vst [vmem:[#allocation62_spill] sm:$0xff] %v10672_v1  ;;  %10677 = vst [vmem:[#allocation64_spill] sm:$0xff] %v8702_v25  ;;  %v8728_v1 = vpack.c.bf16 %v1400_v51, %v1399_v56  ;;  %v1402_v56 = vld [vmem:[#allocation2 + $0xf1] sm:$0xff]  ;;  %v1453_v51 = vld [vmem:[#allocation2 + $0x107] sm:$0xff] }
 0x16b   : > { %5862 = vmatmul.mubr.msk.bf16.gmra.mrb[48].mxu1 %vm8659_vm11, %v8647_v18  ;;  %v8707_v18 = vpack.c.bf16 %v1274_v20, %v1273_v11  ;;  %v10678_v20 = vmov 0  ;;  %v1275_v11 = vld [vmem:[#allocation2 + $0xf7] sm:$0xff] }
 0x16c   : > { %5943 = vmatmul.mubr.msk.bf16.gmra.mrb[76].mxu0 %vm8664_vm3, %v8668_v24  ;;  %2378 = vmatprep.mubr.bf16.mxu1 %v8672_v33  ;;  %vm8694_vm3 = vmpackc.low %vm808_vm0, %vm7843_vm1  ;;  %v560_v33 = vand.u32 15, %v362_v13  ;;  %v364_v13 = vadd.s32 232, %v8024_v50  ;;  %v10722_v50 = vld [vmem:[#allocation53_spill] sm:$0xff] }
 0x16d   : > { %5946 = vmatprep.mubr.msk.bf16.mxu0 %vm8659_vm11, %v8677_v6  ;;  %v10675_v19 = vsel %vm8694_vm3, 4294967295, %v10674_v19  ;;  %vm8719_vm11 = vmpackc.low %vm7843_vm1, %vm779_vm15  ;;  %vm781_vm15 = vcmp.ge.s32.totalorder %v581_v14, 1  ;;  %v588_v14 = vand.u32 15, %v366_v54  ;;  %v1403_v54 = vld [vmem:[#allocation2 + $0xf9] sm:$0xff] }
 0x16e   : > { %10676 = vst [vmem:[#allocation63_spill] sm:$0xff] %v10675_v19  ;;  %vm810_vm0 = vcmp.le.s32.totalorder %v560_v33, 14  ;;  %v10679_v20 = vsel %vm8719_vm11, 4294967295, %v10678_v20  ;;  %v8732_v33 = vpack.c.bf16 %v8500_v57, %v8492_v45  ;;  %v10687_v57 = vmov 0 }
 0x16f   : > { %10680 = vst [vmem:[#allocation65_spill] sm:$0xff] %v10679_v20 }
 0x173   : > { %5865 = vmatmul.mubr.msk.bf16.gmra.mrb[52].mxu1 %vm8689_vm7, %v8677_v6  ;;  %v8737_v6 = vpack.c.bf16 %v1276_v46, %v1275_v11  ;;  %v10684_v46 = vmov 0  ;;  %v1454_v11 = vld [vmem:[#allocation2 + $0x10f] sm:$0xff] }
 0x174   : > { %5949 = vmatmul.mubr.msk.bf16.gmra.mrb[80].mxu0 %vm8694_vm3, %v8698_v61  ;;  %2386 = vmatprep.mubr.bf16.mxu1 %v8702_v25  ;;  %vm8724_vm3 = vmpackc.low %vm810_vm0, %vm7843_vm1  ;;  %v574_v25 = vand.u32 15, %v364_v13  ;;  %v1401_v13 = vld [vmem:[#allocation2 + $0xe9] sm:$0xff] }
 0x175   : > { %5952 = vmatprep.mubr.msk.bf16.mxu0 %vm8689_vm7, %v8707_v18  ;;  %v10682_v58 = vsel %vm8724_vm3, 4294967295, %v10681_v58  ;;  %vm8748_vm7 = vmpackc.low %vm7843_vm1, %vm781_vm15  ;;  %v8757_v45 = vpack.c.bf16 %v1402_v56, %v1401_v13  ;;  %vm814_vm15 = vcmp.le.s32.totalorder %v588_v14, 14  ;;  %v1404_v13 = vld [vmem:[#allocation2 + $0x101] sm:$0xff]  ;;  %v10690_v56 = vmov 0 }
 0x176   : > { %10683 = vst [vmem:[#allocation66_spill] sm:$0xff] %v10682_v58  ;;  %vm812_vm0 = vcmp.le.s32.totalorder %v574_v25, 14  ;;  %v10685_v46 = vsel %vm8748_vm7, 4294967295, %v10684_v46  ;;  %v8762_v25 = vpack.c.bf16 %v1454_v11, %v1453_v51  ;;  %v8778_v51 = vpack.c.bf16 %v1404_v13, %v1403_v54  ;;  %v7752_v11 = vld [vmem:[%s10357_s3 + $0x208] sm:$0xff]   ;;  %v10716_v14 = vld [vmem:[#allocation57_spill] sm:$0xff]  ;;  %v10720_v13 = vld [vmem:[#allocation60_spill] sm:$0xff] }
 0x177   : > { %10686 = vst [vmem:[#allocation67_spill] sm:$0xff] %v10685_v46  ;;  %v10717_v54 = vld [vmem:[#allocation49_spill] sm:$0xff] }
 0x17b   : > { %5868 = vmatmul.mubr.msk.bf16.gmra.mrb[56].mxu1 %vm8719_vm11, %v8707_v18 }
 0x17c   : > { %5955 = vmatmul.mubr.msk.bf16.gmra.mrb[84].mxu0 %vm8724_vm3, %v8728_v1  ;;  %2394 = vmatprep.mubr.bf16.mxu1 %v8732_v33  ;;  %vm8753_vm3 = vmpackc.low %vm812_vm0, %vm7843_vm1 }
 0x17d   : > { %5958 = vmatprep.mubr.msk.bf16.mxu0 %vm8719_vm11, %v8737_v6  ;;  %v10688_v57 = vsel %vm8753_vm3, 4294967295, %v10687_v57  ;;  %vm8774_vm0 = vmpackc.low %vm814_vm15, %vm7843_vm1  ;;  %vm10693_vm1 = vnez %v10598_v0  ;;  %vm10694_vm15 = vnez %v10630_v53 }
 0x17e   : > { %10689 = vst [vmem:[#allocation68_spill] sm:$0xff] %v10688_v57  ;;  %v10691_v56 = vsel %vm8774_vm0, 4294967295, %v10690_v56 }
 0x17f   : > { %10692 = vst [vmem:[#allocation69_spill] sm:$0xff] %v10691_v56 }
 0x183   : > { %5871 = vmatmul.mubr.msk.bf16.gmra.mrb[60].mxu1 %vm8748_vm7, %v8737_v6 }
 0x184   : > { %5961 = vmatmul.mubr.msk.bf16.gmra.mrb[88].mxu0 %vm8753_vm3, %v8757_v45  ;;  %5970 = vmatprep.mubr.msk.bf16.mxu1 %vm8173_vm6, %v8242_v38  ;;  %v7753_v38 = vld [vmem:[%s10357_s3 + $0x210] sm:$0xff]  }
 0x185   : > { %5964 = vmatprep.mubr.msk.bf16.mxu0 %vm8748_vm7, %v8762_v25 }
 0x18b   : > { %2597 = vmatmul.mubr.bf16.vlgmr.msra.gmra.mrb[64].mxu1 %v8140_v36  ;;  %v7754_v36 = vld [vmem:[%s10357_s3 + $0x218] sm:$0xff]  }
 0x18c   : > { %5967 = vmatmul.mubr.msk.bf16.gmra.mrb[92].mxu0 %vm8774_vm0, %v8778_v51  ;;  %7556 = vmatpush3.bf16.msra.mxu1 %v8126_v30  ;;  %v7755_v30 = vld [vmem:[%s10357_s3 + $0x220] sm:$0xff]  }
 0x18d   : > { %5973 = vmatprep.mubr.msk.bf16.mxu1 %vm8235_vm10, %v8300_v16  ;;  %2757 = vmatprep.mubr.bf16.mxu0 %v8183_v5 }
 0x18e   : > { %7557 = vmatprep.subr.bf16.mxu1 %v7752_v11 }
 0x190   : > { %7558 = vmatpush3.bf16.msra.mxu1 %v7752_v11 }
 0x191   : > { %7559 = vmatprep.subr.bf16.mxu1 %v7753_v38 }
 0x193   : > { %2605 = vmatmul.mubr.bf16.gmra.mrb[68].mxu1 %v8183_v5  ;;  %v7756_v5 = vld [vmem:[%s10357_s3 + $0x228] sm:$0xff]  }
 0x194   : > { %6018 = vmatmul.mubr.msk.bf16.vlgmr.msra.gmra.mrb[96].mxu0 %vm8037_vm2, %v8193_v10  ;;  %5976 = vmatprep.mubr.msk.bf16.mxu1 %vm8293_vm14, %v8364_v12  ;;  %v7757_v10 = vld [vmem:[%s10357_s3 + $0x230] sm:$0xff]   ;;  %vm10705_vm2 = vnez %v10650_v35 }
 0x195   : > { %2765 = vmatprep.mubr.bf16.mxu0 %v8247_v43  ;;  %7560 = vmatpush3.bf16.msra.mxu1 %v7753_v38 }
 0x196   : > { %7561 = vmatprep.subr.bf16.mxu1 %v7754_v36 }
 0x199   : > { %7562 = vmatpush3.bf16.msra.mxu1 %v7754_v36 }
 0x19a   : > { %7563 = vmatprep.subr.bf16.mxu1 %v7755_v30 }
 0x19b   : > { %2613 = vmatmul.mubr.bf16.gmra.mrb[72].mxu1 %v8247_v43  ;;  %v7758_v43 = vld [vmem:[%s10357_s3 + $0x238] sm:$0xff]  }
 0x19c   : > { %6021 = vmatmul.mubr.msk.bf16.gmra.mrb[100].mxu0 %vm8164_vm5, %v8255_v47  ;;  %5979 = vmatprep.mubr.msk.bf16.mxu1 %vm8356_vm4, %v8422_v37  ;;  %v10699_v47 = vld [vmem:[#allocation46_spill] sm:$0xff] }
 0x19d   : > { %2773 = vmatprep.mubr.bf16.mxu0 %v8304_v17  ;;  %7564 = vmatpush3.bf16.msra.mxu1 %v7755_v30  ;;  %vm10700_vm5 = vnez %v10699_v47 }
 0x19e   : > { %7565 = vmatprep.subr.bf16.mxu1 %v7756_v5 }
 0x1a1   : > { %7566 = vmatpush3.bf16.msra.mxu1 %v7756_v5 }
 0x1a2   : > { %7567 = vmatprep.subr.bf16.mxu1 %v7757_v10 }
 0x1a3   : > { %2621 = vmatmul.mubr.bf16.gmra.mrb[76].mxu1 %v8304_v17  ;;  %v10703_v17 = vld [vmem:[#allocation41_spill] sm:$0xff] }
 0x1a4   : > { %6024 = vmatmul.mubr.msk.bf16.gmra.mrb[104].mxu0 %vm8229_vm9, %v8313_v26  ;;  %5982 = vmatprep.mubr.msk.bf16.mxu1 %vm8417_vm12, %v8468_v21  ;;  %vm10696_vm9 = vnez %v10635_v52  ;;  %v10706_v26 = vld [vmem:[#allocation47_spill] sm:$0xff] }
 0x1a5   : > { %2781 = vmatprep.mubr.bf16.mxu0 %v8368_v15  ;;  %7568 = vmatpush3.bf16.msra.mxu1 %v7757_v10 }
 0x1a6   : > { %7569 = vmatprep.subr.bf16.mxu1 %v7758_v43 }
 0x1a9   : > { %7570 = vmatpush3.bf16.msra.mxu1 %v7758_v43  ;;  %v10721_v43 = vld [vmem:[#allocation52_spill] sm:$0xff] }
 0x1ab   : > { %2629 = vmatmul.mubr.bf16.gmra.mrb[80].mxu1 %v8368_v15  ;;  %v10708_v15 = vld [vmem:[#allocation42_spill] sm:$0xff] }
 0x1ac   : > { %6027 = vmatmul.mubr.msk.bf16.gmra.mrb[108].mxu0 %vm8287_vm13, %v8377_v29  ;;  %5985 = vmatprep.mubr.msk.bf16.mxu1 %vm8463_vm8, %v8514_v34  ;;  %vm10695_vm13 = vnez %v10609_v8  ;;  %v10711_v29 = vld [vmem:[#allocation51_spill] sm:$0xff] }
 0x1ad   : > { %2789 = vmatprep.mubr.bf16.mxu0 %v8426_v40 }
 0x1b3   : > { %2637 = vmatmul.mubr.bf16.gmra.mrb[84].mxu1 %v8426_v40  ;;  %v10712_v40 = vld [vmem:[#allocation45_spill] sm:$0xff] }
 0x1b4   : > { %6030 = vmatmul.mubr.msk.bf16.gmra.mrb[112].mxu0 %vm10693_vm1, %v8432_v23  ;;  %5988 = vmatprep.mubr.msk.bf16.mxu1 %vm10694_vm15, %v8544_v42  ;;  %v10697_v23 = vld [vmem:[#allocation36_spill] sm:$0xff] }
 0x1b5   : > { %2797 = vmatprep.mubr.bf16.mxu0 %v8472_v48  ;;  %vm10698_vm1 = vnez %v10697_v23 }
 0x1bb   : > { %2645 = vmatmul.mubr.bf16.gmra.mrb[88].mxu1 %v8472_v48  ;;  %v10701_v48 = vld [vmem:[#allocation43_spill] sm:$0xff] }
 0x1bc   : > { %6033 = vmatmul.mubr.msk.bf16.gmra.mrb[116].mxu0 %vm10695_vm13, %v8478_v31  ;;  %5991 = vmatprep.mubr.msk.bf16.mxu1 %vm10696_vm9, %v8574_v7  ;;  %v10702_v31 = vld [vmem:[#allocation44_spill] sm:$0xff]  ;;  %vm10704_vm13 = vnez %v10703_v17 }
 0x1bd   : > { %2805 = vmatprep.mubr.bf16.mxu0 %v8518_v49 }
 0x1c3   : > { %2653 = vmatmul.mubr.bf16.gmra.mrb[92].mxu1 %v8518_v49  ;;  %v10715_v49 = vld [vmem:[#allocation56_spill] sm:$0xff] }
 0x1c4   : > { %6036 = vmatmul.mubr.msk.bf16.gmra.mrb[120].mxu0 %vm10698_vm1, %v8523_v28  ;;  %5994 = vmatprep.mubr.msk.bf16.mxu1 %vm10700_vm5, %v8604_v62  ;;  %v10707_v28 = vld [vmem:[#allocation48_spill] sm:$0xff]  ;;  %vm10709_vm1 = vnez %v10708_v15  ;;  %vm10710_vm5 = vnez %v10659_v41  ;;  %v10724_v15 = vld [vmem:[#allocation54_spill] sm:$0xff] }
 0x1c5   : > { %2813 = vmatprep.mubr.bf16.mxu0 %v10701_v48 }
 0x1cb   : > { %2661 = vmatmul.mubr.bf16.gmra.mrb[96].mxu1 %v10701_v48 }
 0x1cc   : > { %6039 = vmatmul.mubr.msk.bf16.gmra.mrb[124].mxu0 %vm10704_vm13, %v10702_v31  ;;  %5997 = vmatprep.mubr.msk.bf16.mxu1 %vm10705_vm2, %v8638_v2  ;;  %vm10713_vm13 = vnez %v10712_v40  ;;  %vm10714_vm2 = vnez %v10667_v39  ;;  %v3111_v39 = vld [vmem:[#allocation2 + $0x7] sm:$0xff] }
 0x1cd   : > { %2821 = vmatprep.mubr.bf16.mxu0 %v10706_v26 }
 0x1d3   : > { %2669 = vmatmul.mubr.bf16.gmra.mrb[100].mxu1 %v10706_v26 }
 0x1d4   : > { %6042 = vmatmul.mubr.msk.bf16.gmra.mrb[128].mxu0 %vm10709_vm1, %v10707_v28  ;;  %6000 = vmatprep.mubr.msk.bf16.mxu1 %vm10710_vm5, %v8668_v24  ;;  %vm10718_vm1 = vnez %v10717_v54  ;;  %vm10719_vm5 = vnez %v10675_v19 }
 0x1d5   : > { %2829 = vmatprep.mubr.bf16.mxu0 %v10711_v29 }
 0x1db   : > { %2677 = vmatmul.mubr.bf16.gmra.mrb[104].mxu1 %v10711_v29 }
 0x1dc   : > { %6045 = vmatmul.mubr.msk.bf16.gmra.mrb[132].mxu0 %vm10713_vm13, %v8613_v60  ;;  %6003 = vmatprep.mubr.msk.bf16.mxu1 %vm10714_vm2, %v8698_v61  ;;  %v8901_v60 = vld [vmem:[%s10358_s4] ss:$0 sm:$0xff]  ;;  %vm10726_vm13 = vnez %v10682_v58 }
 0x1dd   : > { %2837 = vmatprep.mubr.bf16.mxu0 %v10715_v49  ;;  %v2277_v48 = vadd.f32 %v10721_v43, %v8901_v60  ;;  %v2280_v54 = vadd.f32 %v10722_v50, %v8901_v60 }
 0x1e3   : > { %2685 = vmatmul.mubr.bf16.gmra.mrb[108].mxu1 %v10715_v49 }
 0x1e4   : > { %6048 = vmatmul.mubr.msk.bf16.gmra.mrb[136].mxu0 %vm10718_vm1, %v10716_v14  ;;  %6006 = vmatprep.mubr.msk.bf16.mxu1 %vm10719_vm5, %v8728_v1  ;;  %v7759_v14 = vld [vmem:[%s10359_s5 + $0x40] sm:$0xff]   ;;  %vm10725_vm1 = vnez %v10724_v15 }
 0x1e5   : > { %2845 = vmatprep.mubr.bf16.mxu0 %v10720_v13  ;;  %7035 = vmatprep.subr.bf16.mxu0 %v7759_v14 }
 0x1e6   : > { %v6585_v11 = vpop.f32.mrb[4].mxu1 }
 0x1e7   : > { %v6691_v38 = vpop.f32.mrb[32].mxu0  ;;  %v6586_v36 = vpop.f32.mrb[5].mxu1 }
 0x1e8   : > { %v6587_v30 = vadd.f32 %v6586_v36, %v6585_v11  ;;  %v6692_v5 = vpop.f32.mrb[33].mxu0  ;;  %v6588_v10 = vpop.f32.mrb[6].mxu1  ;;  %v10723_v36 = vld [vmem:[#allocation61_spill] sm:$0xff] }
 0x1e9   : > { %v6693_v31 = vadd.f32 %v6692_v5, %v6691_v38  ;;  %v6694_v26 = vpop.f32.mrb[34].mxu0  ;;  %v6589_v28 = vpop.f32.mrb[7].mxu1  ;;  %v7760_v38 = vld [vmem:[%s10359_s5] sm:$0xff]   ;;  %v10727_v5 = vld [vmem:[#allocation64_spill] sm:$0xff] }
 0x1ea   : > { %v6590_v29 = vadd.f32 %v6589_v28, %v6588_v10  ;;  %v6695_v49 = vpop.f32.mrb[35].mxu0  ;;  %7036 = vmatpush3.bf16.msra.mxu0 %v7760_v38  ;;  %v2285_v28 = vadd.f32 %v6587_v30, %v8901_v60  ;;  %v1507_v38 = vld [vmem:[#allocation2 + $0x111] sm:$0xff] }
 0x1eb   : > { %v6696_v40 = vadd.f32 %v6695_v49, %v6694_v26  ;;  %2693 = vmatmul.mubr.bf16.gmra.mrb[112].mxu1 %v10720_v13  ;;  %v8911_v11 = vadd.f32 %v6693_v31, %v2277_v48 }
 0x1ec   : > { %6051 = vmatmul.mubr.msk.bf16.gmra.mrb[140].mxu0 %vm10725_vm1, %v10723_v36  ;;  %6009 = vmatprep.mubr.msk.bf16.mxu1 %vm10726_vm13, %v8757_v45  ;;  %v2288_v8 = vadd.f32 %v6590_v29, %v8901_v60 }
 0x1ed   : > { %2853 = vmatprep.mubr.bf16.mxu0 %v10727_v5  ;;  %v8923_v50 = vadd.f32 %v6696_v40, %v2280_v54  ;;  %v10728_v54 = vld [vmem:[#allocation58_spill] sm:$0xff] }
 0x1ee   : > { %v6591_v13 = vpop.f32.mrb[8].mxu1  ;;  %vm10729_vm1 = vnez %v10728_v54 }
 0x1ef   : > { %v6697_v10 = vpop.f32.mrb[36].mxu0  ;;  %v6592_v43 = vpop.f32.mrb[9].mxu1 }
 0x1f0   : > { %v6593_v48 = vadd.f32 %v6592_v43, %v6591_v13  ;;  %v6698_v31 = vpop.f32.mrb[37].mxu0  ;;  %v6594_v26 = vpop.f32.mrb[10].mxu1 }
 0x1f1   : > { %v6699_v49 = vadd.f32 %v6698_v31, %v6697_v10  ;;  %v6700_v36 = vpop.f32.mrb[38].mxu0  ;;  %v6595_v15 = vpop.f32.mrb[11].mxu1 }
 0x1f2   : > { %v6596_v17 = vadd.f32 %v6595_v15, %v6594_v26  ;;  %v6701_v23 = vpop.f32.mrb[39].mxu0  ;;  %v2293_v43 = vadd.f32 %v6593_v48, %v8901_v60 }
 0x1f3   : > { %v6702_v0 = vadd.f32 %v6701_v23, %v6700_v36  ;;  %2701 = vmatmul.mubr.bf16.gmra.mrb[116].mxu1 %v10727_v5  ;;  %v8928_v40 = vadd.f32 %v6699_v49, %v2285_v28  ;;  %v1506_v23 = vld [vmem:[#allocation2 + $0x109] sm:$0xff] }
 0x1f4   : > { %6054 = vmatmul.mubr.msk.bf16.gmra.mrb[144].mxu0 %vm10729_vm1, %v8707_v18  ;;  %6012 = vmatprep.mubr.msk.bf16.mxu1 %vm8753_vm3, %v8778_v51  ;;  %v8940_v36 = vpack.c.bf16 %v1507_v38, %v1506_v23 }
 0x1f5   : > { %2861 = vmatprep.mubr.bf16.mxu0 %v8732_v33  ;;  %v8937_v30 = vadd.f32 %v6702_v0, %v2288_v8  ;;  %v7761_v0 = vld [vmem:[%s10359_s5 + $0x48] sm:$0xff]   ;;  %v2296_v8 = vadd.f32 %v6596_v17, %v8901_v60 }
 0x1f6   : > { %v6597_v15 = vpop.f32.mrb[12].mxu1  ;;  %v7762_v17 = vld [vmem:[%s10359_s5 + $0x8] sm:$0xff]   ;;  %7037 = vmatprep.subr.bf16.mxu0 %v7761_v0 }
 0x1f7   : > { %v6703_v14 = vpop.f32.mrb[40].mxu0  ;;  %v6598_v29 = vpop.f32.mrb[13].mxu1  ;;  %7038 = vmatpush3.bf16.msra.mxu0 %v7762_v17 }
 0x1f8   : > { %v6599_v5 = vadd.f32 %v6598_v29, %v6597_v15  ;;  %v6704_v13 = vpop.f32.mrb[41].mxu0  ;;  %v6600_v10 = vpop.f32.mrb[14].mxu1  ;;  %v10730_v15 = vld [vmem:[#allocation37_spill] sm:$0xff]  ;;  %v10731_v29 = vld [vmem:[#allocation39_spill] sm:$0xff] }
 0x1f9   : > { %v6705_v31 = vadd.f32 %v6704_v13, %v6703_v14  ;;  %v6706_v18 = vpop.f32.mrb[42].mxu0  ;;  %v6601_v26 = vpop.f32.mrb[15].mxu1  ;;  %v1505_v4 = vpack.c.bf16 %v10731_v29, %v10730_v15  ;;  %v10732_v14 = vld [vmem:[#allocation62_spill] sm:$0xff] }
 0x1fa   : > { %v6602_v28 = vadd.f32 %v6601_v26, %v6600_v10  ;;  %v6707_v49 = vpop.f32.mrb[43].mxu0  ;;  %vm10733_vm1 = vnez %v10732_v14  ;;  %v7831_v29 = vld [vmem:[#allocation2 + $0x8] sm:$0xff] }
 0x1fb   : > { %v6708_v54 = vadd.f32 %v6707_v49, %v6706_v18  ;;  %2709 = vmatmul.mubr.bf16.gmra.mrb[120].mxu1 %v8732_v33  ;;  %v8949_v48 = vadd.f32 %v6705_v31, %v2293_v43  ;;  %v8963_v15 = vpack.c.bf16 %v7831_v29, %v7831_v29 }
 0x1fc   : > { %6057 = vmatmul.mubr.msk.bf16.gmra.mrb[148].mxu0 %vm10733_vm1, %v8737_v6  ;;  %6015 = vmatprep.mubr.msk.bf16.mxu1 %vm8774_vm0, %v8940_v36  ;;  %v2301_v6 = vadd.f32 %v6599_v5, %v8901_v60  ;;  %vm10736_vm1 = vnez %v10659_v41 }
 0x1fd   : > { %2869 = vmatprep.mubr.bf16.mxu0 %v1505_v4  ;;  %v8960_v23 = vadd.f32 %v6708_v54, %v2296_v8  ;;  %v2304_v54 = vadd.f32 %v6602_v28, %v8901_v60  ;;  %v1556_v28 = vld [vmem:[#allocation2 + $0x117] sm:$0xff] }
 0x1fe   : > { %v6603_v33 = vpop.f32.mrb[16].mxu1 }
 0x1ff   : > { %v6709_v38 = vpop.f32.mrb[44].mxu0  ;;  %v6604_v13 = vpop.f32.mrb[17].mxu1 }
 0x200   : > { %v6605_v10 = vadd.f32 %v6604_v13, %v6603_v33  ;;  %v6710_v43 = vpop.f32.mrb[45].mxu0  ;;  %v6606_v31 = vpop.f32.mrb[18].mxu1 }
 0x201   : > { %v6711_v18 = vadd.f32 %v6710_v43, %v6709_v38  ;;  %v6712_v26 = vpop.f32.mrb[46].mxu0  ;;  %v6607_v49 = vpop.f32.mrb[19].mxu1 }
 0x202   : > { %v6608_v14 = vadd.f32 %v6607_v49, %v6606_v31  ;;  %v6713_v27 = vpop.f32.mrb[47].mxu0  ;;  %v2309_v43 = vadd.f32 %v6605_v10, %v8901_v60  ;;  %v7763_v49 = vld [vmem:[%s10359_s5 + $0x50] sm:$0xff]  }
 0x203   : > { %v6714_v0 = vadd.f32 %v6713_v27, %v6712_v26  ;;  %2717 = vmatmul.mubr.bf16.gmra.mrb[124].mxu1 %v1505_v4  ;;  %v8966_v8 = vadd.f32 %v6711_v18, %v2301_v6  ;;  %v1557_v27 = vld [vmem:[#allocation2 + $0x11f] sm:$0xff]  ;;  %v7764_v10 = vld [vmem:[%s10359_s5 + $0x10] sm:$0xff]   ;;  %7039 = vmatprep.subr.bf16.mxu0 %v7763_v49 }
 0x204   : > { %6060 = vmatmul.mubr.msk.bf16.gmra.mrb[152].mxu0 %vm8719_vm11, %v8762_v25  ;;  %7571 = vmatprep.mubr.msk.bf16.mxu1 %vm8173_vm6, %v8300_v16  ;;  %v6062_v16 = vpack.c.bf16 %v1557_v27, %v1556_v28  ;;  %vm10735_vm11 = vnez %v10650_v35 }
 0x205   : > { %2877 = vmatprep.mubr.bf16.mxu0 %v8963_v15  ;;  %v8975_v5 = vadd.f32 %v6714_v0, %v2304_v54  ;;  %v2312_v54 = vadd.f32 %v6608_v14, %v8901_v60  ;;  %7040 = vmatpush3.bf16.msra.mxu0 %v7764_v10 }
 0x206   : > { %v6609_v29 = vpop.f32.mrb[20].mxu1 }
 0x207   : > { %v6715_v17 = vpop.f32.mrb[48].mxu0  ;;  %v6610_v33 = vpop.f32.mrb[21].mxu1 }
 0x208   : > { %v6611_v4 = vadd.f32 %v6610_v33, %v6609_v29  ;;  %v6716_v38 = vpop.f32.mrb[49].mxu0  ;;  %v6612_v13 = vpop.f32.mrb[22].mxu1 }
 0x209   : > { %v6717_v31 = vadd.f32 %v6716_v38, %v6715_v17  ;;  %v6718_v25 = vpop.f32.mrb[50].mxu0  ;;  %v6613_v6 = vpop.f32.mrb[23].mxu1 }
 0x20a   : > { %v6614_v18 = vadd.f32 %v6613_v6, %v6612_v13  ;;  %v6719_v26 = vpop.f32.mrb[51].mxu0  ;;  %v2317_v13 = vadd.f32 %v6611_v4, %v8901_v60 }
 0x20b   : > { %v6720_v0 = vadd.f32 %v6719_v26, %v6718_v25  ;;  %7572 = vmatmul.mubr.msk.bf16.vlgmr.msra.gmra.mrb[128].mxu1 %vm8235_vm10, %v8364_v12  ;;  %v8985_v29 = vadd.f32 %v6717_v31, %v2309_v43 }
 0x20c   : > { %6063 = vmatmul.mubr.msk.bf16.gmra.mrb[156].mxu0 %vm8748_vm7, %v6062_v16  ;;  %7575 = vmatprep.mubr.msk.bf16.mxu1 %vm8293_vm14, %v8422_v37  ;;  %v2320_v26 = vadd.f32 %v6614_v18, %v8901_v60  ;;  %vm10734_vm7 = vnez %v10699_v47 }
 0x20d   : > { %v8995_v17 = vadd.f32 %v6720_v0, %v2312_v54  ;;  %4140 = vmatprep.mubr.bf16.mxu0 %v8963_v15 }
 0x20e   : > { %v6615_v14 = vpop.f32.mrb[24].mxu1 }
 0x20f   : > { %v6721_v33 = vpop.f32.mrb[52].mxu0  ;;  %v6616_v12 = vpop.f32.mrb[25].mxu1 }
 0x210   : > { %v6617_v28 = vadd.f32 %v6616_v12, %v6615_v14  ;;  %v6722_v27 = vpop.f32.mrb[53].mxu0  ;;  %v6618_v38 = vpop.f32.mrb[26].mxu1 }
 0x211   : > { %v6723_v43 = vadd.f32 %v6722_v27, %v6721_v33  ;;  %v6724_v31 = vpop.f32.mrb[54].mxu0  ;;  %v6619_v25 = vpop.f32.mrb[27].mxu1 }
 0x212   : > { %v6620_v37 = vadd.f32 %v6619_v25, %v6618_v38  ;;  %v6725_v6 = vpop.f32.mrb[55].mxu0  ;;  %v2325_v18 = vadd.f32 %v6617_v28, %v8901_v60  ;;  %v7766_v28 = vld [vmem:[%s10359_s5 + $0x18] sm:$0xff]  }
 0x213   : > { %v6726_v16 = vadd.f32 %v6725_v6, %v6724_v31  ;;  %7576 = vmatmul.mubr.msk.bf16.gmra.mrb[132].mxu1 %vm8356_vm4, %v8468_v21  ;;  %v9002_v49 = vadd.f32 %v6723_v43, %v2317_v13  ;;  %v7765_v43 = vld [vmem:[%s10359_s5 + $0x58] sm:$0xff]  }
 0x214   : > { %7579 = vmatprep.mubr.msk.bf16.mxu1 %vm8417_vm12, %v8514_v34  ;;  %v2328_v34 = vadd.f32 %v6620_v37, %v8901_v60  ;;  %7041 = vmatprep.subr.bf16.mxu0 %v7765_v43 }
 0x215   : > { %v9007_v54 = vadd.f32 %v6726_v16, %v2320_v26  ;;  %7042 = vmatpush3.bf16.msra.mxu0 %v7766_v28 }
 0x216   : > { %v6621_v4 = vpop.f32.mrb[28].mxu1 }
 0x217   : > { %v6727_v0 = vpop.f32.mrb[56].mxu0  ;;  %v6622_v10 = vpop.f32.mrb[29].mxu1 }
 0x218   : > { %v6623_v14 = vadd.f32 %v6622_v10, %v6621_v4  ;;  %v6728_v33 = vpop.f32.mrb[57].mxu0  ;;  %v6624_v12 = vpop.f32.mrb[30].mxu1 }
 0x219   : > { %v6729_v27 = vadd.f32 %v6728_v33, %v6727_v0  ;;  %v6730_v38 = vpop.f32.mrb[58].mxu0  ;;  %v6625_v31 = vpop.f32.mrb[31].mxu1 }
 0x21a   : > { %v6626_v21 = vadd.f32 %v6625_v31, %v6624_v12  ;;  %v6731_v13 = vpop.f32.mrb[59].mxu0  ;;  %v2333_v33 = vadd.f32 %v6623_v14, %v8901_v60 }
 0x21b   : > { %v6732_v25 = vadd.f32 %v6731_v13, %v6730_v38  ;;  %7580 = vmatmul.mubr.msk.bf16.gmra.mrb[136].mxu1 %vm8463_vm8, %v8544_v42  ;;  %v9017_v6 = vadd.f32 %v6729_v27, %v2325_v18 }
 0x21c   : > { %7583 = vmatprep.mubr.msk.bf16.mxu1 %vm10694_vm15, %v8574_v7  ;;  %v2336_v31 = vadd.f32 %v6626_v21, %v8901_v60 }
 0x21d   : > { %v9025_v26 = vadd.f32 %v6732_v25, %v2328_v34 }
 0x21e   : > { %v6627_v16 = vpop.f32.mrb[32].mxu1 }
 0x21f   : > { %v6733_v37 = vpop.f32.mrb[60].mxu0  ;;  %v6628_v4 = vpop.f32.mrb[33].mxu1 }
 0x220   : > { %v6629_v0 = vadd.f32 %v6628_v4, %v6627_v16  ;;  %v6734_v10 = vpop.f32.mrb[61].mxu0  ;;  %v6630_v42 = vpop.f32.mrb[34].mxu1 }
 0x221   : > { %v6735_v12 = vadd.f32 %v6734_v10, %v6733_v37  ;;  %v6736_v18 = vpop.f32.mrb[62].mxu0  ;;  %v6631_v27 = vpop.f32.mrb[35].mxu1 }
 0x222   : > { %v6632_v7 = vadd.f32 %v6631_v27, %v6630_v42  ;;  %v6737_v38 = vpop.f32.mrb[63].mxu0  ;;  %v2341_v21 = vadd.f32 %v6629_v0, %v8901_v60  ;;  %v7768_v0 = vld [vmem:[%s10359_s5 + $0x20] sm:$0xff]  }
 0x223   : > { %v6738_v13 = vadd.f32 %v6737_v38, %v6736_v18  ;;  %7584 = vmatmul.mubr.msk.bf16.gmra.mrb[140].mxu1 %vm10696_vm9, %v8604_v62  ;;  %v9032_v43 = vadd.f32 %v6735_v12, %v2333_v33  ;;  %v7767_v12 = vld [vmem:[%s10359_s5 + $0x60] sm:$0xff]  }
 0x224   : > { %7587 = vmatprep.mubr.msk.bf16.mxu1 %vm10734_vm7, %v8638_v2  ;;  %v2344_v2 = vadd.f32 %v6632_v7, %v8901_v60  ;;  %7043 = vmatprep.subr.bf16.mxu0 %v7767_v12 }
 0x225   : > { %v9037_v34 = vadd.f32 %v6738_v13, %v2336_v31  ;;  %7044 = vmatpush3.bf16.msra.mxu0 %v7768_v0 }
 0x226   : > { %v6633_v14 = vpop.f32.mrb[36].mxu1 }
 0x227   : > { %v6739_v25 = vpop.f32.mrb[64].mxu0  ;;  %v6634_v28 = vpop.f32.mrb[37].mxu1 }
 0x228   : > { %v6635_v16 = vadd.f32 %v6634_v28, %v6633_v14  ;;  %v6740_v37 = vpop.f32.mrb[65].mxu0  ;;  %v6636_v4 = vpop.f32.mrb[38].mxu1 }
 0x229   : > { %v6741_v10 = vadd.f32 %v6740_v37, %v6739_v25  ;;  %v6742_v42 = vpop.f32.mrb[66].mxu0  ;;  %v6637_v18 = vpop.f32.mrb[39].mxu1 }
 0x22a   : > { %v6638_v62 = vadd.f32 %v6637_v18, %v6636_v4  ;;  %v6743_v33 = vpop.f32.mrb[67].mxu0  ;;  %v2349_v37 = vadd.f32 %v6635_v16, %v8901_v60 }
 0x22b   : > { %v6744_v27 = vadd.f32 %v6743_v33, %v6742_v42  ;;  %7588 = vmatmul.mubr.msk.bf16.gmra.mrb[144].mxu1 %vm10735_vm11, %v8668_v24  ;;  %v9047_v38 = vadd.f32 %v6741_v10, %v2341_v21 }
 0x22c   : > { %7591 = vmatprep.mubr.msk.bf16.mxu1 %vm10736_vm1, %v8698_v61  ;;  %v2352_v33 = vadd.f32 %v6638_v62, %v8901_v60 }
 0x22d   : > { %v9055_v31 = vadd.f32 %v6744_v27, %v2344_v2 }
 0x22e   : > { %v6639_v13 = vpop.f32.mrb[40].mxu1 }
 0x22f   : > { %v6745_v7 = vpop.f32.mrb[68].mxu0  ;;  %v6640_v14 = vpop.f32.mrb[41].mxu1 }
 0x230   : > { %v6641_v25 = vadd.f32 %v6640_v14, %v6639_v13  ;;  %v6746_v28 = vpop.f32.mrb[69].mxu0  ;;  %v6642_v24 = vpop.f32.mrb[42].mxu1 }
 0x231   : > { %v6747_v4 = vadd.f32 %v6746_v28, %v6745_v7  ;;  %v6748_v21 = vpop.f32.mrb[70].mxu0  ;;  %v6643_v10 = vpop.f32.mrb[43].mxu1 }
 0x232   : > { %v6644_v61 = vadd.f32 %v6643_v10, %v6642_v24  ;;  %v6749_v42 = vpop.f32.mrb[71].mxu0  ;;  %v2357_v28 = vadd.f32 %v6641_v25, %v8901_v60  ;;  %v1609_v25 = vld [vmem:[#allocation2 + $0x119] sm:$0xff] }
 0x233   : > { %v9058_v18 = vadd.f32 %v6747_v4, %v2349_v37  ;;  %v6750_v12 = vadd.f32 %v6749_v42, %v6748_v21  ;;  %7592 = vmatmul.mubr.msk.bf16.gmra.mrb[148].mxu1 %vm10714_vm2, %v8728_v1  ;;  %v7769_v1 = vld [vmem:[%s10359_s5 + $0x68] sm:$0xff]  }
 0x234   : > { %7595 = vmatprep.mubr.msk.bf16.mxu1 %vm10719_vm5, %v8757_v45  ;;  %v2360_v10 = vadd.f32 %v6644_v61, %v8901_v60  ;;  %7045 = vmatprep.subr.bf16.mxu0 %v7769_v1 }
 0x235   : > { %v9067_v2 = vadd.f32 %v6750_v12, %v2352_v33  ;;  %v1610_v33 = vld [vmem:[#allocation2 + $0x121] sm:$0xff] }
 0x236   : > { %v6645_v16 = vpop.f32.mrb[44].mxu1  ;;  %v7770_v12 = vld [vmem:[%s10359_s5 + $0x28] sm:$0xff]  }
 0x237   : > { %v6751_v27 = vpop.f32.mrb[72].mxu0  ;;  %v6646_v0 = vpop.f32.mrb[45].mxu1  ;;  %7046 = vmatpush3.bf16.msra.mxu0 %v7770_v12 }
 0x238   : > { %v6647_v13 = vadd.f32 %v6646_v0, %v6645_v16  ;;  %v6752_v7 = vpop.f32.mrb[73].mxu0  ;;  %v6648_v14 = vpop.f32.mrb[46].mxu1 }
 0x239   : > { %v6753_v62 = vadd.f32 %v6752_v7, %v6751_v27  ;;  %v6754_v24 = vpop.f32.mrb[74].mxu0  ;;  %v6649_v37 = vpop.f32.mrb[47].mxu1  ;;  %v6110_v7 = vpack.c.bf16 %v1610_v33, %v1609_v25 }
 0x23a   : > { %v6650_v4 = vadd.f32 %v6649_v37, %v6648_v14  ;;  %v6755_v21 = vpop.f32.mrb[75].mxu0 }
 0x23b   : > { %v9073_v45 = vadd.f32 %v6753_v62, %v2357_v28  ;;  %v6756_v42 = vadd.f32 %v6755_v21, %v6754_v24  ;;  %7596 = vmatmul.mubr.msk.bf16.gmra.mrb[152].mxu1 %vm10726_vm13, %v8778_v51  ;;  %v2365_v62 = vadd.f32 %v6647_v13, %v8901_v60 }
 0x23c   : > { %7599 = vmatprep.mubr.msk.bf16.mxu1 %vm8753_vm3, %v8940_v36  ;;  %v2368_v57 = vadd.f32 %v6650_v4, %v8901_v60  ;;  %vm10738_vm3 = vnez %v10568_v55 }
 0x23d   : > { %v9085_v16 = vadd.f32 %v6756_v42, %v2360_v10 }
 0x23e   : > { %v6651_v27 = vpop.f32.mrb[48].mxu1 }
 0x23f   : > { %v6757_v61 = vpop.f32.mrb[76].mxu0  ;;  %v6652_v0 = vpop.f32.mrb[49].mxu1 }
 0x240   : > { %v6653_v14 = vadd.f32 %v6652_v0, %v6651_v27  ;;  %v6758_v51 = vpop.f32.mrb[77].mxu0  ;;  %v6654_v28 = vpop.f32.mrb[50].mxu1 }
 0x241   : > { %v6759_v36 = vadd.f32 %v6758_v51, %v6757_v61  ;;  %v6760_v24 = vpop.f32.mrb[78].mxu0  ;;  %v6655_v37 = vpop.f32.mrb[51].mxu1 }
 0x242   : > { %v6656_v21 = vadd.f32 %v6655_v37, %v6654_v28  ;;  %v6761_v1 = vpop.f32.mrb[79].mxu0  ;;  %v2373_v0 = vadd.f32 %v6653_v14, %v8901_v60 }
 0x243   : > { %v9089_v46 = vadd.f32 %v6759_v36, %v2365_v62  ;;  %v6762_v10 = vadd.f32 %v6761_v1, %v6760_v24  ;;  %7600 = vmatmul.mubr.msk.bf16.gmra.mrb[156].mxu1 %vm8774_vm0, %v6110_v7  ;;  %v7771_v36 = vld [vmem:[%s10359_s5 + $0x70] sm:$0xff]   ;;  %vm10737_vm0 = vnez %v10556_v59 }
 0x244   : > { %7047 = vmatprep.subr.bf16.mxu0 %v7771_v36  ;;  %v7772_v1 = vld [vmem:[%s10359_s5 + $0x30] sm:$0xff]  }
 0x245   : > { %v9093_v42 = vadd.f32 %v6762_v10, %v2368_v57  ;;  %v2376_v57 = vadd.f32 %v6656_v21, %v8901_v60  ;;  %7048 = vmatpush3.bf16.msra.mxu0 %v7772_v1  ;;  %v7773_v21 = vld [vmem:[%s10359_s5 + $0xc0] sm:$0xff]   ;;  %v7829_v59 = vld [vmem:[%s10359_s5 + $0x230] sm:$0xff]  }
 0x246   : > { %v6657_v25 = vpop.f32.mrb[52].mxu1  ;;  %7147 = vmatprep.subr.bf16.mxu1 %v7773_v21 }
 0x247   : > { %v6763_v33 = vpop.f32.mrb[80].mxu0  ;;  %v6658_v12 = vpop.f32.mrb[53].mxu1 }
 0x248   : > { %v6659_v27 = vadd.f32 %v6658_v12, %v6657_v25  ;;  %v6764_v13 = vpop.f32.mrb[81].mxu0  ;;  %v6660_v61 = vpop.f32.mrb[54].mxu1 }
 0x249   : > { %v6765_v51 = vadd.f32 %v6764_v13, %v6763_v33  ;;  %v6766_v28 = vpop.f32.mrb[82].mxu0  ;;  %v6661_v37 = vpop.f32.mrb[55].mxu1 }
 0x24a   : > { %v6662_v4 = vadd.f32 %v6661_v37, %v6660_v61  ;;  %v6767_v62 = vpop.f32.mrb[83].mxu0 }
 0x24b   : > { %v9100_v7 = vadd.f32 %v6765_v51, %v2373_v0  ;;  %v6768_v24 = vadd.f32 %v6767_v62, %v6766_v28  ;;  %v2381_v0 = vadd.f32 %v6659_v27, %v8901_v60  ;;  %v7774_v62 = vld [vmem:[%s10359_s5 + $0x80] sm:$0xff]   ;;  %v7775_v27 = vld [vmem:[%s10359_s5 + $0xc8] sm:$0xff]  }
 0x24c   : > { %7148 = vmatpush3.bf16.msra.mxu1 %v7774_v62 }
 0x24d   : > { %v9105_v14 = vadd.f32 %v6768_v24, %v2376_v57  ;;  %v2384_v24 = vadd.f32 %v6662_v4, %v8901_v60  ;;  %7149 = vmatprep.subr.bf16.mxu1 %v7775_v27 }
 0x24e   : > { %v6663_v10 = vpop.f32.mrb[56].mxu1 }
 0x24f   : > { %v6769_v25 = vpop.f32.mrb[84].mxu0  ;;  %v6664_v33 = vpop.f32.mrb[57].mxu1 }
 0x250   : > { %v6665_v12 = vadd.f32 %v6664_v33, %v6663_v10  ;;  %v6770_v13 = vpop.f32.mrb[85].mxu0  ;;  %v6666_v61 = vpop.f32.mrb[58].mxu1  ;;  %v7776_v33 = vld [vmem:[%s10359_s5 + $0x88] sm:$0xff]  }
 0x251   : > { %v6771_v51 = vadd.f32 %v6770_v13, %v6769_v25  ;;  %v6772_v28 = vpop.f32.mrb[86].mxu0  ;;  %v6667_v37 = vpop.f32.mrb[59].mxu1  ;;  %7150 = vmatpush3.bf16.msra.mxu1 %v7776_v33  ;;  %v7777_v33 = vld [vmem:[%s10359_s5 + $0x78] sm:$0xff]  }
 0x252   : > { %v6668_v36 = vadd.f32 %v6667_v37, %v6666_v61  ;;  %v6773_v57 = vpop.f32.mrb[87].mxu0  ;;  %v2389_v37 = vadd.f32 %v6665_v12, %v8901_v60  ;;  %7049 = vmatprep.subr.bf16.mxu0 %v7777_v33  ;;  %v7778_v12 = vld [vmem:[%s10359_s5 + $0x38] sm:$0xff]  }
 0x253   : > { %v9115_v1 = vadd.f32 %v6771_v51, %v2381_v0  ;;  %v6774_v10 = vadd.f32 %v6773_v57, %v6772_v28  ;;  %v7779_v28 = vld [vmem:[%s10359_s5 + $0xd0] sm:$0xff]   ;;  %7050 = vmatpush3.bf16.msra.mxu0 %v7778_v12  ;;  %v7784_v12 = vld [vmem:[%s10359_s5 + $0xa0] sm:$0xff]  }
 0x254   : > { %7151 = vmatprep.subr.bf16.mxu1 %v7779_v28 }
 0x255   : > { %v9120_v25 = vadd.f32 %v6774_v10, %v2384_v24  ;;  %v7780_v10 = vld [vmem:[%s10359_s5 + $0x90] sm:$0xff]  }
 0x256   : > { %v6669_v13 = vpop.f32.mrb[60].mxu1  ;;  %7152 = vmatpush3.bf16.msra.mxu1 %v7780_v10 }
 0x257   : > { %v6775_v61 = vpop.f32.mrb[88].mxu0  ;;  %v6670_v21 = vpop.f32.mrb[61].mxu1 }
 0x258   : > { %v6671_v4 = vadd.f32 %v6670_v21, %v6669_v13  ;;  %v6776_v0 = vpop.f32.mrb[89].mxu0  ;;  %v6672_v51 = vpop.f32.mrb[62].mxu1  ;;  %v2392_v13 = vadd.f32 %v6668_v36, %v8901_v60 }
 0x259   : > { %v6777_v62 = vadd.f32 %v6776_v0, %v6775_v61  ;;  %v6778_v57 = vpop.f32.mrb[90].mxu0  ;;  %v6673_v24 = vpop.f32.mrb[63].mxu1  ;;  %v7781_v61 = vld [vmem:[%s10359_s5 + $0xd8] sm:$0xff]  }
 0x25a   : > { %v6674_v27 = vadd.f32 %v6673_v24, %v6672_v51  ;;  %v6779_v56 = vpop.f32.mrb[91].mxu0  ;;  %v7782_v51 = vld [vmem:[%s10359_s5 + $0x98] sm:$0xff]   ;;  %7153 = vmatprep.subr.bf16.mxu1 %v7781_v61  ;;  %v7783_v24 = vld [vmem:[%s10359_s5 + $0xe0] sm:$0xff]  }
 0x25b   : > { %v9136_v21 = vadd.f32 %v6777_v62, %v2389_v37  ;;  %v6780_v58 = vadd.f32 %v6779_v56, %v6778_v57  ;;  %7154 = vmatpush3.bf16.msra.mxu1 %v7782_v51 }
 0x25c   : > { %7155 = vmatprep.subr.bf16.mxu1 %v7783_v24 }
 0x25d   : > { %v9144_v0 = vadd.f32 %v6780_v58, %v2392_v13  ;;  %v2397_v58 = vadd.f32 %v6671_v4, %v8901_v60  ;;  %v3112_v4 = vld [vmem:[#allocation2 + $0xf] sm:$0xff] }
 0x25e   : > { %v6803_v36 = vpop.f32.mrb[64].mxu1  ;;  %v6186_v41 = vpack.c.bf16 %v3112_v4, %v3111_v39  ;;  %v7788_v39 = vld [vmem:[%s10359_s5 + $0xf0] sm:$0xff]  }
 0x25f   : > { %v6781_v56 = vpop.f32.mrb[92].mxu0  ;;  %v6804_v28 = vpop.f32.mrb[65].mxu1  ;;  %7156 = vmatpush3.bf16.msra.mxu1 %v7784_v12 }
 0x260   : > { %v6782_v37 = vpop.f32.mrb[93].mxu0  ;;  %v6805_v62 = vadd.f32 %v6804_v28, %v6803_v36  ;;  %v6806_v57 = vpop.f32.mrb[66].mxu1  ;;  %v2400_v36 = vadd.f32 %v6674_v27, %v8901_v60  ;;  %v7786_v60 = vld [vmem:[%s10359_s5 + $0xa8] sm:$0xff]   ;;  %6187 = vmatmul.mubr.msk.bf16.vlgmr.msra.gmra.mrb[160].mxu0 %vm10737_vm0, %v6186_v41 }
 0x261   : > { %v6783_v10 = vadd.f32 %v6782_v37, %v6781_v56  ;;  %v6784_v33 = vpop.f32.mrb[94].mxu0  ;;  %v6807_v13 = vpop.f32.mrb[67].mxu1  ;;  %v7785_v37 = vld [vmem:[%s10359_s5 + $0xe8] sm:$0xff]  }
 0x262   : > { %v2599_v61 = vadd.f32 %v6805_v62, %v8911_v11  ;;  %v6785_v20 = vpop.f32.mrb[95].mxu0  ;;  %v6808_v51 = vadd.f32 %v6807_v13, %v6806_v57  ;;  %7157 = vmatprep.subr.bf16.mxu1 %v7785_v37  ;;  %v7787_v37 = vld [vmem:[%s10359_s5 + $0x140] sm:$0xff]  }
 0x263   : > { %v9158_v28 = vadd.f32 %v6783_v10, %v2397_v58  ;;  %v6786_v19 = vadd.f32 %v6785_v20, %v6784_v33  ;;  %7158 = vmatpush3.bf16.msra.mxu1 %v7786_v60  ;;  %v7790_v58 = vld [vmem:[%s10359_s5 + $0xb0] sm:$0xff]   ;;  %7259 = vmatprep.subr.bf16.mxu0 %v7787_v37 }
 0x264   : > { %v2602_v56 = vadd.f32 %v6808_v51, %v8923_v50  ;;  %7159 = vmatprep.subr.bf16.mxu1 %v7788_v39 }
 0x265   : > { %v9164_v35 = vadd.f32 %v6786_v19, %v2400_v36  ;;  %v7791_v36 = vld [vmem:[%s10359_s5 + $0xf8] sm:$0xff]  }
 0x266   : > { %v6809_v11 = vpop.f32.mrb[68].mxu1 }
 0x267   : > { %v6915_v20 = vpop.f32.mrb[96].mxu0  ;;  %v6810_v50 = vpop.f32.mrb[69].mxu1  ;;  %7160 = vmatpush3.bf16.msra.mxu1 %v7790_v58 }
 0x268   : > { %v6811_v27 = vadd.f32 %v6810_v50, %v6809_v11  ;;  %v6916_v62 = vpop.f32.mrb[97].mxu0  ;;  %v6812_v57 = vpop.f32.mrb[70].mxu1  ;;  %7161 = vmatprep.subr.bf16.mxu1 %v7791_v36 }
 0x269   : > { %v6917_v19 = vadd.f32 %v6916_v62, %v6915_v20  ;;  %v6918_v15 = vpop.f32.mrb[98].mxu0  ;;  %v6813_v24 = vpop.f32.mrb[71].mxu1 }
 0x26a   : > { %v2607_v10 = vadd.f32 %v6811_v27, %v8928_v40  ;;  %v6814_v41 = vadd.f32 %v6813_v24, %v6812_v57  ;;  %v6919_v33 = vpop.f32.mrb[99].mxu0  ;;  %v7792_v40 = vld [vmem:[%s10359_s5 + $0xb8] sm:$0xff]  }
 0x26b   : > { %v6920_v13 = vadd.f32 %v6919_v33, %v6918_v15  ;;  %v9179_v12 = vadd.f32 %v6917_v19, %v2599_v61  ;;  %v7789_v61 = vld [vmem:[%s10359_s5 + $0x100] sm:$0xff]   ;;  %7162 = vmatpush3.bf16.msra.mxu1 %v7792_v40 }
 0x26c   : > { %v2610_v51 = vadd.f32 %v6814_v41, %v8937_v30  ;;  %7260 = vmatpush3.bf16.msra.mxu0 %v7789_v61 }
 0x26d   : > { %v9185_v4 = vadd.f32 %v6920_v13, %v2602_v56 }
 0x26e   : > { %v6815_v60 = vpop.f32.mrb[72].mxu1 }
 0x26f   : > { %v6921_v30 = vpop.f32.mrb[100].mxu0  ;;  %v6816_v11 = vpop.f32.mrb[73].mxu1 }
 0x270   : > { %v6817_v56 = vadd.f32 %v6816_v11, %v6815_v60  ;;  %v6922_v20 = vpop.f32.mrb[101].mxu0  ;;  %v6818_v50 = vpop.f32.mrb[74].mxu1 }
 0x271   : > { %v6923_v27 = vadd.f32 %v6922_v20, %v6921_v30  ;;  %v6924_v62 = vpop.f32.mrb[102].mxu0  ;;  %v6819_v57 = vpop.f32.mrb[75].mxu1 }
 0x272   : > { %v2615_v39 = vadd.f32 %v6817_v56, %v8949_v48  ;;  %v6820_v19 = vadd.f32 %v6819_v57, %v6818_v50  ;;  %v6925_v15 = vpop.f32.mrb[103].mxu0 }
 0x273   : > { %v6926_v24 = vadd.f32 %v6925_v15, %v6924_v62  ;;  %v9197_v58 = vadd.f32 %v6923_v27, %v2607_v10  ;;  %v7793_v27 = vld [vmem:[%s10359_s5 + $0x148] sm:$0xff]  }
 0x274   : > { %v2618_v41 = vadd.f32 %v6820_v19, %v8960_v23  ;;  %v7794_v19 = vld [vmem:[%s10359_s5 + $0x108] sm:$0xff]   ;;  %7261 = vmatprep.subr.bf16.mxu0 %v7793_v27 }
 0x275   : > { %v9200_v33 = vadd.f32 %v6926_v24, %v2610_v51  ;;  %7262 = vmatpush3.bf16.msra.mxu0 %v7794_v19 }
 0x276   : > { %v6821_v13 = vpop.f32.mrb[76].mxu1 }
 0x277   : > { %v6927_v36 = vpop.f32.mrb[104].mxu0  ;;  %v6822_v37 = vpop.f32.mrb[77].mxu1 }
 0x278   : > { %v6823_v40 = vadd.f32 %v6822_v37, %v6821_v13  ;;  %v6928_v60 = vpop.f32.mrb[105].mxu0  ;;  %v6824_v61 = vpop.f32.mrb[78].mxu1 }
 0x279   : > { %v6929_v30 = vadd.f32 %v6928_v60, %v6927_v36  ;;  %v6930_v11 = vpop.f32.mrb[106].mxu0  ;;  %v6825_v20 = vpop.f32.mrb[79].mxu1 }
 0x27a   : > { %v2623_v48 = vadd.f32 %v6823_v40, %v8966_v8  ;;  %v6826_v56 = vadd.f32 %v6825_v20, %v6824_v61  ;;  %v6931_v50 = vpop.f32.mrb[107].mxu0 }
 0x27b   : > { %v6932_v62 = vadd.f32 %v6931_v50, %v6930_v11  ;;  %v9203_v10 = vadd.f32 %v6929_v30, %v2615_v39 }
 0x27c   : > { %v2626_v23 = vadd.f32 %v6826_v56, %v8975_v5 }
 0x27d   : > { %v9206_v51 = vadd.f32 %v6932_v62, %v2618_v41 }
 0x27e   : > { %v6827_v57 = vpop.f32.mrb[80].mxu1 }
 0x27f   : > { %v6933_v15 = vpop.f32.mrb[108].mxu0  ;;  %v6828_v8 = vpop.f32.mrb[81].mxu1 }
 0x280   : > { %v6829_v24 = vadd.f32 %v6828_v8, %v6827_v57  ;;  %v6934_v13 = vpop.f32.mrb[109].mxu0  ;;  %v6830_v39 = vpop.f32.mrb[82].mxu1 }
 0x281   : > { %v6935_v36 = vadd.f32 %v6934_v13, %v6933_v15  ;;  %v6936_v5 = vpop.f32.mrb[110].mxu0  ;;  %v6831_v41 = vpop.f32.mrb[83].mxu1 }
 0x282   : > { %v2631_v37 = vadd.f32 %v6829_v24, %v8985_v29  ;;  %v6832_v40 = vadd.f32 %v6831_v41, %v6830_v39  ;;  %v6937_v60 = vpop.f32.mrb[111].mxu0 }
 0x283   : > { %v6938_v61 = vadd.f32 %v6937_v60, %v6936_v5  ;;  %v9215_v30 = vadd.f32 %v6935_v36, %v2623_v48  ;;  %v7795_v36 = vld [vmem:[%s10359_s5 + $0x150] sm:$0xff]  }
 0x284   : > { %v2634_v11 = vadd.f32 %v6832_v40, %v8995_v17  ;;  %v7796_v40 = vld [vmem:[%s10359_s5 + $0x110] sm:$0xff]   ;;  %7263 = vmatprep.subr.bf16.mxu0 %v7795_v36 }
 0x285   : > { %v9218_v20 = vadd.f32 %v6938_v61, %v2626_v23  ;;  %7264 = vmatpush3.bf16.msra.mxu0 %v7796_v40 }
 0x286   : > { %v6833_v56 = vpop.f32.mrb[84].mxu1 }
 0x287   : > { %v6939_v50 = vpop.f32.mrb[112].mxu0  ;;  %v6834_v62 = vpop.f32.mrb[85].mxu1 }
 0x288   : > { %v6835_v27 = vadd.f32 %v6834_v62, %v6833_v56  ;;  %v6940_v57 = vpop.f32.mrb[113].mxu0  ;;  %v6836_v19 = vpop.f32.mrb[86].mxu1 }
 0x289   : > { %v6941_v15 = vadd.f32 %v6940_v57, %v6939_v50  ;;  %v6942_v8 = vpop.f32.mrb[114].mxu0  ;;  %v6837_v13 = vpop.f32.mrb[87].mxu1 }
 0x28a   : > { %v2639_v29 = vadd.f32 %v6835_v27, %v9002_v49  ;;  %v6838_v24 = vadd.f32 %v6837_v13, %v6836_v19  ;;  %v6943_v39 = vpop.f32.mrb[115].mxu0 }
 0x28b   : > { %v6944_v5 = vadd.f32 %v6943_v39, %v6942_v8  ;;  %v9221_v48 = vadd.f32 %v6941_v15, %v2631_v37 }
 0x28c   : > { %v2642_v17 = vadd.f32 %v6838_v24, %v9007_v54 }
 0x28d   : > { %v9224_v23 = vadd.f32 %v6944_v5, %v2634_v11 }
 0x28e   : > { %v6839_v41 = vpop.f32.mrb[88].mxu1 }
 0x28f   : > { %v6945_v60 = vpop.f32.mrb[116].mxu0  ;;  %v6840_v49 = vpop.f32.mrb[89].mxu1 }
 0x290   : > { %v6841_v61 = vadd.f32 %v6840_v49, %v6839_v41  ;;  %v6946_v56 = vpop.f32.mrb[117].mxu0  ;;  %v6842_v37 = vpop.f32.mrb[90].mxu1 }
 0x291   : > { %v6947_v50 = vadd.f32 %v6946_v56, %v6945_v60  ;;  %v6948_v54 = vpop.f32.mrb[118].mxu0  ;;  %v6843_v11 = vpop.f32.mrb[91].mxu1 }
 0x292   : > { %v2647_v62 = vadd.f32 %v6841_v61, %v9017_v6  ;;  %v6844_v27 = vadd.f32 %v6843_v11, %v6842_v37  ;;  %v6949_v57 = vpop.f32.mrb[119].mxu0 }
 0x293   : > { %v6950_v19 = vadd.f32 %v6949_v57, %v6948_v54  ;;  %v9233_v15 = vadd.f32 %v6947_v50, %v2639_v29  ;;  %v7797_v50 = vld [vmem:[%s10359_s5 + $0x158] sm:$0xff]  }
 0x294   : > { %v2650_v8 = vadd.f32 %v6844_v27, %v9025_v26  ;;  %v7798_v27 = vld [vmem:[%s10359_s5 + $0x118] sm:$0xff]   ;;  %7265 = vmatprep.subr.bf16.mxu0 %v7797_v50 }
 0x295   : > { %v9236_v13 = vadd.f32 %v6950_v19, %v2642_v17  ;;  %7266 = vmatpush3.bf16.msra.mxu0 %v7798_v27 }
 0x296   : > { %v6845_v24 = vpop.f32.mrb[92].mxu1 }
 0x297   : > { %v6951_v39 = vpop.f32.mrb[120].mxu0  ;;  %v6846_v5 = vpop.f32.mrb[93].mxu1 }
 0x298   : > { %v6847_v36 = vadd.f32 %v6846_v5, %v6845_v24  ;;  %v6952_v41 = vpop.f32.mrb[121].mxu0  ;;  %v6848_v40 = vpop.f32.mrb[94].mxu1 }
 0x299   : > { %v6953_v60 = vadd.f32 %v6952_v41, %v6951_v39  ;;  %v6954_v49 = vpop.f32.mrb[122].mxu0  ;;  %v6849_v56 = vpop.f32.mrb[95].mxu1 }
 0x29a   : > { %v2655_v6 = vadd.f32 %v6847_v36, %v9032_v43  ;;  %v6850_v61 = vadd.f32 %v6849_v56, %v6848_v40  ;;  %v6955_v37 = vpop.f32.mrb[123].mxu0  ;;  %v7799_v40 = vld [vmem:[%s10359_s5 + $0x160] sm:$0xff]  }
 0x29b   : > { %v6956_v54 = vadd.f32 %v6955_v37, %v6954_v49  ;;  %v9239_v29 = vadd.f32 %v6953_v60, %v2647_v62  ;;  %v7800_v60 = vld [vmem:[%s10359_s5 + $0x1c0] sm:$0xff]   ;;  %7267 = vmatprep.subr.bf16.mxu0 %v7799_v40 }
 0x29c   : > { %v2658_v26 = vadd.f32 %v6850_v61, %v9037_v34  ;;  %7371 = vmatprep.subr.bf16.mxu1 %v7800_v60 }
 0x29d   : > { %v9242_v17 = vadd.f32 %v6956_v54, %v2650_v8 }
 0x29e   : > { %v6851_v11 = vpop.f32.mrb[96].mxu1 }
 0x29f   : > { %v6957_v57 = vpop.f32.mrb[124].mxu0  ;;  %v6852_v43 = vpop.f32.mrb[97].mxu1 }
 0x2a0   : > { %v6853_v19 = vadd.f32 %v6852_v43, %v6851_v11  ;;  %v6958_v24 = vpop.f32.mrb[125].mxu0  ;;  %v6854_v62 = vpop.f32.mrb[98].mxu1 }
 0x2a1   : > { %v6959_v39 = vadd.f32 %v6958_v24, %v6957_v57  ;;  %v6960_v34 = vpop.f32.mrb[126].mxu0  ;;  %v6855_v8 = vpop.f32.mrb[99].mxu1 }
 0x2a2   : > { %v2663_v5 = vadd.f32 %v6853_v19, %v9047_v38  ;;  %v6856_v36 = vadd.f32 %v6855_v8, %v6854_v62  ;;  %v6961_v41 = vpop.f32.mrb[127].mxu0 }
 0x2a3   : > { %v6962_v49 = vadd.f32 %v6961_v41, %v6960_v34  ;;  %v9257_v56 = vadd.f32 %v6959_v39, %v2655_v6  ;;  %v7801_v6 = vld [vmem:[%s10359_s5 + $0x120] sm:$0xff]  }
 0x2a4   : > { %v2666_v61 = vadd.f32 %v6856_v36, %v9055_v31  ;;  %7268 = vmatpush3.bf16.msra.mxu0 %v7801_v6 }
 0x2a5   : > { %v9260_v37 = vadd.f32 %v6962_v49, %v2658_v26 }
 0x2a6   : > { %v6857_v38 = vpop.f32.mrb[100].mxu1 }
 0x2a7   : > { %v6963_v54 = vpop.f32.mrb[128].mxu0  ;;  %v6858_v50 = vpop.f32.mrb[101].mxu1 }
 0x2a8   : > { %v6859_v11 = vadd.f32 %v6858_v50, %v6857_v38  ;;  %v6964_v27 = vpop.f32.mrb[129].mxu0  ;;  %v6860_v57 = vpop.f32.mrb[102].mxu1 }
 0x2a9   : > { %v6965_v43 = vadd.f32 %v6964_v27, %v6963_v54  ;;  %v6966_v19 = vpop.f32.mrb[130].mxu0  ;;  %v6861_v24 = vpop.f32.mrb[103].mxu1 }
 0x2aa   : > { %v2671_v62 = vadd.f32 %v6859_v11, %v9058_v18  ;;  %v6862_v31 = vadd.f32 %v6861_v24, %v6860_v57  ;;  %v6967_v39 = vpop.f32.mrb[131].mxu0 }
 0x2ab   : > { %v6968_v34 = vadd.f32 %v6967_v39, %v6966_v19  ;;  %v9266_v26 = vadd.f32 %v6965_v43, %v2663_v5  ;;  %v7803_v5 = vld [vmem:[%s10359_s5 + $0x168] sm:$0xff]  }
 0x2ac   : > { %v2674_v8 = vadd.f32 %v6862_v31, %v9067_v2  ;;  %7269 = vmatprep.subr.bf16.mxu0 %v7803_v5 }
 0x2ad   : > { %v9269_v36 = vadd.f32 %v6968_v34, %v2666_v61 }
 0x2ae   : > { %v6863_v41 = vpop.f32.mrb[104].mxu1 }
 0x2af   : > { %v6969_v40 = vpop.f32.mrb[132].mxu0  ;;  %v6864_v60 = vpop.f32.mrb[105].mxu1 }
 0x2b0   : > { %v6865_v49 = vadd.f32 %v6864_v60, %v6863_v41  ;;  %v6970_v38 = vpop.f32.mrb[133].mxu0  ;;  %v6866_v54 = vpop.f32.mrb[106].mxu1  ;;  %v7805_v60 = vld [vmem:[%s10359_s5 + $0x128] sm:$0xff]  }
 0x2b1   : > { %v6971_v50 = vadd.f32 %v6970_v38, %v6969_v40  ;;  %v6972_v27 = vpop.f32.mrb[134].mxu0  ;;  %v6867_v47 = vpop.f32.mrb[107].mxu1  ;;  %7270 = vmatpush3.bf16.msra.mxu0 %v7805_v60 }
 0x2b2   : > { %v2679_v18 = vadd.f32 %v6865_v49, %v9073_v45  ;;  %v6868_v11 = vadd.f32 %v6867_v47, %v6866_v54  ;;  %v6973_v57 = vpop.f32.mrb[135].mxu0 }
 0x2b3   : > { %v6974_v2 = vadd.f32 %v6973_v57, %v6972_v27  ;;  %v9275_v61 = vadd.f32 %v6971_v50, %v2671_v62 }
 0x2b4   : > { %v2682_v43 = vadd.f32 %v6868_v11, %v9085_v16 }
 0x2b5   : > { %v9278_v19 = vadd.f32 %v6974_v2, %v2674_v8 }
 0x2b6   : > { %v6869_v24 = vpop.f32.mrb[108].mxu1 }
 0x2b7   : > { %v6975_v6 = vpop.f32.mrb[136].mxu0  ;;  %v6870_v31 = vpop.f32.mrb[109].mxu1 }
 0x2b8   : > { %v6871_v39 = vadd.f32 %v6870_v31, %v6869_v24  ;;  %v6976_v34 = vpop.f32.mrb[137].mxu0  ;;  %v6872_v45 = vpop.f32.mrb[110].mxu1 }
 0x2b9   : > { %v6977_v47 = vadd.f32 %v6976_v34, %v6975_v6  ;;  %v6978_v41 = vpop.f32.mrb[138].mxu0  ;;  %v6873_v40 = vpop.f32.mrb[111].mxu1 }
 0x2ba   : > { %v2687_v62 = vadd.f32 %v6871_v39, %v9089_v46  ;;  %v6874_v49 = vadd.f32 %v6873_v40, %v6872_v45  ;;  %v6979_v16 = vpop.f32.mrb[139].mxu0 }
 0x2bb   : > { %v6980_v38 = vadd.f32 %v6979_v16, %v6978_v41  ;;  %v9284_v8 = vadd.f32 %v6977_v47, %v2679_v18  ;;  %v7807_v18 = vld [vmem:[%s10359_s5 + $0x170] sm:$0xff]  }
 0x2bc   : > { %v2690_v54 = vadd.f32 %v6874_v49, %v9093_v42  ;;  %7271 = vmatprep.subr.bf16.mxu0 %v7807_v18 }
 0x2bd   : > { %v9287_v50 = vadd.f32 %v6980_v38, %v2682_v43 }
 0x2be   : > { %v6875_v27 = vpop.f32.mrb[112].mxu1 }
 0x2bf   : > { %v6981_v11 = vpop.f32.mrb[140].mxu0  ;;  %v6876_v57 = vpop.f32.mrb[113].mxu1 }
 0x2c0   : > { %v6877_v5 = vadd.f32 %v6876_v57, %v6875_v27  ;;  %v6982_v2 = vpop.f32.mrb[141].mxu0  ;;  %v6878_v24 = vpop.f32.mrb[114].mxu1 }
 0x2c1   : > { %v6983_v6 = vadd.f32 %v6982_v2, %v6981_v11  ;;  %v6984_v31 = vpop.f32.mrb[142].mxu0  ;;  %v6879_v34 = vpop.f32.mrb[115].mxu1 }
 0x2c2   : > { %v2695_v46 = vadd.f32 %v6877_v5, %v9100_v7  ;;  %v6880_v39 = vadd.f32 %v6879_v34, %v6878_v24  ;;  %v6985_v45 = vpop.f32.mrb[143].mxu0  ;;  %v7809_v5 = vld [vmem:[%s10359_s5 + $0x130] sm:$0xff]  }
 0x2c3   : > { %v6986_v42 = vadd.f32 %v6985_v45, %v6984_v31  ;;  %v9293_v43 = vadd.f32 %v6983_v6, %v2687_v62  ;;  %7272 = vmatpush3.bf16.msra.mxu0 %v7809_v5 }
 0x2c4   : > { %v2698_v47 = vadd.f32 %v6880_v39, %v9105_v14 }
 0x2c5   : > { %v9296_v41 = vadd.f32 %v6986_v42, %v2690_v54 }
 0x2c6   : > { %v6881_v40 = vpop.f32.mrb[116].mxu1 }
 0x2c7   : > { %v6987_v60 = vpop.f32.mrb[144].mxu0  ;;  %v6882_v49 = vpop.f32.mrb[117].mxu1 }
 0x2c8   : > { %v6883_v16 = vadd.f32 %v6882_v49, %v6881_v40  ;;  %v6988_v38 = vpop.f32.mrb[145].mxu0  ;;  %v6884_v7 = vpop.f32.mrb[118].mxu1 }
 0x2c9   : > { %v6989_v27 = vadd.f32 %v6988_v38, %v6987_v60  ;;  %v6990_v11 = vpop.f32.mrb[146].mxu0  ;;  %v6885_v57 = vpop.f32.mrb[119].mxu1 }
 0x2ca   : > { %v2703_v62 = vadd.f32 %v6883_v16, %v9115_v1  ;;  %v6886_v2 = vadd.f32 %v6885_v57, %v6884_v7  ;;  %v6991_v14 = vpop.f32.mrb[147].mxu0 }
 0x2cb   : > { %v6992_v24 = vadd.f32 %v6991_v14, %v6990_v11  ;;  %v9302_v54 = vadd.f32 %v6989_v27, %v2695_v46  ;;  %v7811_v46 = vld [vmem:[%s10359_s5 + $0x178] sm:$0xff]  }
 0x2cc   : > { %v2706_v6 = vadd.f32 %v6886_v2, %v9120_v25  ;;  %7273 = vmatprep.subr.bf16.mxu0 %v7811_v46 }
 0x2cd   : > { %v9305_v31 = vadd.f32 %v6992_v24, %v2698_v47 }
 0x2ce   : > { %v6887_v34 = vpop.f32.mrb[120].mxu1 }
 0x2cf   : > { %v6993_v39 = vpop.f32.mrb[148].mxu0  ;;  %v6888_v45 = vpop.f32.mrb[121].mxu1 }
 0x2d0   : > { %v6889_v18 = vadd.f32 %v6888_v45, %v6887_v34  ;;  %v6994_v42 = vpop.f32.mrb[149].mxu0  ;;  %v6890_v40 = vpop.f32.mrb[122].mxu1 }
 0x2d1   : > { %v6995_v60 = vadd.f32 %v6994_v42, %v6993_v39  ;;  %v6996_v49 = vpop.f32.mrb[150].mxu0  ;;  %v6891_v38 = vpop.f32.mrb[123].mxu1 }
 0x2d2   : > { %v2711_v1 = vadd.f32 %v6889_v18, %v9136_v21  ;;  %v6892_v16 = vadd.f32 %v6891_v38, %v6890_v40  ;;  %v6997_v7 = vpop.f32.mrb[151].mxu0  ;;  %v7813_v18 = vld [vmem:[%s10359_s5 + $0x138] sm:$0xff]  }
 0x2d3   : > { %v6998_v25 = vadd.f32 %v6997_v7, %v6996_v49  ;;  %v9311_v47 = vadd.f32 %v6995_v60, %v2703_v62  ;;  %7274 = vmatpush3.bf16.msra.mxu0 %v7813_v18 }
 0x2d4   : > { %v2714_v27 = vadd.f32 %v6892_v16, %v9144_v0 }
 0x2d5   : > { %v9314_v11 = vadd.f32 %v6998_v25, %v2706_v6 }
 0x2d6   : > { %v6893_v57 = vpop.f32.mrb[124].mxu1 }
 0x2d7   : > { %v6999_v5 = vpop.f32.mrb[152].mxu0  ;;  %v6894_v2 = vpop.f32.mrb[125].mxu1 }
 0x2d8   : > { %v6895_v14 = vadd.f32 %v6894_v2, %v6893_v57  ;;  %v7000_v24 = vpop.f32.mrb[153].mxu0  ;;  %v6896_v21 = vpop.f32.mrb[126].mxu1 }
 0x2d9   : > { %v7001_v34 = vadd.f32 %v7000_v24, %v6999_v5  ;;  %v7002_v39 = vpop.f32.mrb[154].mxu0  ;;  %v6897_v45 = vpop.f32.mrb[127].mxu1 }
 0x2da   : > { %v2719_v62 = vadd.f32 %v6895_v14, %v9158_v28  ;;  %v6898_v42 = vadd.f32 %v6897_v45, %v6896_v21  ;;  %v7003_v0 = vpop.f32.mrb[155].mxu0 }
 0x2db   : > { %v7004_v40 = vadd.f32 %v7003_v0, %v7002_v39  ;;  %v9320_v6 = vadd.f32 %v7001_v34, %v2711_v1 }
 0x2dc   : > { %v2722_v60 = vadd.f32 %v6898_v42, %v9164_v35 }
 0x2dd   : > { %v9323_v49 = vadd.f32 %v7004_v40, %v2714_v27  ;;  %v9332_v27 = vld [vmem:[%s10359_s5 + $0x200] sm:$0xff]  }
 0x2de   : > { %v7573_v38 = vpop.f32.mrb[128].mxu1  ;;  %7603 = vmatprep.subr.bf16.mxu0 %v9332_v27 }
 0x2df   : > { %v7005_v16 = vpop.f32.mrb[156].mxu0  ;;  %v2929_v7 = vadd.f32 %v7573_v38, %v9197_v58  ;;  %v2920_v46 = vpop.f32.mrb[129].mxu1 }
 0x2e0   : > { %v7006_v25 = vpop.f32.mrb[157].mxu0  ;;  %v2921_v57 = vadd.f32 %v2920_v46, %v9179_v12  ;;  %v7574_v5 = vpop.f32.mrb[130].mxu1 }
 0x2e1   : > { %v3049_v28 = vmax.f32 %v2929_v7, 0.0  ;;  %v7007_v2 = vadd.f32 %v7006_v25, %v7005_v16  ;;  %v7008_v14 = vpop.f32.mrb[158].mxu0  ;;  %v2932_v1 = vadd.f32 %v7574_v5, %v9200_v33  ;;  %v2923_v24 = vpop.f32.mrb[131].mxu1 }
 0x2e2   : > { %v3047_v21 = vmax.f32 %v2921_v57, 0.0  ;;  %v7009_v34 = vpop.f32.mrb[159].mxu0  ;;  %v2924_v35 = vadd.f32 %v2923_v24, %v9185_v4 }
 0x2e3   : > { %3081 = vst [vmem:[#allocation2 + $0x28] sm:$0xff] %v3049_v28  ;;  %v3050_v58 = vmax.f32 %v2932_v1, 0.0  ;;  %v7010_v39 = vadd.f32 %v7009_v34, %v7008_v14  ;;  %v9334_v12 = vadd.f32 %v7007_v2, %v2719_v62  ;;  %v3239_v2 = vld [vmem:[#allocation2 + $0x9] sm:$0xff] }
 0x2e4   : > { %3079 = vst [vmem:[#allocation2 + $0x18] sm:$0xff] %v3047_v21  ;;  %v3048_v45 = vmax.f32 %v2924_v35, 0.0 }
 0x2e5   : > { %3082 = vst [vmem:[#allocation2 + $0x30] sm:$0xff] %v3050_v58  ;;  %v9337_v33 = vpack.c.bf16 %v3050_v58, %v3049_v28  ;;  %v9339_v18 = vadd.f32 %v7010_v39, %v2722_v60 }
 0x2e6   : > { %3080 = vst [vmem:[#allocation2 + $0x20] sm:$0xff] %v3048_v45  ;;  %v7577_v4 = vpop.f32.mrb[132].mxu1  ;;  %v9341_v42 = vpack.c.bf16 %v3048_v45, %v3047_v21  ;;  %v7804_v45 = vld [vmem:[%s10359_s5 + $0x1c8] sm:$0xff]  }
 0x2e7   : > { %v2945_v0 = vadd.f32 %v7577_v4, %v9215_v30  ;;  %v2936_v40 = vpop.f32.mrb[133].mxu1 }
 0x2e8   : > { %v2937_v38 = vadd.f32 %v2936_v40, %v9203_v10  ;;  %v7578_v62 = vpop.f32.mrb[134].mxu1  ;;  %4148 = vmatprep.mubr.bf16.mxu0 %v9341_v42 }
 0x2e9   : > { %v3053_v16 = vmax.f32 %v2945_v0, 0.0  ;;  %v2948_v7 = vadd.f32 %v7578_v62, %v9218_v20  ;;  %v2939_v46 = vpop.f32.mrb[135].mxu1 }
 0x2ea   : > { %v3051_v25 = vmax.f32 %v2937_v38, 0.0  ;;  %v2940_v60 = vadd.f32 %v2939_v46, %v9206_v51  ;;  %v7802_v51 = vld [vmem:[%s10359_s5 + $0x180] sm:$0xff]   ;;  %v7808_v46 = vld [vmem:[%s10359_s5 + $0x1d0] sm:$0xff]  }
 0x2eb   : > { %3085 = vst [vmem:[#allocation2 + $0x48] sm:$0xff] %v3053_v16  ;;  %v3054_v57 = vmax.f32 %v2948_v7, 0.0  ;;  %v3113_v28 = vld [vmem:[#allocation2 + $0x17] sm:$0xff]  ;;  %v7806_v7 = vld [vmem:[%s10359_s5 + $0x188] sm:$0xff]  }
 0x2ec   : > { %3083 = vst [vmem:[#allocation2 + $0x38] sm:$0xff] %v3051_v25  ;;  %v3052_v5 = vmax.f32 %v2940_v60, 0.0  ;;  %v3240_v30 = vld [vmem:[#allocation2 + $0x11] sm:$0xff] }
 0x2ed   : > { %3086 = vst [vmem:[#allocation2 + $0x50] sm:$0xff] %v3054_v57  ;;  %v3114_v14 = vld [vmem:[#allocation2 + $0x1f] sm:$0xff]  ;;  %v3115_v10 = vld [vmem:[#allocation2 + $0x27] sm:$0xff]  ;;  %v3116_v1 = vld [vmem:[#allocation2 + $0x2f] sm:$0xff]  ;;  %v9348_v24 = vpack.c.bf16 %v3054_v57, %v3053_v16  ;;  %v6237_v39 = vpack.c.bf16 %v3240_v30, %v3239_v2 }
 0x2ee   : > { %3084 = vst [vmem:[#allocation2 + $0x40] sm:$0xff] %v3052_v5  ;;  %v7581_v21 = vpop.f32.mrb[136].mxu1  ;;  %v6189_v20 = vpack.c.bf16 %v3114_v14, %v3113_v28  ;;  %v9350_v34 = vpack.c.bf16 %v3052_v5, %v3051_v25  ;;  %v9364_v40 = vpack.c.bf16 %v3116_v1, %v3115_v10  ;;  %v3241_v60 = vld [vmem:[#allocation2 + $0x19] sm:$0xff]  ;;  %v7810_v30 = vld [vmem:[%s10359_s5 + $0x190] sm:$0xff]  }
 0x2ef   : > { %v2961_v35 = vadd.f32 %v7581_v21, %v9233_v15  ;;  %v2952_v58 = vpop.f32.mrb[137].mxu1 }
 0x2f0   : > { %v2953_v4 = vadd.f32 %v2952_v58, %v9221_v48  ;;  %v7582_v0 = vpop.f32.mrb[138].mxu1  ;;  %6235 = vmatprep.mubr.msk.bf16.mxu1 %vm10737_vm0, %v6189_v20  ;;  %6190 = vmatmul.mubr.msk.bf16.gmra.mrb[164].mxu0 %vm10738_vm3, %v6189_v20  ;;  %v7812_v20 = vld [vmem:[%s10359_s5 + $0x1d8] sm:$0xff]  }
 0x2f1   : > { %v3057_v38 = vmax.f32 %v2961_v35, 0.0  ;;  %v2964_v15 = vadd.f32 %v7582_v0, %v9236_v13  ;;  %v2955_v62 = vpop.f32.mrb[139].mxu1  ;;  %6238 = vmatmul.mubr.msk.bf16.vlgmr.msra.gmra.mrb[160].mxu1 %vm8173_vm6, %v6237_v39  ;;  %4156 = vmatprep.mubr.bf16.mxu0 %v9337_v33  ;;  %v10739_v58 = vld [vmem:[#allocation16_spill] sm:$0xff] }
 0x2f2   : > { %v3055_v16 = vmax.f32 %v2953_v4, 0.0  ;;  %v2956_v48 = vadd.f32 %v2955_v62, %v9224_v23  ;;  %6241 = vmatprep.mubr.msk.bf16.mxu1 %vm10738_vm3, %v9364_v40  ;;  %7372 = vmatpush3.bf16.msra.mxu1 %v7802_v51  ;;  %v3242_v23 = vld [vmem:[#allocation2 + $0x21] sm:$0xff]  ;;  %vm10740_vm3 = vnez %v10739_v58 }
 0x2f3   : > { %3089 = vst [vmem:[#allocation2 + $0x68] sm:$0xff] %v3057_v38  ;;  %v3058_v13 = vmax.f32 %v2964_v15, 0.0  ;;  %7373 = vmatprep.subr.bf16.mxu1 %v7804_v45  ;;  %v9388_v1 = vpack.c.bf16 %v3242_v23, %v3241_v60  ;;  %v3117_v21 = vld [vmem:[#allocation2 + $0x37] sm:$0xff]  ;;  %v7815_v15 = vld [vmem:[%s10359_s5 + $0x1e0] sm:$0xff]  }
 0x2f4   : > { %3087 = vst [vmem:[#allocation2 + $0x58] sm:$0xff] %v3055_v16  ;;  %v3056_v25 = vmax.f32 %v2956_v48, 0.0  ;;  %v3120_v48 = vld [vmem:[#allocation2 + $0x4f] sm:$0xff]  ;;  %v7816_v60 = vld [vmem:[%s10359_s5 + $0x1a0] sm:$0xff]  }
 0x2f5   : > { %3090 = vst [vmem:[#allocation2 + $0x70] sm:$0xff] %v3058_v13  ;;  %v3118_v57 = vld [vmem:[#allocation2 + $0x3f] sm:$0xff]  ;;  %v9380_v5 = vpack.c.bf16 %v3058_v13, %v3057_v38 }
 0x2f6   : > { %3088 = vst [vmem:[#allocation2 + $0x60] sm:$0xff] %v3056_v25  ;;  %v7585_v28 = vpop.f32.mrb[140].mxu1  ;;  %v9382_v2 = vpack.c.bf16 %v3056_v25, %v3055_v16  ;;  %7374 = vmatpush3.bf16.msra.mxu1 %v7806_v7  ;;  %v9397_v39 = vpack.c.bf16 %v3118_v57, %v3117_v21  ;;  %v7814_v38 = vld [vmem:[%s10359_s5 + $0x198] sm:$0xff]   ;;  %v10741_v21 = vld [vmem:[#allocation21_spill] sm:$0xff] }
 0x2f7   : > { %v2977_v14 = vadd.f32 %v7585_v28, %v9257_v56  ;;  %v2968_v10 = vpop.f32.mrb[141].mxu1  ;;  %7375 = vmatprep.subr.bf16.mxu1 %v7808_v46  ;;  %v3244_v16 = vld [vmem:[#allocation2 + $0x31] sm:$0xff]  ;;  %v3243_v46 = vld [vmem:[#allocation2 + $0x29] sm:$0xff] }
 0x2f8   : > { %v2969_v51 = vadd.f32 %v2968_v10, %v9239_v29  ;;  %v7586_v35 = vpop.f32.mrb[142].mxu1  ;;  %6193 = vmatmul.mubr.msk.bf16.gmra.mrb[168].mxu0 %vm10740_vm3, %v9364_v40  ;;  %v9422_v28 = vpack.c.bf16 %v3244_v16, %v3243_v46  ;;  %v7821_v16 = vld [vmem:[%s10359_s5 + $0x1b0] sm:$0xff]  }
 0x2f9   : > { %v3061_v45 = vmax.f32 %v2977_v14, 0.0  ;;  %v2980_v56 = vadd.f32 %v7586_v35, %v9260_v37  ;;  %v2971_v4 = vpop.f32.mrb[143].mxu1  ;;  %6244 = vmatmul.mubr.msk.bf16.gmra.mrb[164].mxu1 %vm8235_vm10, %v9388_v1  ;;  %4164 = vmatprep.mubr.bf16.mxu0 %v9350_v34 }
 0x2fa   : > { %v3059_v0 = vmax.f32 %v2969_v51, 0.0  ;;  %v2972_v29 = vadd.f32 %v2971_v4, %v9242_v17  ;;  %6247 = vmatprep.mubr.msk.bf16.mxu1 %vm10740_vm3, %v9397_v39  ;;  %7376 = vmatpush3.bf16.msra.mxu1 %v7810_v30  ;;  %v3119_v17 = vld [vmem:[#allocation2 + $0x47] sm:$0xff]  ;;  %vm10742_vm3 = vnez %v10741_v21  ;;  %v7820_v4 = vld [vmem:[%s10359_s5 + $0x1f0] sm:$0xff]  }
 0x2fb   : > { %3093 = vst [vmem:[#allocation2 + $0x88] sm:$0xff] %v3061_v45  ;;  %v3062_v37 = vmax.f32 %v2980_v56, 0.0  ;;  %7377 = vmatprep.subr.bf16.mxu1 %v7812_v20  ;;  %v7817_v30 = vld [vmem:[%s10359_s5 + $0x1e8] sm:$0xff]   ;;  %v9431_v20 = vpack.c.bf16 %v3120_v48, %v3119_v17  ;;  %v3121_v46 = vld [vmem:[#allocation2 + $0x57] sm:$0xff] }
 0x2fc   : > { %3091 = vst [vmem:[#allocation2 + $0x78] sm:$0xff] %v3059_v0  ;;  %v3060_v62 = vmax.f32 %v2972_v29, 0.0  ;;  %v7818_v56 = vld [vmem:[%s10359_s5 + $0x1a8] sm:$0xff]   ;;  %v3245_v29 = vld [vmem:[#allocation2 + $0x39] sm:$0xff] }
 0x2fd   : > { %3094 = vst [vmem:[#allocation2 + $0x90] sm:$0xff] %v3062_v37  ;;  %v9414_v7 = vpack.c.bf16 %v3062_v37, %v3061_v45 }
 0x2fe   : > { %3092 = vst [vmem:[#allocation2 + $0x80] sm:$0xff] %v3060_v62  ;;  %v7589_v13 = vpop.f32.mrb[144].mxu1  ;;  %v9416_v25 = vpack.c.bf16 %v3060_v62, %v3059_v0  ;;  %7378 = vmatpush3.bf16.msra.mxu1 %v7814_v38  ;;  %v3122_v38 = vld [vmem:[#allocation2 + $0x5f] sm:$0xff] }
 0x2ff   : > { %v2993_v23 = vadd.f32 %v7589_v13, %v9275_v61  ;;  %v2984_v57 = vpop.f32.mrb[145].mxu1  ;;  %7379 = vmatprep.subr.bf16.mxu1 %v7815_v15 }
 0x300   : > { %v2985_v14 = vadd.f32 %v2984_v57, %v9266_v26  ;;  %v7590_v10 = vpop.f32.mrb[146].mxu1  ;;  %6196 = vmatmul.mubr.msk.bf16.gmra.mrb[172].mxu0 %vm10742_vm3, %v9397_v39 }
 0x301   : > { %v3065_v51 = vmax.f32 %v2993_v23, 0.0  ;;  %v2996_v61 = vadd.f32 %v7590_v10, %v9278_v19  ;;  %v2987_v35 = vpop.f32.mrb[147].mxu1  ;;  %6250 = vmatmul.mubr.msk.bf16.gmra.mrb[168].mxu1 %vm8293_vm14, %v9422_v28  ;;  %4172 = vmatprep.mubr.bf16.mxu0 %v9348_v24 }
 0x302   : > { %v3063_v45 = vmax.f32 %v2985_v14, 0.0  ;;  %v2988_v26 = vadd.f32 %v2987_v35, %v9269_v36  ;;  %6253 = vmatprep.mubr.msk.bf16.mxu1 %vm10742_vm3, %v9431_v20  ;;  %7380 = vmatpush3.bf16.msra.mxu1 %v7816_v60  ;;  %v3246_v36 = vld [vmem:[#allocation2 + $0x41] sm:$0xff]  ;;  %v7822_v60 = vld [vmem:[%s10359_s5 + $0x1f8] sm:$0xff]   ;;  %v9465_v14 = vpack.c.bf16 %v3122_v38, %v3121_v46 }
 0x303   : > { %3097 = vst [vmem:[#allocation2 + $0xa8] sm:$0xff] %v3065_v51  ;;  %v3066_v19 = vmax.f32 %v2996_v61, 0.0  ;;  %7381 = vmatprep.subr.bf16.mxu1 %v7817_v30  ;;  %v9456_v13 = vpack.c.bf16 %v3246_v36, %v3245_v29  ;;  %v10744_v30 = vld [vmem:[#allocation26_spill] sm:$0xff]  ;;  %v7823_v35 = vld [vmem:[%s10359_s5 + $0x1b8] sm:$0xff]  }
 0x304   : > { %3095 = vst [vmem:[#allocation2 + $0x98] sm:$0xff] %v3063_v45  ;;  %v3064_v0 = vmax.f32 %v2988_v26, 0.0  ;;  %vm10745_vm3 = vnez %v10744_v30  ;;  %v3248_v26 = vld [vmem:[#allocation2 + $0x51] sm:$0xff] }
 0x305   : > { %3098 = vst [vmem:[#allocation2 + $0xb0] sm:$0xff] %v3066_v19  ;;  %v9448_v37 = vpack.c.bf16 %v3066_v19, %v3065_v51  ;;  %v3124_v19 = vld [vmem:[#allocation2 + $0x6f] sm:$0xff] }
 0x306   : > { %3096 = vst [vmem:[#allocation2 + $0xa0] sm:$0xff] %v3064_v0  ;;  %v7593_v15 = vpop.f32.mrb[148].mxu1  ;;  %v9450_v62 = vpack.c.bf16 %v3064_v0, %v3063_v45  ;;  %7382 = vmatpush3.bf16.msra.mxu1 %v7818_v56  ;;  %v3123_v56 = vld [vmem:[#allocation2 + $0x67] sm:$0xff] }
 0x307   : > { %10743 = vst [vmem:[#allocation43_spill] sm:$0xff] %v9448_v37  ;;  %v3009_v17 = vadd.f32 %v7593_v15, %v9293_v43  ;;  %v3000_v48 = vpop.f32.mrb[149].mxu1  ;;  %7383 = vmatprep.subr.bf16.mxu1 %v7820_v4  ;;  %v3247_v0 = vld [vmem:[#allocation2 + $0x49] sm:$0xff]  ;;  %v9490_v46 = vpack.c.bf16 %v3124_v19, %v3123_v56  ;;  %v3125_v56 = vld [vmem:[#allocation2 + $0x77] sm:$0xff] }
 0x308   : > { %v3001_v23 = vadd.f32 %v3000_v48, %v9284_v8  ;;  %v7594_v57 = vpop.f32.mrb[150].mxu1  ;;  %6199 = vmatmul.mubr.msk.bf16.gmra.mrb[176].mxu0 %vm10745_vm3, %v9431_v20  ;;  %v9484_v15 = vpack.c.bf16 %v3248_v26, %v3247_v0  ;;  %v10748_v48 = vld [vmem:[#allocation31_spill] sm:$0xff]  ;;  %v10752_v0 = vld [vmem:[#allocation36_spill] sm:$0xff] }
 0x309   : > { %v3069_v10 = vmax.f32 %v3009_v17, 0.0  ;;  %v3012_v43 = vadd.f32 %v7594_v57, %v9296_v41  ;;  %v3003_v51 = vpop.f32.mrb[151].mxu1  ;;  %6256 = vmatmul.mubr.msk.bf16.gmra.mrb[172].mxu1 %vm8356_vm4, %v9456_v13  ;;  %4180 = vmatprep.mubr.bf16.mxu0 %v9382_v2 }
 0x30a   : > { %v3067_v61 = vmax.f32 %v3001_v23, 0.0  ;;  %v3004_v8 = vadd.f32 %v3003_v51, %v9287_v50  ;;  %6259 = vmatprep.mubr.msk.bf16.mxu1 %vm10745_vm3, %v9465_v14  ;;  %7384 = vmatpush3.bf16.msra.mxu1 %v7821_v16  ;;  %vm10749_vm3 = vnez %v10748_v48  ;;  %v3249_v51 = vld [vmem:[#allocation2 + $0x59] sm:$0xff] }
 0x30b   : > { %3101 = vst [vmem:[#allocation2 + $0xc8] sm:$0xff] %v3069_v10  ;;  %v3070_v41 = vmax.f32 %v3012_v43, 0.0  ;;  %7385 = vmatprep.subr.bf16.mxu1 %v7822_v60 }
 0x30c   : > { %3099 = vst [vmem:[#allocation2 + $0xb8] sm:$0xff] %v3067_v61  ;;  %v3068_v45 = vmax.f32 %v3004_v8, 0.0 }
 0x30d   : > { %3102 = vst [vmem:[#allocation2 + $0xd0] sm:$0xff] %v3070_v41  ;;  %v9479_v4 = vpack.c.bf16 %v3070_v41, %v3069_v10 }
 0x30e   : > { %3100 = vst [vmem:[#allocation2 + $0xc0] sm:$0xff] %v3068_v45  ;;  %v7597_v50 = vpop.f32.mrb[152].mxu1  ;;  %v9481_v29 = vpack.c.bf16 %v3068_v45, %v3067_v61  ;;  %7386 = vmatpush3.bf16.msra.mxu1 %v7823_v35  ;;  %v3126_v61 = vld [vmem:[#allocation2 + $0x7f] sm:$0xff] }
 0x30f   : > { %10746 = vst [vmem:[#allocation44_spill] sm:$0xff] %v9479_v4  ;;  %v3025_v36 = vadd.f32 %v7597_v50, %v9311_v47  ;;  %v3016_v38 = vpop.f32.mrb[153].mxu1 }
 0x310   : > { %10747 = vst [vmem:[#allocation47_spill] sm:$0xff] %v9481_v29  ;;  %v3017_v16 = vadd.f32 %v3016_v38, %v9302_v54  ;;  %v7598_v17 = vpop.f32.mrb[154].mxu1  ;;  %6202 = vmatmul.mubr.msk.bf16.gmra.mrb[180].mxu0 %vm10749_vm3, %v9465_v14 }
 0x311   : > { %v3073_v60 = vmax.f32 %v3025_v36, 0.0  ;;  %v3028_v23 = vadd.f32 %v7598_v17, %v9314_v11  ;;  %v3019_v57 = vpop.f32.mrb[155].mxu1  ;;  %6262 = vmatmul.mubr.msk.bf16.gmra.mrb[176].mxu1 %vm8417_vm12, %v9484_v15  ;;  %4188 = vmatprep.mubr.bf16.mxu0 %v9380_v5  ;;  %v3250_v11 = vld [vmem:[#allocation2 + $0x61] sm:$0xff]  ;;  %v9512_v36 = vpack.c.bf16 %v3126_v61, %v3125_v56  ;;  %v3253_v61 = vld [vmem:[#allocation2 + $0x79] sm:$0xff] }
 0x312   : > { %v3071_v47 = vmax.f32 %v3017_v16, 0.0  ;;  %v3020_v54 = vadd.f32 %v3019_v57, %v9305_v31  ;;  %6265 = vmatprep.mubr.msk.bf16.mxu1 %vm10749_vm3, %v9490_v46  ;;  %v9506_v26 = vpack.c.bf16 %v3250_v11, %v3249_v51  ;;  %vm10753_vm3 = vnez %v10752_v0  ;;  %v3252_v57 = vld [vmem:[#allocation2 + $0x71] sm:$0xff] }
 0x313   : > { %3105 = vst [vmem:[#allocation2 + $0xe8] sm:$0xff] %v3073_v60  ;;  %v3074_v10 = vmax.f32 %v3028_v23, 0.0  ;;  %v3129_v56 = vld [vmem:[#allocation2 + $0x97] sm:$0xff] }
 0x314   : > { %3103 = vst [vmem:[#allocation2 + $0xd8] sm:$0xff] %v3071_v47  ;;  %v3072_v43 = vmax.f32 %v3020_v54, 0.0 }
 0x315   : > { %3106 = vst [vmem:[#allocation2 + $0xf0] sm:$0xff] %v3074_v10  ;;  %v9501_v8 = vpack.c.bf16 %v3074_v10, %v3073_v60  ;;  %v3251_v10 = vld [vmem:[#allocation2 + $0x69] sm:$0xff] }
 0x316   : > { %3104 = vst [vmem:[#allocation2 + $0xe0] sm:$0xff] %v3072_v43  ;;  %v7601_v35 = vpop.f32.mrb[156].mxu1  ;;  %v9503_v41 = vpack.c.bf16 %v3072_v43, %v3071_v47  ;;  %v3128_v47 = vld [vmem:[#allocation2 + $0x8f] sm:$0xff]  ;;  %v9527_v51 = vpack.c.bf16 %v3252_v57, %v3251_v10  ;;  %v3134_v10 = vld [vmem:[#allocation2 + $0xbf] sm:$0xff] }
 0x317   : > { %10750 = vst [vmem:[#allocation48_spill] sm:$0xff] %v9501_v8  ;;  %v3041_v31 = vadd.f32 %v7601_v35, %v9334_v12  ;;  %v3032_v45 = vpop.f32.mrb[157].mxu1  ;;  %v3254_v35 = vld [vmem:[#allocation2 + $0x81] sm:$0xff] }
 0x318   : > { %10751 = vst [vmem:[#allocation51_spill] sm:$0xff] %v9503_v41  ;;  %v3033_v19 = vadd.f32 %v3032_v45, %v9320_v6  ;;  %v7602_v50 = vpop.f32.mrb[158].mxu1  ;;  %6205 = vmatmul.mubr.msk.bf16.gmra.mrb[184].mxu0 %vm10753_vm3, %v9490_v46  ;;  %v9541_v45 = vpack.c.bf16 %v3254_v35, %v3253_v61  ;;  %v3133_v35 = vld [vmem:[#allocation2 + $0xb7] sm:$0xff] }
 0x319   : > { %v3077_v38 = vmax.f32 %v3041_v31, 0.0  ;;  %v3044_v16 = vadd.f32 %v7602_v50, %v9339_v18  ;;  %v3035_v17 = vpop.f32.mrb[159].mxu1  ;;  %6268 = vmatmul.mubr.msk.bf16.gmra.mrb[180].mxu1 %vm8463_vm8, %v9506_v26  ;;  %4196 = vmatprep.mubr.bf16.mxu0 %v9416_v25  ;;  %v3127_v18 = vld [vmem:[#allocation2 + $0x87] sm:$0xff]  ;;  %v3130_v31 = vld [vmem:[#allocation2 + $0x9f] sm:$0xff] }
 0x31a   : > { %v3075_v12 = vmax.f32 %v3033_v19, 0.0  ;;  %v3036_v6 = vadd.f32 %v3035_v17, %v9323_v49  ;;  %6271 = vmatprep.mubr.msk.bf16.mxu1 %vm10753_vm3, %v9512_v36  ;;  %v10755_v49 = vld [vmem:[#allocation41_spill] sm:$0xff]  ;;  %v9532_v11 = vpack.c.bf16 %v3128_v47, %v3127_v18  ;;  %v10757_v19 = vld [vmem:[#allocation42_spill] sm:$0xff]  ;;  %v9546_v50 = vpack.c.bf16 %v3130_v31, %v3129_v56 }
 0x31b   : > { %3109 = vst [vmem:[#allocation2 + $0x108] sm:$0xff] %v3077_v38  ;;  %v3078_v60 = vmax.f32 %v3044_v16, 0.0  ;;  %vm10756_vm8 = vnez %v10755_v49  ;;  %vm10758_vm3 = vnez %v10757_v19  ;;  %v3131_v16 = vld [vmem:[#allocation2 + $0xa7] sm:$0xff]  ;;  %v3132_v17 = vld [vmem:[#allocation2 + $0xaf] sm:$0xff]  ;;  %v3257_v18 = vld [vmem:[#allocation2 + $0x99] sm:$0xff]  ;;  %v9574_v56 = vpack.c.bf16 %v3134_v10, %v3133_v35 }
 0x31c   : > { %3107 = vst [vmem:[#allocation2 + $0xf8] sm:$0xff] %v3075_v12  ;;  %v3076_v23 = vmax.f32 %v3036_v6, 0.0  ;;  %v3258_v47 = vld [vmem:[#allocation2 + $0xa1] sm:$0xff]  ;;  %v3136_v10 = vld [vmem:[#allocation2 + $0xcf] sm:$0xff] }
 0x31d   : > { %3110 = vst [vmem:[#allocation2 + $0x110] sm:$0xff] %v3078_v60  ;;  %v9523_v54 = vpack.c.bf16 %v3078_v60, %v3077_v38  ;;  %v3256_v38 = vld [vmem:[#allocation2 + $0x91] sm:$0xff]  ;;  %v10759_v60 = vld [vmem:[#allocation45_spill] sm:$0xff]  ;;  %v9569_v61 = vpack.c.bf16 %v3258_v47, %v3257_v18  ;;  %v3259_v19 = vld [vmem:[#allocation2 + $0xa9] sm:$0xff] }
 0x31e   : > { %3108 = vst [vmem:[#allocation2 + $0x100] sm:$0xff] %v3076_v23  ;;  %v9525_v43 = vpack.c.bf16 %v3076_v23, %v3075_v12  ;;  %v3255_v12 = vld [vmem:[#allocation2 + $0x89] sm:$0xff]  ;;  %v9560_v23 = vpack.c.bf16 %v3132_v17, %v3131_v16  ;;  %v10763_v31 = vld [vmem:[#allocation49_spill] sm:$0xff]  ;;  %v3260_v47 = vld [vmem:[#allocation2 + $0xb1] sm:$0xff] }
 0x31f   : > { %10754 = vst [vmem:[#allocation56_spill] sm:$0xff] %v9523_v54  ;;  %v9555_v6 = vpack.c.bf16 %v3256_v38, %v3255_v12 }
 0x320   : > { %6208 = vmatmul.mubr.msk.bf16.gmra.mrb[188].mxu0 %vm10756_vm8, %v9512_v36  ;;  %10761 = vst [vmem:[#allocation57_spill] sm:$0xff] %v9560_v23 }
 0x321   : > { %6274 = vmatmul.mubr.msk.bf16.gmra.mrb[184].mxu1 %vm10694_vm15, %v9527_v51  ;;  %4204 = vmatprep.mubr.bf16.mxu0 %v9414_v7 }
 0x322   : > { %6277 = vmatprep.mubr.msk.bf16.mxu1 %vm10756_vm8, %v9532_v11  ;;  %vm10760_vm8 = vnez %v10759_v60  ;;  %v3135_v60 = vld [vmem:[#allocation2 + $0xc7] sm:$0xff] }
 0x328   : > { %6211 = vmatmul.mubr.msk.bf16.gmra.mrb[192].mxu0 %vm10758_vm3, %v9532_v11 }
 0x329   : > { %6280 = vmatmul.mubr.msk.bf16.gmra.mrb[188].mxu1 %vm10696_vm9, %v9541_v45  ;;  %4212 = vmatprep.mubr.bf16.mxu0 %v9450_v62 }
 0x32a   : > { %6283 = vmatprep.mubr.msk.bf16.mxu1 %vm10758_vm3, %v9546_v50  ;;  %vm10764_vm3 = vnez %v10763_v31 }
 0x330   : > { %6214 = vmatmul.mubr.msk.bf16.gmra.mrb[196].mxu0 %vm10760_vm8, %v9546_v50 }
 0x331   : > { %6286 = vmatmul.mubr.msk.bf16.gmra.mrb[192].mxu1 %vm10734_vm7, %v9555_v6  ;;  %4220 = vmatprep.mubr.bf16.mxu0 %v9448_v37  ;;  %v9592_v37 = vpack.c.bf16 %v3136_v10, %v3135_v60 }
 0x332   : > { %6289 = vmatprep.mubr.msk.bf16.mxu1 %vm10760_vm8, %v9560_v23 }
 0x333   : > { %v7051_v16 = vpop.f32.mrb[160].mxu0  ;;  %10770 = vst [vmem:[#allocation53_spill] sm:$0xff] %v9592_v37 }
 0x334   : > { %v7052_v17 = vpop.f32.mrb[161].mxu0 }
 0x335   : > { %v9583_v12 = vadd.f32 %v7052_v17, %v7051_v16  ;;  %v7054_v18 = vpop.f32.mrb[162].mxu0  ;;  %v3262_v16 = vld [vmem:[#allocation2 + $0xc1] sm:$0xff] }
 0x336   : > { %v7055_v54 = vpop.f32.mrb[163].mxu0 }
 0x337   : > { %10766 = vst [vmem:[#allocation60_spill] sm:$0xff] %v9583_v12  ;;  %v9585_v35 = vadd.f32 %v7055_v54, %v7054_v18  ;;  %v3261_v54 = vld [vmem:[#allocation2 + $0xb9] sm:$0xff] }
 0x338   : > { %6217 = vmatmul.mubr.msk.bf16.gmra.mrb[200].mxu0 %vm10764_vm3, %v9560_v23  ;;  %v9587_v23 = vpack.c.bf16 %v3260_v47, %v3259_v19  ;;  %v3138_v19 = vld [vmem:[#allocation2 + $0xdf] sm:$0xff]  ;;  %v9601_v17 = vpack.c.bf16 %v3262_v16, %v3261_v54  ;;  %v3137_v18 = vld [vmem:[#allocation2 + $0xd7] sm:$0xff]  ;;  %v10772_v47 = vld [vmem:[#allocation58_spill] sm:$0xff] }
 0x339   : > { %6292 = vmatmul.mubr.msk.bf16.gmra.mrb[196].mxu1 %vm10735_vm11, %v9569_v61  ;;  %4228 = vmatprep.mubr.bf16.mxu0 %v9481_v29  ;;  %10767 = vst [vmem:[#allocation52_spill] sm:$0xff] %v9585_v35  ;;  %v10768_v29 = vld [vmem:[#allocation54_spill] sm:$0xff]  ;;  %v9606_v60 = vpack.c.bf16 %v3138_v19, %v3137_v18 }
 0x33a   : > { %6295 = vmatprep.mubr.msk.bf16.mxu1 %vm10764_vm3, %v9574_v56  ;;  %vm10769_vm8 = vnez %v10768_v29  ;;  %vm10773_vm3 = vnez %v10772_v47  ;;  %v3264_v29 = vld [vmem:[#allocation2 + $0xd1] sm:$0xff]  ;;  %v3139_v54 = vld [vmem:[#allocation2 + $0xe7] sm:$0xff]  ;;  %v3265_v47 = vld [vmem:[#allocation2 + $0xd9] sm:$0xff] }
 0x33b   : > { %10774 = vst [vmem:[#allocation61_spill] sm:$0xff] %v9606_v60  ;;  %v3140_v16 = vld [vmem:[#allocation2 + $0xef] sm:$0xff] }
 0x33c   : > { %v3263_v35 = vld [vmem:[#allocation2 + $0xc9] sm:$0xff]  ;;  %v9620_v19 = vpack.c.bf16 %v3140_v16, %v3139_v54 }
 0x33d   : > { %v9615_v12 = vpack.c.bf16 %v3264_v29, %v3263_v35  ;;  %v3142_v29 = vld [vmem:[#allocation2 + $0xff] sm:$0xff]  ;;  %v10782_v16 = vld [vmem:[#allocation66_spill] sm:$0xff] }
 0x33e   : > { %10778 = vst [vmem:[#allocation64_spill] sm:$0xff] %v9620_v19 }
 0x340   : > { %6220 = vmatmul.mubr.msk.bf16.gmra.mrb[204].mxu0 %vm10769_vm8, %v9574_v56 }
 0x341   : > { %6298 = vmatmul.mubr.msk.bf16.gmra.mrb[200].mxu1 %vm10736_vm1, %v9587_v23  ;;  %4236 = vmatprep.mubr.bf16.mxu0 %v9479_v4  ;;  %v3141_v4 = vld [vmem:[#allocation2 + $0xf7] sm:$0xff] }
 0x342   : > { %6301 = vmatprep.mubr.msk.bf16.mxu1 %vm10769_vm8, %v9592_v37  ;;  %v9634_v54 = vpack.c.bf16 %v3142_v29, %v3141_v4  ;;  %v10785_v29 = vld [vmem:[#allocation68_spill] sm:$0xff] }
 0x348   : > { %6223 = vmatmul.mubr.msk.bf16.gmra.mrb[208].mxu0 %vm10773_vm3, %v9592_v37  ;;  %v10776_v37 = vld [vmem:[#allocation62_spill] sm:$0xff] }
 0x349   : > { %6304 = vmatmul.mubr.msk.bf16.gmra.mrb[204].mxu1 %vm10714_vm2, %v9601_v17  ;;  %4244 = vmatprep.mubr.bf16.mxu0 %v9503_v41  ;;  %vm10777_vm8 = vnez %v10776_v37  ;;  %v3266_v41 = vld [vmem:[#allocation2 + $0xe1] sm:$0xff]  ;;  %v3268_v37 = vld [vmem:[#allocation2 + $0xf1] sm:$0xff] }
 0x34a   : > { %6307 = vmatprep.mubr.msk.bf16.mxu1 %vm10773_vm3, %v9606_v60  ;;  %v9629_v35 = vpack.c.bf16 %v3266_v41, %v3265_v47  ;;  %v3319_v41 = vld [vmem:[#allocation2 + $0x107] sm:$0xff]  ;;  %v3320_v47 = vld [vmem:[#allocation2 + $0x10f] sm:$0xff] }
 0x34b   : > { %v9648_v4 = vpack.c.bf16 %v3320_v47, %v3319_v41  ;;  %v7824_v41 = vld [vmem:[%s10359_s5 + $0x208] sm:$0xff]   ;;  %v10787_v47 = vld [vmem:[#allocation69_spill] sm:$0xff] }
 0x350   : > { %6226 = vmatmul.mubr.msk.bf16.gmra.mrb[212].mxu0 %vm10777_vm8, %v9606_v60  ;;  %v10780_v60 = vld [vmem:[#allocation65_spill] sm:$0xff] }
 0x351   : > { %6310 = vmatmul.mubr.msk.bf16.gmra.mrb[208].mxu1 %vm10719_vm5, %v9615_v12  ;;  %4252 = vmatprep.mubr.bf16.mxu0 %v9501_v8  ;;  %vm10781_vm3 = vnez %v10780_v60  ;;  %v3267_v8 = vld [vmem:[#allocation2 + $0xe9] sm:$0xff] }
 0x352   : > { %6313 = vmatprep.mubr.msk.bf16.mxu1 %vm10777_vm8, %v9620_v19  ;;  %v9643_v18 = vpack.c.bf16 %v3268_v37, %v3267_v8  ;;  %v3269_v37 = vld [vmem:[#allocation2 + $0xf9] sm:$0xff]  ;;  %v3270_v8 = vld [vmem:[#allocation2 + $0x101] sm:$0xff] }
 0x353   : > { %v9659_v60 = vpack.c.bf16 %v3270_v8, %v3269_v37 }
 0x358   : > { %6229 = vmatmul.mubr.msk.bf16.gmra.mrb[216].mxu0 %vm10781_vm3, %v9620_v19  ;;  %v10783_v19 = vld [vmem:[#allocation67_spill] sm:$0xff] }
 0x359   : > { %6316 = vmatmul.mubr.msk.bf16.gmra.mrb[212].mxu1 %vm10726_vm13, %v9629_v35  ;;  %4260 = vmatprep.mubr.bf16.mxu0 %v9525_v43  ;;  %vm10784_vm8 = vnez %v10783_v19  ;;  %vm10786_vm13 = vnez %v10785_v29 }
 0x35a   : > { %6319 = vmatprep.mubr.msk.bf16.mxu1 %vm10781_vm3, %v9634_v54  ;;  %vm10788_vm3 = vnez %v10787_v47 }
 0x360   : > { %6232 = vmatmul.mubr.msk.bf16.gmra.mrb[220].mxu0 %vm10784_vm8, %v9634_v54 }
 0x361   : > { %6322 = vmatmul.mubr.msk.bf16.gmra.mrb[216].mxu1 %vm10786_vm13, %v9643_v18  ;;  %6331 = vmatprep.mubr.msk.bf16.mxu0 %vm8173_vm6, %v9388_v1  ;;  %v7825_v1 = vld [vmem:[%s10359_s5 + $0x210] sm:$0xff]  }
 0x362   : > { %6325 = vmatprep.mubr.msk.bf16.mxu1 %vm10784_vm8, %v9648_v4 }
 0x368   : > { %4463 = vmatmul.mubr.bf16.vlgmr.msra.gmra.mrb[224].mxu0 %v9341_v42  ;;  %v7826_v42 = vld [vmem:[%s10359_s5 + $0x218] sm:$0xff]  }
 0x369   : > { %6328 = vmatmul.mubr.msk.bf16.gmra.mrb[220].mxu1 %vm10788_vm3, %v9659_v60  ;;  %7604 = vmatpush3.bf16.msra.mxu0 %v9332_v27  ;;  %v7827_v27 = vld [vmem:[%s10359_s5 + $0x220] sm:$0xff]  }
 0x36a   : > { %6334 = vmatprep.mubr.msk.bf16.mxu0 %vm8235_vm10, %v9422_v28  ;;  %4623 = vmatprep.mubr.bf16.mxu1 %v9337_v33 }
 0x36b   : > { %7605 = vmatprep.subr.bf16.mxu0 %v7824_v41 }
 0x36d   : > { %7606 = vmatpush3.bf16.msra.mxu0 %v7824_v41  ;;  %v10811_v41 = vld [vmem:[#allocation52_spill] sm:$0xff] }
 0x36e   : > { %7607 = vmatprep.subr.bf16.mxu0 %v7825_v1 }
 0x370   : > { %4471 = vmatmul.mubr.bf16.gmra.mrb[228].mxu0 %v9337_v33  ;;  %v7828_v33 = vld [vmem:[%s10359_s5 + $0x228] sm:$0xff]  }
 0x371   : > { %6379 = vmatmul.mubr.msk.bf16.vlgmr.msra.gmra.mrb[224].mxu1 %vm10737_vm0, %v9364_v40  ;;  %6337 = vmatprep.mubr.msk.bf16.mxu0 %vm8293_vm14, %v9456_v13  ;;  %vm10789_vm0 = vnez %v10568_v55  ;;  %vm10792_vm14 = vnez %v10621_v44  ;;  %v10797_v55 = vld [vmem:[#allocation43_spill] sm:$0xff]  ;;  %v10799_v40 = vld [vmem:[#allocation42_spill] sm:$0xff] }
 0x372   : > { %4631 = vmatprep.mubr.bf16.mxu1 %v9350_v34  ;;  %7608 = vmatpush3.bf16.msra.mxu0 %v7825_v1 }
 0x373   : > { %7609 = vmatprep.subr.bf16.mxu0 %v7826_v42 }
 0x376   : > { %7610 = vmatpush3.bf16.msra.mxu0 %v7826_v42 }
 0x377   : > { %7611 = vmatprep.subr.bf16.mxu0 %v7827_v27 }
 0x378   : > { %4479 = vmatmul.mubr.bf16.gmra.mrb[232].mxu0 %v9350_v34  ;;  %v7830_v34 = vld [vmem:[%s10359_s5 + $0x238] sm:$0xff]  }
 0x379   : > { %6382 = vmatmul.mubr.msk.bf16.gmra.mrb[228].mxu1 %vm10789_vm0, %v9397_v39  ;;  %6340 = vmatprep.mubr.msk.bf16.mxu0 %vm8356_vm4, %v9484_v15  ;;  %vm10790_vm0 = vnez %v10739_v58  ;;  %vm10791_vm4 = vnez %v10741_v21  ;;  %v10804_v58 = vld [vmem:[#allocation44_spill] sm:$0xff]  ;;  %v10805_v39 = vld [vmem:[#allocation53_spill] sm:$0xff]  ;;  %v10809_v21 = vld [vmem:[#allocation51_spill] sm:$0xff] }
 0x37a   : > { %4639 = vmatprep.mubr.bf16.mxu1 %v9348_v24  ;;  %7612 = vmatpush3.bf16.msra.mxu0 %v7827_v27 }
 0x37b   : > { %7613 = vmatprep.subr.bf16.mxu0 %v7828_v33 }
 0x37e   : > { %7614 = vmatpush3.bf16.msra.mxu0 %v7828_v33  ;;  %v10812_v33 = vld [vmem:[#allocation61_spill] sm:$0xff] }
 0x37f   : > { %7615 = vmatprep.subr.bf16.mxu0 %v7829_v59 }
 0x380   : > { %4487 = vmatmul.mubr.bf16.gmra.mrb[236].mxu0 %v9348_v24  ;;  %v10798_v24 = vld [vmem:[#allocation57_spill] sm:$0xff] }
 0x381   : > { %6385 = vmatmul.mubr.msk.bf16.gmra.mrb[232].mxu1 %vm10790_vm0, %v9431_v20  ;;  %6343 = vmatprep.mubr.msk.bf16.mxu0 %vm8417_vm12, %v9506_v26  ;;  %vm10793_vm0 = vnez %v10744_v30  ;;  %v9782_v20 = vld [vmem:[%s10360_s6] ss:$0 sm:$0xff] }
 0x382   : > { %4647 = vmatprep.mubr.bf16.mxu1 %v9382_v2  ;;  %7616 = vmatpush3.bf16.msra.mxu0 %v7829_v59  ;;  %v4146_v1 = vadd.f32 %v10811_v41, %v9782_v20  ;;  %v10813_v59 = vld [vmem:[#allocation54_spill] sm:$0xff] }
 0x383   : > { %7617 = vmatprep.subr.bf16.mxu0 %v7830_v34  ;;  %v3372_v41 = vld [vmem:[#allocation2 + $0x109] sm:$0xff] }
 0x386   : > { %7618 = vmatpush3.bf16.msra.mxu0 %v7830_v34 }
 0x388   : > { %4495 = vmatmul.mubr.bf16.gmra.mrb[240].mxu0 %v9382_v2  ;;  %v10802_v2 = vld [vmem:[#allocation45_spill] sm:$0xff] }
 0x389   : > { %6388 = vmatmul.mubr.msk.bf16.gmra.mrb[236].mxu1 %vm10791_vm4, %v9465_v14  ;;  %6346 = vmatprep.mubr.msk.bf16.mxu0 %vm10792_vm14, %v9527_v51  ;;  %vm10794_vm4 = vnez %v10748_v48 }
 0x38a   : > { %4655 = vmatprep.mubr.bf16.mxu1 %v9380_v5 }
 0x390   : > { %4503 = vmatmul.mubr.bf16.gmra.mrb[244].mxu0 %v9380_v5  ;;  %v10801_v5 = vld [vmem:[#allocation47_spill] sm:$0xff] }
 0x391   : > { %6391 = vmatmul.mubr.msk.bf16.gmra.mrb[240].mxu1 %vm10793_vm0, %v9490_v46  ;;  %6349 = vmatprep.mubr.msk.bf16.mxu0 %vm10694_vm15, %v9541_v45  ;;  %vm10795_vm0 = vnez %v10752_v0 }
 0x392   : > { %4663 = vmatprep.mubr.bf16.mxu1 %v9416_v25 }
 0x398   : > { %4511 = vmatmul.mubr.bf16.gmra.mrb[248].mxu0 %v9416_v25 }
 0x399   : > { %6394 = vmatmul.mubr.msk.bf16.gmra.mrb[244].mxu1 %vm10794_vm4, %v9512_v36  ;;  %6352 = vmatprep.mubr.msk.bf16.mxu0 %vm10696_vm9, %v9555_v6  ;;  %vm10796_vm4 = vnez %v10755_v49  ;;  %v10810_v36 = vld [vmem:[#allocation60_spill] sm:$0xff] }
 0x39a   : > { %4671 = vmatprep.mubr.bf16.mxu1 %v9414_v7  ;;  %v4143_v49 = vadd.f32 %v10810_v36, %v9782_v20 }
 0x3a0   : > { %4519 = vmatmul.mubr.bf16.gmra.mrb[252].mxu0 %v9414_v7  ;;  %v10806_v7 = vld [vmem:[#allocation49_spill] sm:$0xff] }
 0x3a1   : > { %6397 = vmatmul.mubr.msk.bf16.gmra.mrb[248].mxu1 %vm10795_vm0, %v9532_v11  ;;  %6355 = vmatprep.mubr.msk.bf16.mxu0 %vm10734_vm7, %v9569_v61  ;;  %vm10800_vm0 = vnez %v10799_v40 }
 0x3a2   : > { %4679 = vmatprep.mubr.bf16.mxu1 %v9450_v62 }
 0x3a8   : > { %4527 = vmatmul.mubr.bf16.gmra.mrb[0].mxu0 %v9450_v62 }
 0x3a9   : > { %6400 = vmatmul.mubr.msk.bf16.gmra.mrb[252].mxu1 %vm10796_vm4, %v9546_v50  ;;  %6358 = vmatprep.mubr.msk.bf16.mxu0 %vm10735_vm11, %v9587_v23  ;;  %vm10803_vm4 = vnez %v10802_v2 }
 0x3aa   : > { %4687 = vmatprep.mubr.bf16.mxu1 %v10797_v55 }
 0x3b0   : > { %4535 = vmatmul.mubr.bf16.gmra.mrb[4].mxu0 %v10797_v55  ;;  %v10816_v55 = vld [vmem:[#allocation48_spill] sm:$0xff] }
 0x3b1   : > { %6403 = vmatmul.mubr.msk.bf16.gmra.mrb[0].mxu1 %vm10800_vm0, %v10798_v24  ;;  %6361 = vmatprep.mubr.msk.bf16.mxu0 %vm10736_vm1, %v9601_v17  ;;  %vm10807_vm0 = vnez %v10806_v7 }
 0x3b2   : > { %4695 = vmatprep.mubr.bf16.mxu1 %v10801_v5 }
 0x3b8   : > { %4543 = vmatmul.mubr.bf16.gmra.mrb[8].mxu0 %v10801_v5 }
 0x3b9   : > { %6406 = vmatmul.mubr.msk.bf16.gmra.mrb[4].mxu1 %vm10803_vm4, %v9574_v56  ;;  %6364 = vmatprep.mubr.msk.bf16.mxu0 %vm10714_vm2, %v9615_v12  ;;  %vm10814_vm4 = vnez %v10813_v59 }
 0x3ba   : > { %4703 = vmatprep.mubr.bf16.mxu1 %v10804_v58 }
 0x3c0   : > { %4551 = vmatmul.mubr.bf16.gmra.mrb[12].mxu0 %v10804_v58 }
 0x3c1   : > { %6409 = vmatmul.mubr.msk.bf16.gmra.mrb[8].mxu1 %vm10807_vm0, %v10805_v39  ;;  %6367 = vmatprep.mubr.msk.bf16.mxu0 %vm10719_vm5, %v9629_v35  ;;  %vm10815_vm0 = vnez %v10782_v16 }
 0x3c2   : > { %4711 = vmatprep.mubr.bf16.mxu1 %v10809_v21 }
 0x3c3   : > { %v7057_v62 = vpop.f32.mrb[164].mxu0 }
 0x3c4   : > { %v7163_v30 = vpop.f32.mrb[160].mxu1  ;;  %v7058_v14 = vpop.f32.mrb[165].mxu0 }
 0x3c5   : > { %v7059_v48 = vadd.f32 %v7058_v14, %v7057_v62  ;;  %v7164_v46 = vpop.f32.mrb[161].mxu1  ;;  %v7060_v0 = vpop.f32.mrb[166].mxu0 }
 0x3c6   : > { %v7165_v11 = vadd.f32 %v7164_v46, %v7163_v30  ;;  %v7166_v50 = vpop.f32.mrb[162].mxu1  ;;  %v7061_v56 = vpop.f32.mrb[167].mxu0 }
 0x3c7   : > { %v7062_v37 = vadd.f32 %v7061_v56, %v7060_v0  ;;  %v7167_v8 = vpop.f32.mrb[163].mxu1  ;;  %v4151_v7 = vadd.f32 %v7059_v48, %v9782_v20 }
 0x3c8   : > { %v9788_v42 = vadd.f32 %v7165_v11, %v4143_v49  ;;  %v7168_v27 = vadd.f32 %v7167_v8, %v7166_v50  ;;  %4559 = vmatmul.mubr.bf16.gmra.mrb[16].mxu0 %v10809_v21  ;;  %v10817_v11 = vld [vmem:[#allocation64_spill] sm:$0xff]  ;;  %v10818_v50 = vld [vmem:[#allocation58_spill] sm:$0xff] }
 0x3c9   : > { %6412 = vmatmul.mubr.msk.bf16.gmra.mrb[12].mxu1 %vm10814_vm4, %v10812_v33  ;;  %6370 = vmatprep.mubr.msk.bf16.mxu0 %vm10815_vm0, %v9643_v18  ;;  %v4154_v0 = vadd.f32 %v7062_v37, %v9782_v20  ;;  %vm10819_vm4 = vnez %v10818_v50 }
 0x3ca   : > { %v9797_v34 = vadd.f32 %v7168_v27, %v4146_v1  ;;  %4719 = vmatprep.mubr.bf16.mxu1 %v10816_v55  ;;  %v3373_v1 = vld [vmem:[#allocation2 + $0x111] sm:$0xff] }
 0x3cb   : > { %v7063_v24 = vpop.f32.mrb[168].mxu0 }
 0x3cc   : > { %v7169_v40 = vpop.f32.mrb[164].mxu1  ;;  %v7064_v5 = vpop.f32.mrb[169].mxu0 }
 0x3cd   : > { %v7065_v2 = vadd.f32 %v7064_v5, %v7063_v24  ;;  %v7170_v58 = vpop.f32.mrb[165].mxu1  ;;  %v7066_v39 = vpop.f32.mrb[170].mxu0 }
 0x3ce   : > { %v7171_v21 = vadd.f32 %v7170_v58, %v7169_v40  ;;  %v7172_v62 = vpop.f32.mrb[166].mxu1  ;;  %v7067_v30 = vpop.f32.mrb[171].mxu0 }
 0x3cf   : > { %v7068_v14 = vadd.f32 %v7067_v30, %v7066_v39  ;;  %v7173_v46 = vpop.f32.mrb[167].mxu1 }
 0x3d0   : > { %v9802_v36 = vadd.f32 %v7171_v21, %v4151_v7  ;;  %v7174_v49 = vadd.f32 %v7173_v46, %v7172_v62  ;;  %4567 = vmatmul.mubr.bf16.gmra.mrb[20].mxu0 %v10816_v55  ;;  %v4159_v55 = vadd.f32 %v7065_v2, %v9782_v20  ;;  %v9815_v7 = vpack.c.bf16 %v3373_v1, %v3372_v41  ;;  %v10820_v46 = vld [vmem:[#allocation62_spill] sm:$0xff] }
 0x3d1   : > { %6415 = vmatmul.mubr.msk.bf16.gmra.mrb[16].mxu1 %vm10819_vm4, %v10817_v11  ;;  %6373 = vmatprep.mubr.msk.bf16.mxu0 %vm10786_vm13, %v9659_v60  ;;  %v4162_v21 = vadd.f32 %v7068_v14, %v9782_v20  ;;  %vm10821_vm4 = vnez %v10820_v46 }
 0x3d2   : > { %v9811_v48 = vadd.f32 %v7174_v49, %v4154_v0  ;;  %4727 = vmatprep.mubr.bf16.mxu1 %v9525_v43  ;;  %v10822_v0 = vld [vmem:[#allocation56_spill] sm:$0xff] }
 0x3d3   : > { %v7069_v56 = vpop.f32.mrb[172].mxu0 }
 0x3d4   : > { %v7175_v8 = vpop.f32.mrb[168].mxu1  ;;  %v7070_v37 = vpop.f32.mrb[173].mxu0 }
 0x3d5   : > { %v7071_v27 = vadd.f32 %v7070_v37, %v7069_v56  ;;  %v7176_v33 = vpop.f32.mrb[169].mxu1  ;;  %v7072_v59 = vpop.f32.mrb[174].mxu0 }
 0x3d6   : > { %v7177_v24 = vadd.f32 %v7176_v33, %v7175_v8  ;;  %v7178_v40 = vpop.f32.mrb[170].mxu1  ;;  %v7073_v5 = vpop.f32.mrb[175].mxu0 }
 0x3d7   : > { %v7074_v58 = vadd.f32 %v7073_v5, %v7072_v59  ;;  %v7179_v39 = vpop.f32.mrb[171].mxu1 }
 0x3d8   : > { %v9818_v62 = vadd.f32 %v7177_v24, %v4159_v55  ;;  %v7180_v30 = vadd.f32 %v7179_v39, %v7178_v40  ;;  %4575 = vmatmul.mubr.bf16.gmra.mrb[24].mxu0 %v9525_v43  ;;  %v4167_v43 = vadd.f32 %v7071_v27, %v9782_v20  ;;  %v10823_v39 = vld [vmem:[#allocation65_spill] sm:$0xff] }
 0x3d9   : > { %6418 = vmatmul.mubr.msk.bf16.gmra.mrb[20].mxu1 %vm10821_vm4, %v9634_v54  ;;  %6376 = vmatprep.mubr.msk.bf16.mxu0 %vm10788_vm3, %v9815_v7  ;;  %v7832_v54 = vld [vmem:[#allocation2 + $0x8] sm:$0xff]  ;;  %v4170_v24 = vadd.f32 %v7074_v58, %v9782_v20  ;;  %vm10824_vm4 = vnez %v10823_v39  ;;  %v3422_v58 = vld [vmem:[#allocation2 + $0x117] sm:$0xff] }
 0x3da   : > { %v9827_v2 = vadd.f32 %v7180_v30, %v4162_v21  ;;  %4735 = vmatprep.mubr.bf16.mxu1 %v10822_v0  ;;  %v3474_v33 = vpack.c.bf16 %v7832_v54, %v7832_v54 }
 0x3db   : > { %v7075_v49 = vpop.f32.mrb[176].mxu0 }
 0x3dc   : > { %v7181_v11 = vpop.f32.mrb[172].mxu1  ;;  %v7076_v14 = vpop.f32.mrb[177].mxu0 }
 0x3dd   : > { %v7077_v50 = vadd.f32 %v7076_v14, %v7075_v49  ;;  %v7182_v56 = vpop.f32.mrb[173].mxu1  ;;  %v7078_v8 = vpop.f32.mrb[178].mxu0  ;;  %v3423_v49 = vld [vmem:[#allocation2 + $0x11f] sm:$0xff] }
 0x3de   : > { %v7183_v37 = vadd.f32 %v7182_v56, %v7181_v11  ;;  %v7184_v41 = vpop.f32.mrb[174].mxu1  ;;  %v7079_v1 = vpop.f32.mrb[179].mxu0  ;;  %v6423_v63 = vpack.c.bf16 %v3423_v49, %v3422_v58 }
 0x3df   : > { %v7080_v59 = vadd.f32 %v7079_v1, %v7078_v8  ;;  %v7185_v55 = vpop.f32.mrb[175].mxu1 }
 0x3e0   : > { %v9832_v40 = vadd.f32 %v7183_v37, %v4167_v43  ;;  %v7186_v5 = vadd.f32 %v7185_v55, %v7184_v41  ;;  %4583 = vmatmul.mubr.bf16.gmra.mrb[28].mxu0 %v10822_v0  ;;  %v4175_v0 = vadd.f32 %v7077_v50, %v9782_v20 }
 0x3e1   : > { %6421 = vmatmul.mubr.msk.bf16.gmra.mrb[24].mxu1 %vm10824_vm4, %v9648_v4  ;;  %7619 = vmatprep.mubr.msk.bf16.mxu0 %vm8173_vm6, %v9422_v28  ;;  %v4178_v28 = vadd.f32 %v7080_v59, %v9782_v20  ;;  %vm10825_vm6 = vnez %v10590_v9 }
 0x3e2   : > { %v9841_v27 = vadd.f32 %v7186_v5, %v4170_v24  ;;  %4743 = vmatprep.mubr.bf16.mxu1 %v3474_v33 }
 0x3e3   : > { %v7081_v21 = vpop.f32.mrb[180].mxu0 }
 0x3e4   : > { %v7187_v30 = vpop.f32.mrb[176].mxu1  ;;  %v7082_v46 = vpop.f32.mrb[181].mxu0 }
 0x3e5   : > { %v7083_v11 = vadd.f32 %v7082_v46, %v7081_v21  ;;  %v7188_v14 = vpop.f32.mrb[177].mxu1  ;;  %v7084_v56 = vpop.f32.mrb[182].mxu0 }
 0x3e6   : > { %v7189_v8 = vadd.f32 %v7188_v14, %v7187_v30  ;;  %v7190_v43 = vpop.f32.mrb[178].mxu1  ;;  %v7085_v4 = vpop.f32.mrb[183].mxu0 }
 0x3e7   : > { %v7086_v37 = vadd.f32 %v7085_v4, %v7084_v56  ;;  %v7191_v41 = vpop.f32.mrb[179].mxu1  ;;  %v4183_v21 = vadd.f32 %v7083_v11, %v9782_v20 }
 0x3e8   : > { %v9845_v1 = vadd.f32 %v7189_v8, %v4175_v0  ;;  %v7192_v54 = vadd.f32 %v7191_v41, %v7190_v43  ;;  %7620 = vmatmul.mubr.msk.bf16.vlgmr.msra.gmra.mrb[32].mxu0 %vm8235_vm10, %v9456_v13  ;;  %vm10826_vm10 = vnez %v10601_v3 }
 0x3e9   : > { %6424 = vmatmul.mubr.msk.bf16.gmra.mrb[28].mxu1 %vm10784_vm8, %v6423_v63  ;;  %7623 = vmatprep.mubr.msk.bf16.mxu0 %vm10825_vm6, %v9484_v15  ;;  %v4186_v58 = vadd.f32 %v7086_v37, %v9782_v20 }
 0x3ea   : > { %v9855_v50 = vadd.f32 %v7192_v54, %v4178_v28 }
 0x3eb   : > { %v7087_v33 = vpop.f32.mrb[184].mxu0 }
 0x3ec   : > { %v7193_v55 = vpop.f32.mrb[180].mxu1  ;;  %v7088_v24 = vpop.f32.mrb[185].mxu0 }
 0x3ed   : > { %v7089_v59 = vadd.f32 %v7088_v24, %v7087_v33  ;;  %v7194_v5 = vpop.f32.mrb[181].mxu1  ;;  %v7090_v39 = vpop.f32.mrb[186].mxu0 }
 0x3ee   : > { %v7195_v30 = vadd.f32 %v7194_v5, %v7193_v55  ;;  %v7196_v32 = vpop.f32.mrb[182].mxu1  ;;  %v7091_v13 = vpop.f32.mrb[187].mxu0 }
 0x3ef   : > { %v7092_v46 = vadd.f32 %v7091_v13, %v7090_v39  ;;  %v7197_v19 = vpop.f32.mrb[183].mxu1  ;;  %v4191_v4 = vadd.f32 %v7089_v59, %v9782_v20 }
 0x3f0   : > { %v9859_v49 = vadd.f32 %v7195_v30, %v4183_v21  ;;  %v7198_v9 = vadd.f32 %v7197_v19, %v7196_v32  ;;  %7624 = vmatmul.mubr.msk.bf16.gmra.mrb[36].mxu0 %vm10826_vm10, %v9506_v26 }
 0x3f1   : > { %7627 = vmatprep.mubr.msk.bf16.mxu0 %vm8417_vm12, %v9527_v51  ;;  %v4194_v26 = vadd.f32 %v7092_v46, %v9782_v20 }
 0x3f2   : > { %v9867_v15 = vadd.f32 %v7198_v9, %v4186_v58 }
 0x3f3   : > { %v7093_v11 = vpop.f32.mrb[188].mxu0 }
 0x3f4   : > { %v7199_v14 = vpop.f32.mrb[184].mxu1  ;;  %v7094_v56 = vpop.f32.mrb[189].mxu0 }
 0x3f5   : > { %v7095_v0 = vadd.f32 %v7094_v56, %v7093_v11  ;;  %v7200_v8 = vpop.f32.mrb[185].mxu1  ;;  %v7096_v43 = vpop.f32.mrb[190].mxu0 }
 0x3f6   : > { %v7201_v37 = vadd.f32 %v7200_v8, %v7199_v14  ;;  %v7202_v41 = vpop.f32.mrb[186].mxu1  ;;  %v7097_v63 = vpop.f32.mrb[191].mxu0 }
 0x3f7   : > { %v7098_v28 = vadd.f32 %v7097_v63, %v7096_v43  ;;  %v7203_v3 = vpop.f32.mrb[187].mxu1  ;;  %v4199_v21 = vadd.f32 %v7095_v0, %v9782_v20 }
 0x3f8   : > { %v9871_v54 = vadd.f32 %v7201_v37, %v4191_v4  ;;  %v7204_v22 = vadd.f32 %v7203_v3, %v7202_v41  ;;  %7628 = vmatmul.mubr.msk.bf16.gmra.mrb[40].mxu0 %vm10792_vm14, %v9541_v45 }
 0x3f9   : > { %7631 = vmatprep.mubr.msk.bf16.mxu0 %vm10694_vm15, %v9555_v6  ;;  %v4202_v45 = vadd.f32 %v7098_v28, %v9782_v20 }
 0x3fa   : > { %v9879_v51 = vadd.f32 %v7204_v22, %v4194_v26 }
 0x3fb   : > { %v7099_v33 = vpop.f32.mrb[192].mxu0 }
 0x3fc   : > { %v7205_v55 = vpop.f32.mrb[188].mxu1  ;;  %v7100_v24 = vpop.f32.mrb[193].mxu0 }
 0x3fd   : > { %v7101_v59 = vadd.f32 %v7100_v24, %v7099_v33  ;;  %v7206_v5 = vpop.f32.mrb[189].mxu1  ;;  %v7102_v39 = vpop.f32.mrb[194].mxu0 }
 0x3fe   : > { %v7207_v30 = vadd.f32 %v7206_v5, %v7205_v55  ;;  %v7208_v32 = vpop.f32.mrb[190].mxu1  ;;  %v7103_v13 = vpop.f32.mrb[195].mxu0 }
 0x3ff   : > { %v7104_v46 = vadd.f32 %v7103_v13, %v7102_v39  ;;  %v7209_v44 = vpop.f32.mrb[191].mxu1  ;;  %v4207_v8 = vadd.f32 %v7101_v59, %v9782_v20 }
 0x400   : > { %v9883_v19 = vadd.f32 %v7207_v30, %v4199_v21  ;;  %v7210_v53 = vadd.f32 %v7209_v44, %v7208_v32  ;;  %7632 = vmatmul.mubr.msk.bf16.gmra.mrb[44].mxu0 %vm10696_vm9, %v9569_v61  ;;  %v5020_v32 = vld [vmem:[%s10361_s7 + $0x20] sm:$0xff] }
 0x401   : > { %7635 = vmatprep.mubr.msk.bf16.mxu0 %vm10734_vm7, %v9587_v23  ;;  %v4210_v61 = vadd.f32 %v7104_v46, %v9782_v20 }
 0x402   : > { %v9891_v6 = vadd.f32 %v7210_v53, %v4202_v45 }
 0x403   : > { %v7105_v58 = vpop.f32.mrb[196].mxu0 }
 0x404   : > { %v7211_v9 = vpop.f32.mrb[192].mxu1  ;;  %v7106_v11 = vpop.f32.mrb[197].mxu0 }
 0x405   : > { %v7107_v14 = vadd.f32 %v7106_v11, %v7105_v58  ;;  %v7212_v56 = vpop.f32.mrb[193].mxu1  ;;  %v7108_v0 = vpop.f32.mrb[198].mxu0 }
 0x406   : > { %v7213_v43 = vadd.f32 %v7212_v56, %v7211_v9  ;;  %v7214_v4 = vpop.f32.mrb[194].mxu1  ;;  %v7109_v37 = vpop.f32.mrb[199].mxu0 }
 0x407   : > { %v7110_v41 = vadd.f32 %v7109_v37, %v7108_v0  ;;  %v7215_v52 = vpop.f32.mrb[195].mxu1  ;;  %v4215_v24 = vadd.f32 %v7107_v14, %v9782_v20  ;;  %v3475_v37 = vld [vmem:[#allocation2 + $0x119] sm:$0xff] }
 0x408   : > { %v9895_v63 = vadd.f32 %v7213_v43, %v4207_v8  ;;  %v7216_v23 = vadd.f32 %v7215_v52, %v7214_v4  ;;  %7636 = vmatmul.mubr.msk.bf16.gmra.mrb[48].mxu0 %vm10735_vm11, %v9601_v17 }
 0x409   : > { %7639 = vmatprep.mubr.msk.bf16.mxu0 %vm10736_vm1, %v9615_v12  ;;  %v4218_v17 = vadd.f32 %v7110_v41, %v9782_v20  ;;  %v5016_v12 = vld [vmem:[%s10361_s7] sm:$0xff] }
 0x40a   : > { %v9903_v57 = vadd.f32 %v7216_v23, %v4210_v61  ;;  %v6473_v46 = vcombine.low %v5016_v12, %v5020_v32  ;;  %v6474_v44 = vcombine.high %v5016_v12, %v5020_v32  ;;  %v3476_v41 = vld [vmem:[#allocation2 + $0x121] sm:$0xff] }
 0x40b   : > { %v7111_v28 = vpop.f32.mrb[200].mxu0 }
 0x40c   : > { %v7217_v3 = vpop.f32.mrb[196].mxu1  ;;  %v7112_v26 = vpop.f32.mrb[201].mxu0  ;;  %5442 = vmatprep.subr.bf16.mxu1 %v6474_v44 }
 0x40d   : > { %v7113_v22 = vadd.f32 %v7112_v26, %v7111_v28  ;;  %v7218_v33 = vpop.f32.mrb[197].mxu1  ;;  %v7114_v55 = vpop.f32.mrb[202].mxu0  ;;  %5443 = vmatpush1.bf16.msra.mxu1 %v6473_v46 }
 0x40e   : > { %v7219_v59 = vadd.f32 %v7218_v33, %v7217_v3  ;;  %v7220_v5 = vpop.f32.mrb[198].mxu1  ;;  %v7115_v39 = vpop.f32.mrb[203].mxu0  ;;  %v6471_v3 = vpack.c.bf16 %v3476_v41, %v3475_v37 }
 0x40f   : > { %v7116_v21 = vadd.f32 %v7115_v39, %v7114_v55  ;;  %v7221_v38 = vpop.f32.mrb[199].mxu1 }
 0x410   : > { %v9907_v30 = vadd.f32 %v7219_v59, %v4215_v24  ;;  %v7222_v31 = vadd.f32 %v7221_v38, %v7220_v5  ;;  %7640 = vmatmul.mubr.msk.bf16.gmra.mrb[52].mxu0 %vm10714_vm2, %v9629_v35  ;;  %v5028_v38 = vld [vmem:[%s10361_s7 + $0x60] sm:$0xff] }
 0x411   : > { %7643 = vmatprep.mubr.msk.bf16.mxu0 %vm10719_vm5, %v9643_v18  ;;  %v4223_v18 = vadd.f32 %v7113_v22, %v9782_v20  ;;  %v4226_v8 = vadd.f32 %v7116_v21, %v9782_v20  ;;  %v5024_v21 = vld [vmem:[%s10361_s7 + $0x40] sm:$0xff] }
 0x412   : > { %v9921_v13 = vadd.f32 %v7222_v31, %v4218_v17  ;;  %v6481_v31 = vcombine.low %v5024_v21, %v5028_v38  ;;  %v6482_v12 = vcombine.high %v5024_v21, %v5028_v38 }
 0x413   : > { %v7117_v45 = vpop.f32.mrb[204].mxu0 }
 0x414   : > { %v7223_v53 = vpop.f32.mrb[200].mxu1  ;;  %v7118_v10 = vpop.f32.mrb[205].mxu0  ;;  %5444 = vmatprep.subr.bf16.mxu1 %v6482_v12 }
 0x415   : > { %v7119_v35 = vadd.f32 %v7118_v10, %v7117_v45  ;;  %v7224_v58 = vpop.f32.mrb[201].mxu1  ;;  %v7120_v25 = vpop.f32.mrb[206].mxu0  ;;  %5445 = vmatpush1.bf16.msra.mxu1 %v6481_v31 }
 0x416   : > { %v7225_v9 = vadd.f32 %v7224_v58, %v7223_v53  ;;  %v7226_v11 = vpop.f32.mrb[202].mxu1  ;;  %v7121_v14 = vpop.f32.mrb[207].mxu0 }
 0x417   : > { %v7122_v56 = vadd.f32 %v7121_v14, %v7120_v25  ;;  %v7227_v0 = vpop.f32.mrb[203].mxu1  ;;  %v4231_v55 = vadd.f32 %v7119_v35, %v9782_v20 }
 0x418   : > { %v9925_v43 = vadd.f32 %v7225_v9, %v4223_v18  ;;  %v7228_v4 = vadd.f32 %v7227_v0, %v7226_v11  ;;  %7644 = vmatmul.mubr.msk.bf16.gmra.mrb[56].mxu0 %vm10815_vm0, %v9659_v60 }
 0x419   : > { %7647 = vmatprep.mubr.msk.bf16.mxu0 %vm10786_vm13, %v9815_v7  ;;  %v4234_v29 = vadd.f32 %v7122_v56, %v9782_v20 }
 0x41a   : > { %v9933_v52 = vadd.f32 %v7228_v4, %v4226_v8 }
 0x41b   : > { %v7123_v61 = vpop.f32.mrb[208].mxu0 }
 0x41c   : > { %v7229_v23 = vpop.f32.mrb[204].mxu1  ;;  %v7124_v28 = vpop.f32.mrb[209].mxu0 }
 0x41d   : > { %v7125_v26 = vadd.f32 %v7124_v28, %v7123_v61  ;;  %v7230_v22 = vpop.f32.mrb[205].mxu1  ;;  %v7126_v33 = vpop.f32.mrb[210].mxu0 }
 0x41e   : > { %v7231_v24 = vadd.f32 %v7230_v22, %v7229_v23  ;;  %v7232_v16 = vpop.f32.mrb[206].mxu1  ;;  %v7127_v60 = vpop.f32.mrb[211].mxu0 }
 0x41f   : > { %v7128_v59 = vadd.f32 %v7127_v60, %v7126_v33  ;;  %v7233_v5 = vpop.f32.mrb[207].mxu1  ;;  %v4239_v10 = vadd.f32 %v7125_v26, %v9782_v20 }
 0x420   : > { %v9937_v7 = vadd.f32 %v7231_v24, %v4231_v55  ;;  %v7234_v39 = vadd.f32 %v7233_v5, %v7232_v16  ;;  %7648 = vmatmul.mubr.msk.bf16.gmra.mrb[60].mxu0 %vm10788_vm3, %v6471_v3  ;;  %v5036_v5 = vld [vmem:[%s10361_s7 + $0xa0] sm:$0xff] }
 0x421   : > { %v4242_v11 = vadd.f32 %v7128_v59, %v9782_v20  ;;  %v5032_v59 = vld [vmem:[%s10361_s7 + $0x80] sm:$0xff] }
 0x422   : > { %v9947_v17 = vadd.f32 %v7234_v39, %v4234_v29  ;;  %v6489_v39 = vcombine.low %v5032_v59, %v5036_v5  ;;  %v6490_v21 = vcombine.high %v5032_v59, %v5036_v5 }
 0x423   : > { %v7129_v32 = vpop.f32.mrb[212].mxu0 }
 0x424   : > { %v7235_v46 = vpop.f32.mrb[208].mxu1  ;;  %v7130_v44 = vpop.f32.mrb[213].mxu0  ;;  %5446 = vmatprep.subr.bf16.mxu1 %v6490_v21 }
 0x425   : > { %v7131_v45 = vadd.f32 %v7130_v44, %v7129_v32  ;;  %v7236_v53 = vpop.f32.mrb[209].mxu1  ;;  %v7132_v47 = vpop.f32.mrb[214].mxu0  ;;  %5447 = vmatpush1.bf16.msra.mxu1 %v6489_v39 }
 0x426   : > { %v7237_v35 = vadd.f32 %v7236_v53, %v7235_v46  ;;  %v7238_v58 = vpop.f32.mrb[210].mxu1  ;;  %v7133_v25 = vpop.f32.mrb[215].mxu0 }
 0x427   : > { %v7134_v18 = vadd.f32 %v7133_v25, %v7132_v47  ;;  %v7239_v9 = vpop.f32.mrb[211].mxu1  ;;  %v4247_v28 = vadd.f32 %v7131_v45, %v9782_v20 }
 0x428   : > { %v9951_v14 = vadd.f32 %v7237_v35, %v4239_v10  ;;  %v7240_v56 = vadd.f32 %v7239_v9, %v7238_v58 }
 0x429   : > { %v4250_v24 = vadd.f32 %v7134_v18, %v9782_v20 }
 0x42a   : > { %v9953_v0 = vadd.f32 %v7240_v56, %v4242_v11 }
 0x42b   : > { %v7135_v8 = vpop.f32.mrb[216].mxu0 }
 0x42c   : > { %v7241_v4 = vpop.f32.mrb[212].mxu1  ;;  %v7136_v37 = vpop.f32.mrb[217].mxu0 }
 0x42d   : > { %v7137_v41 = vadd.f32 %v7136_v37, %v7135_v8  ;;  %v7242_v61 = vpop.f32.mrb[213].mxu1  ;;  %v7138_v23 = vpop.f32.mrb[218].mxu0 }
 0x42e   : > { %v7243_v3 = vadd.f32 %v7242_v61, %v7241_v4  ;;  %v7244_v26 = vpop.f32.mrb[214].mxu1  ;;  %v7139_v22 = vpop.f32.mrb[219].mxu0 }
 0x42f   : > { %v7140_v33 = vadd.f32 %v7139_v22, %v7138_v23  ;;  %v7245_v55 = vpop.f32.mrb[215].mxu1  ;;  %v4255_v45 = vadd.f32 %v7137_v41, %v9782_v20 }
 0x430   : > { %v9957_v16 = vadd.f32 %v7243_v3, %v4247_v28  ;;  %v7246_v60 = vadd.f32 %v7245_v55, %v7244_v26 }
 0x431   : > { %v4258_v25 = vadd.f32 %v7140_v33, %v9782_v20 }
 0x432   : > { %v9965_v29 = vadd.f32 %v7246_v60, %v4250_v24 }
 0x433   : > { %v7141_v38 = vpop.f32.mrb[220].mxu0 }
 0x434   : > { %v7247_v31 = vpop.f32.mrb[216].mxu1  ;;  %v7142_v12 = vpop.f32.mrb[221].mxu0 }
 0x435   : > { %v7143_v32 = vadd.f32 %v7142_v12, %v7141_v38  ;;  %v7248_v46 = vpop.f32.mrb[217].mxu1  ;;  %v7144_v44 = vpop.f32.mrb[222].mxu0 }
 0x436   : > { %v7249_v53 = vadd.f32 %v7248_v46, %v7247_v31  ;;  %v7250_v47 = vpop.f32.mrb[218].mxu1  ;;  %v7145_v10 = vpop.f32.mrb[223].mxu0 }
 0x437   : > { %v7146_v35 = vadd.f32 %v7145_v10, %v7144_v44  ;;  %v7251_v58 = vpop.f32.mrb[219].mxu1  ;;  %v4263_v41 = vadd.f32 %v7143_v32, %v9782_v20  ;;  %v5040_v10 = vld [vmem:[%s10361_s7 + $0xc0] sm:$0xff] }
 0x438   : > { %v9969_v18 = vadd.f32 %v7249_v53, %v4255_v45  ;;  %v7252_v9 = vadd.f32 %v7251_v58, %v7250_v47 }
 0x439   : > { %v4266_v24 = vadd.f32 %v7146_v35, %v9782_v20 }
 0x43a   : > { %v9971_v11 = vadd.f32 %v7252_v9, %v4258_v25 }
 0x43b   : > { %v7275_v56 = vpop.f32.mrb[224].mxu0 }
 0x43c   : > { %v7253_v8 = vpop.f32.mrb[220].mxu1  ;;  %v7276_v4 = vpop.f32.mrb[225].mxu0 }
 0x43d   : > { %v7254_v37 = vpop.f32.mrb[221].mxu1  ;;  %v7277_v61 = vadd.f32 %v7276_v4, %v7275_v56  ;;  %v7278_v23 = vpop.f32.mrb[226].mxu0 }
 0x43e   : > { %v7255_v28 = vadd.f32 %v7254_v37, %v7253_v8  ;;  %v7256_v3 = vpop.f32.mrb[222].mxu1  ;;  %v7279_v26 = vpop.f32.mrb[227].mxu0 }
 0x43f   : > { %v4465_v22 = vadd.f32 %v7277_v61, %v9788_v42  ;;  %v7257_v55 = vpop.f32.mrb[223].mxu1  ;;  %v7280_v33 = vadd.f32 %v7279_v26, %v7278_v23 }
 0x440   : > { %v9976_v60 = vadd.f32 %v7255_v28, %v4263_v41  ;;  %v7258_v59 = vadd.f32 %v7257_v55, %v7256_v3 }
 0x441   : > { %v4468_v5 = vadd.f32 %v7280_v33, %v9797_v34  ;;  %v5044_v34 = vld [vmem:[%s10361_s7 + $0xe0] sm:$0xff] }
 0x442   : > { %v9979_v39 = vadd.f32 %v7258_v59, %v4266_v24  ;;  %v6497_v25 = vcombine.low %v5040_v10, %v5044_v34  ;;  %v6498_v9 = vcombine.high %v5040_v10, %v5044_v34 }
 0x443   : > { %v7281_v21 = vpop.f32.mrb[228].mxu0 }
 0x444   : > { %v7387_v38 = vpop.f32.mrb[224].mxu1  ;;  %v7282_v31 = vpop.f32.mrb[229].mxu0  ;;  %5448 = vmatprep.subr.bf16.mxu1 %v6498_v9 }
 0x445   : > { %v7283_v12 = vadd.f32 %v7282_v31, %v7281_v21  ;;  %v7388_v32 = vpop.f32.mrb[225].mxu1  ;;  %v7284_v46 = vpop.f32.mrb[230].mxu0  ;;  %5449 = vmatpush1.bf16.msra.mxu1 %v6497_v25 }
 0x446   : > { %v7389_v44 = vadd.f32 %v7388_v32, %v7387_v38  ;;  %v7390_v45 = vpop.f32.mrb[226].mxu1  ;;  %v7285_v42 = vpop.f32.mrb[231].mxu0 }
 0x447   : > { %v4473_v53 = vadd.f32 %v7283_v12, %v9802_v36  ;;  %v7286_v47 = vadd.f32 %v7285_v42, %v7284_v46  ;;  %v7391_v20 = vpop.f32.mrb[227].mxu1 }
 0x448   : > { %v7392_v35 = vadd.f32 %v7391_v20, %v7390_v45  ;;  %v9988_v58 = vadd.f32 %v7389_v44, %v4465_v22 }
 0x449   : > { %v4476_v56 = vadd.f32 %v7286_v47, %v9811_v48 }
 0x44a   : > { %v9991_v8 = vadd.f32 %v7392_v35, %v4468_v5 }
 0x44b   : > { %v7287_v36 = vpop.f32.mrb[232].mxu0 }
 0x44c   : > { %v7393_v4 = vpop.f32.mrb[228].mxu1  ;;  %v7288_v37 = vpop.f32.mrb[233].mxu0 }
 0x44d   : > { %v7289_v61 = vadd.f32 %v7288_v37, %v7287_v36  ;;  %v7394_v23 = vpop.f32.mrb[229].mxu1  ;;  %v7290_v41 = vpop.f32.mrb[234].mxu0 }
 0x44e   : > { %v7395_v28 = vadd.f32 %v7394_v23, %v7393_v4  ;;  %v7396_v3 = vpop.f32.mrb[230].mxu1  ;;  %v7291_v26 = vpop.f32.mrb[235].mxu0 }
 0x44f   : > { %v4481_v22 = vadd.f32 %v7289_v61, %v9818_v62  ;;  %v7292_v55 = vadd.f32 %v7291_v26, %v7290_v41  ;;  %v7397_v33 = vpop.f32.mrb[231].mxu1 }
 0x450   : > { %v7398_v24 = vadd.f32 %v7397_v33, %v7396_v3  ;;  %v9994_v59 = vadd.f32 %v7395_v28, %v4473_v53  ;;  %v5048_v53 = vld [vmem:[%s10361_s7 + $0x100] sm:$0xff] }
 0x451   : > { %v4484_v48 = vadd.f32 %v7292_v55, %v9827_v2  ;;  %v5052_v2 = vld [vmem:[%s10361_s7 + $0x120] sm:$0xff] }
 0x452   : > { %v9997_v5 = vadd.f32 %v7398_v24, %v4476_v56  ;;  %v6505_v35 = vcombine.low %v5048_v53, %v5052_v2  ;;  %v6506_v25 = vcombine.high %v5048_v53, %v5052_v2 }
 0x453   : > { %v7293_v21 = vpop.f32.mrb[236].mxu0 }
 0x454   : > { %v7399_v38 = vpop.f32.mrb[232].mxu1  ;;  %v7294_v31 = vpop.f32.mrb[237].mxu0  ;;  %5450 = vmatprep.subr.bf16.mxu1 %v6506_v25 }
 0x455   : > { %v7295_v12 = vadd.f32 %v7294_v31, %v7293_v21  ;;  %v7400_v32 = vpop.f32.mrb[233].mxu1  ;;  %v7296_v46 = vpop.f32.mrb[238].mxu0  ;;  %5451 = vmatpush1.bf16.msra.mxu1 %v6505_v35 }
 0x456   : > { %v7401_v44 = vadd.f32 %v7400_v32, %v7399_v38  ;;  %v7402_v45 = vpop.f32.mrb[234].mxu1  ;;  %v7297_v42 = vpop.f32.mrb[239].mxu0 }
 0x457   : > { %v4489_v62 = vadd.f32 %v7295_v12, %v9832_v40  ;;  %v7298_v47 = vadd.f32 %v7297_v42, %v7296_v46  ;;  %v7403_v20 = vpop.f32.mrb[235].mxu1 }
 0x458   : > { %v7404_v10 = vadd.f32 %v7403_v20, %v7402_v45  ;;  %v10006_v34 = vadd.f32 %v7401_v44, %v4481_v22 }
 0x459   : > { %v4492_v9 = vadd.f32 %v7298_v47, %v9841_v27 }
 0x45a   : > { %v10009_v56 = vadd.f32 %v7404_v10, %v4484_v48 }
 0x45b   : > { %v7299_v40 = vpop.f32.mrb[240].mxu0 }
 0x45c   : > { %v7405_v36 = vpop.f32.mrb[236].mxu1  ;;  %v7300_v4 = vpop.f32.mrb[241].mxu0 }
 0x45d   : > { %v7301_v37 = vadd.f32 %v7300_v4, %v7299_v40  ;;  %v7406_v61 = vpop.f32.mrb[237].mxu1  ;;  %v7302_v23 = vpop.f32.mrb[242].mxu0 }
 0x45e   : > { %v7407_v41 = vadd.f32 %v7406_v61, %v7405_v36  ;;  %v7408_v28 = vpop.f32.mrb[238].mxu1  ;;  %v7303_v3 = vpop.f32.mrb[243].mxu0 }
 0x45f   : > { %v4497_v26 = vadd.f32 %v7301_v37, %v9845_v1  ;;  %v7304_v22 = vadd.f32 %v7303_v3, %v7302_v23  ;;  %v7409_v55 = vpop.f32.mrb[239].mxu1 }
 0x460   : > { %v7410_v33 = vadd.f32 %v7409_v55, %v7408_v28  ;;  %v10012_v24 = vadd.f32 %v7407_v41, %v4489_v62  ;;  %v5056_v62 = vld [vmem:[%s10361_s7 + $0x140] sm:$0xff] }
 0x461   : > { %v4500_v27 = vadd.f32 %v7304_v22, %v9855_v50  ;;  %v5060_v50 = vld [vmem:[%s10361_s7 + $0x160] sm:$0xff] }
 0x462   : > { %v10015_v48 = vadd.f32 %v7410_v33, %v4492_v9  ;;  %v6513_v10 = vcombine.low %v5056_v62, %v5060_v50  ;;  %v6514_v35 = vcombine.high %v5056_v62, %v5060_v50  ;;  %v5030_v62 = vld [vmem:[%s10361_s7 + $0x70] sm:$0xff] }
 0x463   : > { %v7305_v21 = vpop.f32.mrb[244].mxu0 }
 0x464   : > { %v7411_v38 = vpop.f32.mrb[240].mxu1  ;;  %v7306_v31 = vpop.f32.mrb[245].mxu0  ;;  %5452 = vmatprep.subr.bf16.mxu1 %v6514_v35  ;;  %v5064_v35 = vld [vmem:[%s10361_s7 + $0x180] sm:$0xff] }
 0x465   : > { %v7307_v12 = vadd.f32 %v7306_v31, %v7305_v21  ;;  %v7412_v32 = vpop.f32.mrb[241].mxu1  ;;  %v7308_v46 = vpop.f32.mrb[246].mxu0  ;;  %5453 = vmatpush1.bf16.msra.mxu1 %v6513_v10  ;;  %v5018_v21 = vld [vmem:[%s10361_s7 + $0x10] sm:$0xff] }
 0x466   : > { %v7413_v44 = vadd.f32 %v7412_v32, %v7411_v38  ;;  %v7414_v45 = vpop.f32.mrb[242].mxu1  ;;  %v7309_v42 = vpop.f32.mrb[247].mxu0  ;;  %v5022_v38 = vld [vmem:[%s10361_s7 + $0x30] sm:$0xff] }
 0x467   : > { %v4505_v1 = vadd.f32 %v7307_v12, %v9859_v49  ;;  %v7310_v47 = vadd.f32 %v7309_v42, %v7308_v46  ;;  %v7415_v20 = vpop.f32.mrb[243].mxu1  ;;  %v6478_v12 = vcombine.high %v5018_v21, %v5022_v38  ;;  %v6477_v46 = vcombine.low %v5018_v21, %v5022_v38 }
 0x468   : > { %v7416_v53 = vadd.f32 %v7415_v20, %v7414_v45  ;;  %v10024_v2 = vadd.f32 %v7413_v44, %v4497_v26  ;;  %v5026_v20 = vld [vmem:[%s10361_s7 + $0x50] sm:$0xff] }
 0x469   : > { %v4508_v25 = vadd.f32 %v7310_v47, %v9867_v15  ;;  %5524 = vmatprep.subr.bf16.mxu0 %v6478_v12 }
 0x46a   : > { %v10027_v9 = vadd.f32 %v7416_v53, %v4500_v27  ;;  %5525 = vmatpush1.bf16.msra.mxu0 %v6477_v46  ;;  %v5046_v46 = vld [vmem:[%s10361_s7 + $0xf0] sm:$0xff] }
 0x46b   : > { %v7311_v49 = vpop.f32.mrb[248].mxu0 }
 0x46c   : > { %v7417_v40 = vpop.f32.mrb[244].mxu1  ;;  %v7312_v36 = vpop.f32.mrb[249].mxu0 }
 0x46d   : > { %v7313_v4 = vadd.f32 %v7312_v36, %v7311_v49  ;;  %v7418_v37 = vpop.f32.mrb[245].mxu1  ;;  %v7314_v61 = vpop.f32.mrb[250].mxu0  ;;  %v6486_v49 = vcombine.high %v5026_v20, %v5030_v62 }
 0x46e   : > { %v7419_v23 = vadd.f32 %v7418_v37, %v7417_v40  ;;  %v7420_v41 = vpop.f32.mrb[246].mxu1  ;;  %v7315_v28 = vpop.f32.mrb[251].mxu0 }
 0x46f   : > { %v4513_v3 = vadd.f32 %v7313_v4, %v9871_v54  ;;  %v7316_v26 = vadd.f32 %v7315_v28, %v7314_v61  ;;  %v7421_v22 = vpop.f32.mrb[247].mxu1  ;;  %5526 = vmatprep.subr.bf16.mxu0 %v6486_v49  ;;  %v5038_v28 = vld [vmem:[%s10361_s7 + $0xb0] sm:$0xff] }
 0x470   : > { %v7422_v55 = vadd.f32 %v7421_v22, %v7420_v41  ;;  %v10030_v33 = vadd.f32 %v7419_v23, %v4505_v1  ;;  %v6485_v23 = vcombine.low %v5026_v20, %v5030_v62  ;;  %v5034_v41 = vld [vmem:[%s10361_s7 + $0x90] sm:$0xff] }
 0x471   : > { %v4516_v15 = vadd.f32 %v7316_v26, %v9879_v51 }
 0x472   : > { %v10033_v27 = vadd.f32 %v7422_v55, %v4508_v25  ;;  %v5068_v25 = vld [vmem:[%s10361_s7 + $0x1a0] sm:$0xff]  ;;  %5527 = vmatpush1.bf16.msra.mxu0 %v6485_v23 }
 0x473   : > { %v7317_v31 = vpop.f32.mrb[252].mxu0  ;;  %v6521_v4 = vcombine.low %v5064_v35, %v5068_v25  ;;  %v6522_v37 = vcombine.high %v5064_v35, %v5068_v25 }
 0x474   : > { %v7423_v54 = vpop.f32.mrb[248].mxu1  ;;  %v7318_v32 = vpop.f32.mrb[253].mxu0 }
 0x475   : > { %v7319_v44 = vadd.f32 %v7318_v32, %v7317_v31  ;;  %v7424_v45 = vpop.f32.mrb[249].mxu1  ;;  %v7320_v42 = vpop.f32.mrb[254].mxu0  ;;  %5454 = vmatprep.subr.bf16.mxu1 %v6522_v37  ;;  %v5042_v32 = vld [vmem:[%s10361_s7 + $0xd0] sm:$0xff] }
 0x476   : > { %v7425_v51 = vadd.f32 %v7424_v45, %v7423_v54  ;;  %v7426_v1 = vpop.f32.mrb[250].mxu1  ;;  %v7321_v47 = vpop.f32.mrb[255].mxu0  ;;  %5455 = vmatpush1.bf16.msra.mxu1 %v6521_v4  ;;  %v6501_v20 = vcombine.low %v5042_v32, %v5046_v46 }
 0x477   : > { %v4521_v50 = vadd.f32 %v7319_v44, %v9883_v19  ;;  %v7322_v53 = vadd.f32 %v7321_v47, %v7320_v42  ;;  %v7427_v10 = vpop.f32.mrb[251].mxu1 }
 0x478   : > { %v7428_v40 = vadd.f32 %v7427_v10, %v7426_v1  ;;  %v10054_v36 = vadd.f32 %v7425_v51, %v4513_v3  ;;  %v6494_v3 = vcombine.high %v5034_v41, %v5038_v28  ;;  %v6502_v51 = vcombine.high %v5042_v32, %v5046_v46  ;;  %v5050_v10 = vld [vmem:[%s10361_s7 + $0x110] sm:$0xff] }
 0x479   : > { %v4524_v61 = vadd.f32 %v7322_v53, %v9891_v6  ;;  %v6493_v6 = vcombine.low %v5034_v41, %v5038_v28  ;;  %v5058_v28 = vld [vmem:[%s10361_s7 + $0x150] sm:$0xff] }
 0x47a   : > { %v10057_v19 = vadd.f32 %v7428_v40, %v4516_v15  ;;  %5528 = vmatprep.subr.bf16.mxu0 %v6494_v3 }
 0x47b   : > { %v7323_v26 = vpop.f32.mrb[0].mxu0  ;;  %5529 = vmatpush1.bf16.msra.mxu0 %v6493_v6 }
 0x47c   : > { %v7429_v22 = vpop.f32.mrb[252].mxu1  ;;  %v7324_v55 = vpop.f32.mrb[1].mxu0  ;;  %5530 = vmatprep.subr.bf16.mxu0 %v6502_v51 }
 0x47d   : > { %v7325_v21 = vadd.f32 %v7324_v55, %v7323_v26  ;;  %v7430_v38 = vpop.f32.mrb[253].mxu1  ;;  %v7326_v15 = vpop.f32.mrb[2].mxu0  ;;  %v5062_v26 = vld [vmem:[%s10361_s7 + $0x170] sm:$0xff] }
 0x47e   : > { %v7431_v31 = vadd.f32 %v7430_v38, %v7429_v22  ;;  %v7432_v12 = vpop.f32.mrb[254].mxu1  ;;  %v7327_v54 = vpop.f32.mrb[3].mxu0  ;;  %v6518_v6 = vcombine.high %v5058_v28, %v5062_v26 }
 0x47f   : > { %v4529_v44 = vadd.f32 %v7325_v21, %v9895_v63  ;;  %v7328_v45 = vadd.f32 %v7327_v54, %v7326_v15  ;;  %v7433_v42 = vpop.f32.mrb[255].mxu1  ;;  %v5054_v63 = vld [vmem:[%s10361_s7 + $0x130] sm:$0xff]  ;;  %5531 = vmatpush1.bf16.msra.mxu0 %v6501_v20  ;;  %v6517_v15 = vcombine.low %v5058_v28, %v5062_v26  ;;  %v5072_v20 = vld [vmem:[%s10361_s7 + $0x1c0] sm:$0xff] }
 0x480   : > { %v7434_v1 = vadd.f32 %v7433_v42, %v7432_v12  ;;  %v10072_v47 = vadd.f32 %v7431_v31, %v4521_v50  ;;  %v6510_v25 = vcombine.high %v5050_v10, %v5054_v63  ;;  %v6509_v40 = vcombine.low %v5050_v10, %v5054_v63  ;;  %v5066_v54 = vld [vmem:[%s10361_s7 + $0x190] sm:$0xff] }
 0x481   : > { %v4532_v62 = vadd.f32 %v7328_v45, %v9903_v57 }
 0x482   : > { %v10075_v53 = vadd.f32 %v7434_v1, %v4524_v61  ;;  %5532 = vmatprep.subr.bf16.mxu0 %v6510_v25 }
 0x483   : > { %v7329_v35 = vpop.f32.mrb[4].mxu0  ;;  %5533 = vmatpush1.bf16.msra.mxu0 %v6509_v40 }
 0x484   : > { %v7435_v49 = vpop.f32.mrb[0].mxu1  ;;  %v7330_v50 = vpop.f32.mrb[5].mxu0  ;;  %5534 = vmatprep.subr.bf16.mxu0 %v6518_v6 }
 0x485   : > { %v7331_v4 = vadd.f32 %v7330_v50, %v7329_v35  ;;  %v7436_v37 = vpop.f32.mrb[1].mxu1  ;;  %v7332_v57 = vpop.f32.mrb[6].mxu0  ;;  %v5078_v50 = vld [vmem:[%s10361_s7 + $0x1f0] sm:$0xff] }
 0x486   : > { %v7437_v61 = vadd.f32 %v7436_v37, %v7435_v49  ;;  %v7438_v23 = vpop.f32.mrb[2].mxu1  ;;  %v7333_v41 = vpop.f32.mrb[7].mxu0  ;;  %v5074_v49 = vld [vmem:[%s10361_s7 + $0x1d0] sm:$0xff] }
 0x487   : > { %v4537_v3 = vadd.f32 %v7331_v4, %v9907_v30  ;;  %v7334_v22 = vadd.f32 %v7333_v41, %v7332_v57  ;;  %v7439_v55 = vpop.f32.mrb[3].mxu1  ;;  %v5070_v30 = vld [vmem:[%s10361_s7 + $0x1b0] sm:$0xff]  ;;  %5535 = vmatpush1.bf16.msra.mxu0 %v6517_v15  ;;  %v6533_v28 = vcombine.low %v5074_v49, %v5078_v50 }
 0x488   : > { %v7440_v21 = vadd.f32 %v7439_v55, %v7438_v23  ;;  %v10090_v38 = vadd.f32 %v7437_v61, %v4529_v44  ;;  %v6526_v46 = vcombine.high %v5066_v54, %v5070_v30  ;;  %v6525_v42 = vcombine.low %v5066_v54, %v5070_v30 }
 0x489   : > { %v4540_v31 = vadd.f32 %v7334_v22, %v9921_v13  ;;  %v6534_v61 = vcombine.high %v5074_v49, %v5078_v50  ;;  %v10120_v22 = vld [vmem:[%s10361_s7 + $0x8] sm:$0xff] }
 0x48a   : > { %v10093_v12 = vadd.f32 %v7440_v21, %v4532_v62  ;;  %v5076_v62 = vld [vmem:[%s10361_s7 + $0x1e0] sm:$0xff]  ;;  %5536 = vmatprep.subr.bf16.mxu0 %v6526_v46 }
 0x48b   : > { %v7335_v32 = vpop.f32.mrb[8].mxu0  ;;  %v6530_v25 = vcombine.high %v5072_v20, %v5076_v62  ;;  %v6529_v57 = vcombine.low %v5072_v20, %v5076_v62  ;;  %5537 = vmatpush1.bf16.msra.mxu0 %v6525_v42 }
 0x48c   : > { %v7441_v45 = vpop.f32.mrb[4].mxu1  ;;  %v7336_v44 = vpop.f32.mrb[9].mxu0  ;;  %5538 = vmatprep.subr.bf16.mxu0 %v6534_v61 }
 0x48d   : > { %v7337_v51 = vadd.f32 %v7336_v44, %v7335_v32  ;;  %v7442_v1 = vpop.f32.mrb[5].mxu1  ;;  %v7338_v13 = vpop.f32.mrb[10].mxu0  ;;  %5456 = vmatprep.subr.bf16.mxu1 %v6530_v25 }
 0x48e   : > { %v7443_v10 = vadd.f32 %v7442_v1, %v7441_v45  ;;  %v7444_v63 = vpop.f32.mrb[6].mxu1  ;;  %v7339_v35 = vpop.f32.mrb[11].mxu0  ;;  %5457 = vmatpush1.bf16.msra.mxu1 %v6529_v57 }
 0x48f   : > { %v4545_v40 = vadd.f32 %v7337_v51, %v9925_v43  ;;  %v7340_v4 = vadd.f32 %v7339_v35, %v7338_v13  ;;  %v7445_v37 = vpop.f32.mrb[7].mxu1  ;;  %v10125_v43 = vld [vmem:[%s10361_s7 + $0x28] sm:$0xff]  ;;  %5539 = vmatpush1.bf16.msra.mxu0 %v6533_v28 }
 0x490   : > { %v7446_v23 = vadd.f32 %v7445_v37, %v7444_v63  ;;  %v10114_v41 = vadd.f32 %v7443_v10, %v4537_v3  ;;  %v7844_v3 = vmov 0   ;;  %v6476_v6 = vcombine.high %v10120_v22, %v10125_v43 }
 0x491   : > { %v4548_v26 = vadd.f32 %v7340_v4, %v9933_v52  ;;  %5474 = vmatprep.mubr.bf16.mxu1 %v7844_v3  ;;  %v6475_v52 = vcombine.low %v10120_v22, %v10125_v43  ;;  %5556 = vmatprep.mubr.bf16.mxu0 %v7844_v3  ;;  %v5049_v22 = vld [vmem:[%s10361_s7 + $0x108] sm:$0xff] }
 0x492   : > { %v10127_v55 = vadd.f32 %v7446_v23, %v4540_v31  ;;  %5483 = vmatprep.subr.bf16.mxu1 %v6476_v6  ;;  %v5053_v43 = vld [vmem:[%s10361_s7 + $0x128] sm:$0xff] }
 0x493   : > { %v7341_v21 = vpop.f32.mrb[12].mxu0 }
 0x494   : > { %v7447_v15 = vpop.f32.mrb[8].mxu1  ;;  %v7342_v54 = vpop.f32.mrb[13].mxu0 }
 0x495   : > { %v7343_v30 = vadd.f32 %v7342_v54, %v7341_v21  ;;  %v7448_v32 = vpop.f32.mrb[9].mxu1  ;;  %v7344_v31 = vpop.f32.mrb[14].mxu0 }
 0x496   : > { %v7449_v46 = vadd.f32 %v7448_v32, %v7447_v15  ;;  %v7450_v45 = vpop.f32.mrb[10].mxu1  ;;  %v7345_v44 = vpop.f32.mrb[15].mxu0 }
 0x497   : > { %v4553_v42 = vadd.f32 %v7343_v30, %v9937_v7  ;;  %v7346_v51 = vadd.f32 %v7345_v44, %v7344_v31  ;;  %v7451_v1 = vpop.f32.mrb[11].mxu1 }
 0x498   : > { %v7452_v13 = vadd.f32 %v7451_v1, %v7450_v45  ;;  %v10136_v20 = vadd.f32 %v7449_v46, %v4545_v40 }
 0x499   : > { %v4556_v62 = vadd.f32 %v7346_v51, %v9947_v17 }
 0x49a   : > { %v10139_v10 = vadd.f32 %v7452_v13, %v4548_v26 }
 0x49b   : > { %v7347_v63 = vpop.f32.mrb[16].mxu0 }
 0x49c   : > { %v7453_v35 = vpop.f32.mrb[12].mxu1  ;;  %v7348_v25 = vpop.f32.mrb[17].mxu0 }
 0x49d   : > { %v7349_v49 = vadd.f32 %v7348_v25, %v7347_v63  ;;  %v7454_v50 = vpop.f32.mrb[13].mxu1  ;;  %v7350_v4 = vpop.f32.mrb[18].mxu0 }
 0x49e   : > { %v7455_v37 = vadd.f32 %v7454_v50, %v7453_v35  ;;  %v7456_v57 = vpop.f32.mrb[14].mxu1  ;;  %v7351_v61 = vpop.f32.mrb[19].mxu0 }
 0x49f   : > { %v4561_v7 = vadd.f32 %v7349_v49, %v9951_v14  ;;  %v7352_v23 = vadd.f32 %v7351_v61, %v7350_v4  ;;  %v7457_v28 = vpop.f32.mrb[15].mxu1 }
 0x4a0   : > { %v7458_v6 = vadd.f32 %v7457_v28, %v7456_v57  ;;  %v10142_v40 = vadd.f32 %v7455_v37, %v4553_v42 }
 0x4a1   : > { %v4564_v17 = vadd.f32 %v7352_v23, %v9953_v0 }
 0x4a2   : > { %v10145_v26 = vadd.f32 %v7458_v6, %v4556_v62 }
 0x4a3   : > { %v7353_v21 = vpop.f32.mrb[20].mxu0 }
 0x4a4   : > { %v7459_v15 = vpop.f32.mrb[16].mxu1  ;;  %v7354_v54 = vpop.f32.mrb[21].mxu0 }
 0x4a5   : > { %v7355_v30 = vadd.f32 %v7354_v54, %v7353_v21  ;;  %v7460_v32 = vpop.f32.mrb[17].mxu1  ;;  %v7356_v31 = vpop.f32.mrb[22].mxu0 }
 0x4a6   : > { %v7461_v46 = vadd.f32 %v7460_v32, %v7459_v15  ;;  %v7462_v45 = vpop.f32.mrb[18].mxu1  ;;  %v7357_v44 = vpop.f32.mrb[23].mxu0 }
 0x4a7   : > { %v4569_v14 = vadd.f32 %v7355_v30, %v9957_v16  ;;  %v7358_v51 = vadd.f32 %v7357_v44, %v7356_v31  ;;  %v7463_v1 = vpop.f32.mrb[19].mxu1 }
 0x4a8   : > { %v7464_v13 = vadd.f32 %v7463_v1, %v7462_v45  ;;  %v10148_v42 = vadd.f32 %v7461_v46, %v4561_v7 }
 0x4a9   : > { %v4572_v0 = vadd.f32 %v7358_v51, %v9965_v29 }
 0x4aa   : > { %v10151_v62 = vadd.f32 %v7464_v13, %v4564_v17 }
 0x4ab   : > { %v7359_v63 = vpop.f32.mrb[24].mxu0 }
 0x4ac   : > { %v7465_v35 = vpop.f32.mrb[20].mxu1  ;;  %v7360_v25 = vpop.f32.mrb[25].mxu0 }
 0x4ad   : > { %v7361_v49 = vadd.f32 %v7360_v25, %v7359_v63  ;;  %v7466_v50 = vpop.f32.mrb[21].mxu1  ;;  %v7362_v4 = vpop.f32.mrb[26].mxu0 }
 0x4ae   : > { %v7467_v37 = vadd.f32 %v7466_v50, %v7465_v35  ;;  %v7468_v57 = vpop.f32.mrb[22].mxu1  ;;  %v7363_v61 = vpop.f32.mrb[27].mxu0 }
 0x4af   : > { %v4577_v16 = vadd.f32 %v7361_v49, %v9969_v18  ;;  %v7364_v23 = vadd.f32 %v7363_v61, %v7362_v4  ;;  %v7469_v28 = vpop.f32.mrb[23].mxu1 }
 0x4b0   : > { %v7470_v6 = vadd.f32 %v7469_v28, %v7468_v57  ;;  %v10154_v7 = vadd.f32 %v7467_v37, %v4569_v14 }
 0x4b1   : > { %v4580_v29 = vadd.f32 %v7364_v23, %v9971_v11 }
 0x4b2   : > { %v10157_v17 = vadd.f32 %v7470_v6, %v4572_v0 }
 0x4b3   : > { %v7365_v21 = vpop.f32.mrb[28].mxu0 }
 0x4b4   : > { %v7471_v15 = vpop.f32.mrb[24].mxu1  ;;  %v7366_v54 = vpop.f32.mrb[29].mxu0 }
 0x4b5   : > { %v7367_v30 = vadd.f32 %v7366_v54, %v7365_v21  ;;  %v7472_v32 = vpop.f32.mrb[25].mxu1  ;;  %v7368_v31 = vpop.f32.mrb[30].mxu0  ;;  %v10829_v54 = vld [vmem:[#allocation7_spill] sm:$0xff] }
 0x4b6   : > { %v7473_v46 = vadd.f32 %v7472_v32, %v7471_v15  ;;  %v7474_v45 = vpop.f32.mrb[26].mxu1  ;;  %v7369_v44 = vpop.f32.mrb[31].mxu0  ;;  %v10828_v15 = vld [vmem:[#allocation4_spill] sm:$0xff] }
 0x4b7   : > { %v4585_v18 = vadd.f32 %v7367_v30, %v9976_v60  ;;  %v7370_v51 = vadd.f32 %v7369_v44, %v7368_v31  ;;  %v7475_v1 = vpop.f32.mrb[27].mxu1  ;;  %v10830_v31 = vld [vmem:[#allocation6_spill] sm:$0xff] }
 0x4b8   : > { %v7476_v13 = vadd.f32 %v7475_v1, %v7474_v45  ;;  %v10160_v14 = vadd.f32 %v7473_v46, %v4577_v16  ;;  %v10827_v16 = vld [vmem:[#allocation5_spill] sm:$0xff] }
 0x4b9   : > { %v4588_v11 = vadd.f32 %v7370_v51, %v9979_v39 }
 0x4ba   : > { %v10163_v0 = vadd.f32 %v7476_v13, %v4580_v29 }
 0x4bb   : > { %v7621_v63 = vpop.f32.mrb[32].mxu0 }
 0x4bc   : > { %v7477_v35 = vpop.f32.mrb[28].mxu1  ;;  %v4795_v25 = vadd.f32 %v7621_v63, %v9994_v59  ;;  %v4786_v49 = vpop.f32.mrb[33].mxu0 }
 0x4bd   : > { %v7478_v50 = vpop.f32.mrb[29].mxu1  ;;  %v4787_v4 = vadd.f32 %v4786_v49, %v9988_v58  ;;  %v7622_v37 = vpop.f32.mrb[34].mxu0 }
 0x4be   : > { %v7479_v57 = vadd.f32 %v7478_v50, %v7477_v35  ;;  %v7480_v60 = vpop.f32.mrb[30].mxu1  ;;  %v4798_v61 = vadd.f32 %v7622_v37, %v9997_v5  ;;  %v4789_v23 = vpop.f32.mrb[35].mxu0  ;;  %v4915_v59 = vadd.f32 %v4795_v25, %v10828_v15  ;;  %v10832_v37 = vld [vmem:[#allocation8_spill] sm:$0xff] }
 0x4bf   : > { %v4913_v28 = vadd.f32 %v4787_v4, %v10827_v16  ;;  %v7481_v6 = vpop.f32.mrb[31].mxu1  ;;  %v4790_v39 = vadd.f32 %v4789_v23, %v9991_v8 }
 0x4c0   : > { %v7482_v29 = vadd.f32 %v7481_v6, %v7480_v60  ;;  %v10170_v21 = vadd.f32 %v7479_v57, %v4585_v18  ;;  %v4916_v46 = vadd.f32 %v4798_v61, %v10830_v31  ;;  %v4947_v1 = vmax.f32 %v4915_v59, 0.0 }
 0x4c1   : > { %v4914_v30 = vadd.f32 %v4790_v39, %v10829_v54  ;;  %v4945_v58 = vmax.f32 %v4913_v28, 0.0  ;;  %v10834_v28 = vld [vmem:[#allocation10_spill] sm:$0xff] }
 0x4c2   : > { %v10174_v32 = vadd.f32 %v7482_v29, %v4588_v11  ;;  %v4948_v25 = vmax.f32 %v4916_v46, 0.0  ;;  %v10831_v11 = vld [vmem:[#allocation9_spill] sm:$0xff] }
 0x4c3   : > { %v4946_v45 = vmax.f32 %v4914_v30, 0.0  ;;  %v7625_v5 = vpop.f32.mrb[36].mxu0 }
 0x4c4   : > { %v4811_v44 = vadd.f32 %v7625_v5, %v10012_v24  ;;  %v4802_v51 = vpop.f32.mrb[37].mxu0  ;;  %v10833_v24 = vld [vmem:[#allocation11_spill] sm:$0xff] }
 0x4c5   : > { %v4977_v13 = vadd.f32 %v4946_v45, %v4945_v58  ;;  %v4803_v8 = vadd.f32 %v4802_v51, %v10006_v34  ;;  %v7626_v18 = vpop.f32.mrb[38].mxu0  ;;  %v10835_v45 = vld [vmem:[#allocation13_spill] sm:$0xff]  ;;  %v10836_v51 = vld [vmem:[#allocation12_spill] sm:$0xff] }
 0x4c6   : > { %v4814_v63 = vadd.f32 %v7626_v18, %v10015_v48  ;;  %v4805_v35 = vpop.f32.mrb[39].mxu0  ;;  %v4919_v57 = vadd.f32 %v4811_v44, %v10832_v37 }
 0x4c7   : > { %v4978_v49 = vadd.f32 %v4977_v13, %v4947_v1  ;;  %v4917_v50 = vadd.f32 %v4803_v8, %v10831_v11  ;;  %v4806_v4 = vadd.f32 %v4805_v35, %v10009_v56  ;;  %v10838_v35 = vld [vmem:[#allocation14_spill] sm:$0xff] }
 0x4c8   : > { %v4920_v6 = vadd.f32 %v4814_v63, %v10834_v28  ;;  %v4951_v15 = vmax.f32 %v4919_v57, 0.0 }
 0x4c9   : > { %v4949_v60 = vmax.f32 %v4917_v50, 0.0  ;;  %v4979_v61 = vadd.f32 %v4978_v49, %v4948_v25  ;;  %v4918_v23 = vadd.f32 %v4806_v4, %v10833_v24 }
 0x4ca   : > { %v4952_v31 = vmax.f32 %v4920_v6, 0.0  ;;  %v10840_v6 = vld [vmem:[#allocation17_spill] sm:$0xff] }
 0x4cb   : > { %v4980_v16 = vadd.f32 %v4979_v61, %v4949_v60  ;;  %v4950_v34 = vmax.f32 %v4918_v23, 0.0  ;;  %v7629_v39 = vpop.f32.mrb[40].mxu0  ;;  %v10839_v23 = vld [vmem:[#allocation18_spill] sm:$0xff] }
 0x4cc   : > { %v4827_v48 = vadd.f32 %v7629_v39, %v10030_v33  ;;  %v4818_v29 = vpop.f32.mrb[41].mxu0  ;;  %v10837_v33 = vld [vmem:[#allocation15_spill] sm:$0xff] }
 0x4cd   : > { %v4981_v59 = vadd.f32 %v4980_v16, %v4950_v34  ;;  %v4819_v54 = vadd.f32 %v4818_v29, %v10024_v2  ;;  %v7630_v30 = vpop.f32.mrb[42].mxu0 }
 0x4ce   : > { %v4830_v56 = vadd.f32 %v7630_v30, %v10033_v27  ;;  %v4821_v58 = vpop.f32.mrb[43].mxu0  ;;  %v4923_v1 = vadd.f32 %v4827_v48, %v10836_v51 }
 0x4cf   : > { %v4982_v46 = vadd.f32 %v4981_v59, %v4951_v15  ;;  %v4921_v5 = vadd.f32 %v4819_v54, %v10835_v45  ;;  %v4822_v44 = vadd.f32 %v4821_v58, %v10027_v9  ;;  %v10842_v59 = vld [vmem:[#allocation19_spill] sm:$0xff] }
 0x4d0   : > { %v4924_v25 = vadd.f32 %v4830_v56, %v10838_v35  ;;  %v4955_v50 = vmax.f32 %v4923_v1, 0.0  ;;  %v10843_v1 = vld [vmem:[#allocation23_spill] sm:$0xff] }
 0x4d1   : > { %v4953_v13 = vmax.f32 %v4921_v5, 0.0  ;;  %v4983_v8 = vadd.f32 %v4982_v46, %v4952_v31  ;;  %v4922_v18 = vadd.f32 %v4822_v44, %v10837_v33  ;;  %v10844_v33 = vld [vmem:[#allocation22_spill] sm:$0xff] }
 0x4d2   : > { %v4956_v61 = vmax.f32 %v4924_v25, 0.0 }
 0x4d3   : > { %v4984_v63 = vadd.f32 %v4983_v8, %v4953_v13  ;;  %v4954_v2 = vmax.f32 %v4922_v18, 0.0  ;;  %v7633_v49 = vpop.f32.mrb[44].mxu0 }
 0x4d4   : > { %v4843_v27 = vadd.f32 %v7633_v49, %v10072_v47  ;;  %v4834_v11 = vpop.f32.mrb[45].mxu0  ;;  %v10841_v47 = vld [vmem:[#allocation20_spill] sm:$0xff] }
 0x4d5   : > { %v4985_v4 = vadd.f32 %v4984_v63, %v4954_v2  ;;  %v4835_v37 = vadd.f32 %v4834_v11, %v10054_v36  ;;  %v7634_v57 = vpop.f32.mrb[46].mxu0  ;;  %v10846_v49 = vld [vmem:[#allocation24_spill] sm:$0xff] }
 0x4d6   : > { %v4846_v9 = vadd.f32 %v7634_v57, %v10075_v53  ;;  %v4837_v60 = vpop.f32.mrb[47].mxu0  ;;  %v4927_v34 = vadd.f32 %v4843_v27, %v10840_v6  ;;  %v10848_v6 = vld [vmem:[#allocation27_spill] sm:$0xff] }
 0x4d7   : > { %v4986_v24 = vadd.f32 %v4985_v4, %v4955_v50  ;;  %v4925_v16 = vadd.f32 %v4835_v37, %v10839_v23  ;;  %v4838_v28 = vadd.f32 %v4837_v60, %v10057_v19  ;;  %v10847_v23 = vld [vmem:[#allocation28_spill] sm:$0xff] }
 0x4d8   : > { %v4928_v54 = vadd.f32 %v4846_v9, %v10842_v59  ;;  %v4959_v58 = vmax.f32 %v4927_v34, 0.0 }
 0x4d9   : > { %v4957_v39 = vmax.f32 %v4925_v16, 0.0  ;;  %v4987_v48 = vadd.f32 %v4986_v24, %v4956_v61  ;;  %v4926_v29 = vadd.f32 %v4838_v28, %v10841_v47 }
 0x4da   : > { %v4960_v44 = vmax.f32 %v4928_v54, 0.0 }
 0x4db   : > { %v4988_v15 = vadd.f32 %v4987_v48, %v4957_v39  ;;  %v4958_v36 = vmax.f32 %v4926_v29, 0.0  ;;  %v7637_v30 = vpop.f32.mrb[48].mxu0 }
 0x4dc   : > { %v4859_v53 = vadd.f32 %v7637_v30, %v10114_v41  ;;  %v4850_v56 = vpop.f32.mrb[49].mxu0  ;;  %v10845_v41 = vld [vmem:[#allocation25_spill] sm:$0xff] }
 0x4dd   : > { %v4989_v31 = vadd.f32 %v4988_v15, %v4958_v36  ;;  %v4851_v46 = vadd.f32 %v4850_v56, %v10090_v38  ;;  %v7638_v45 = vpop.f32.mrb[50].mxu0  ;;  %v10850_v15 = vld [vmem:[#allocation29_spill] sm:$0xff] }
 0x4de   : > { %v4862_v19 = vadd.f32 %v7638_v45, %v10127_v55  ;;  %v4853_v5 = vpop.f32.mrb[51].mxu0  ;;  %v4931_v18 = vadd.f32 %v4859_v53, %v10844_v33 }
 0x4df   : > { %v4990_v51 = vadd.f32 %v4989_v31, %v4959_v58  ;;  %v4929_v13 = vadd.f32 %v4851_v46, %v10843_v1  ;;  %v4854_v8 = vadd.f32 %v4853_v5, %v10093_v12 }
 0x4e0   : > { %v4932_v27 = vadd.f32 %v4862_v19, %v10846_v49  ;;  %v4963_v4 = vmax.f32 %v4931_v18, 0.0  ;;  %v10851_v19 = vld [vmem:[#allocation33_spill] sm:$0xff] }
 0x4e1   : > { %v4961_v63 = vmax.f32 %v4929_v13, 0.0  ;;  %v4991_v35 = vadd.f32 %v4990_v51, %v4960_v44  ;;  %v4930_v25 = vadd.f32 %v4854_v8, %v10845_v41  ;;  %v10852_v51 = vld [vmem:[#allocation32_spill] sm:$0xff] }
 0x4e2   : > { %v4964_v61 = vmax.f32 %v4932_v27, 0.0 }
 0x4e3   : > { %v4992_v2 = vadd.f32 %v4991_v35, %v4961_v63  ;;  %v4962_v38 = vmax.f32 %v4930_v25, 0.0  ;;  %v7641_v11 = vpop.f32.mrb[52].mxu0  ;;  %v10854_v63 = vld [vmem:[#allocation34_spill] sm:$0xff] }
 0x4e4   : > { %v4875_v55 = vadd.f32 %v7641_v11, %v10142_v40  ;;  %v4866_v50 = vpop.f32.mrb[53].mxu0  ;;  %v10849_v40 = vld [vmem:[#allocation30_spill] sm:$0xff] }
 0x4e5   : > { %v4993_v37 = vadd.f32 %v4992_v2, %v4962_v38  ;;  %v4867_v57 = vadd.f32 %v4866_v50, %v10136_v20  ;;  %v7642_v9 = vpop.f32.mrb[54].mxu0 }
 0x4e6   : > { %v4878_v12 = vadd.f32 %v7642_v9, %v10145_v26  ;;  %v4869_v60 = vpop.f32.mrb[55].mxu0  ;;  %v4935_v34 = vadd.f32 %v4875_v55, %v10848_v6  ;;  %v10856_v9 = vld [vmem:[#allocation37_spill] sm:$0xff] }
 0x4e7   : > { %v4994_v24 = vadd.f32 %v4993_v37, %v4963_v4  ;;  %v4933_v16 = vadd.f32 %v4867_v57, %v10847_v23  ;;  %v4870_v28 = vadd.f32 %v4869_v60, %v10139_v10  ;;  %v10855_v4 = vld [vmem:[#allocation38_spill] sm:$0xff] }
 0x4e8   : > { %v4936_v59 = vadd.f32 %v4878_v12, %v10850_v15  ;;  %v4967_v30 = vmax.f32 %v4935_v34, 0.0 }
 0x4e9   : > { %v4965_v39 = vmax.f32 %v4933_v16, 0.0  ;;  %v4995_v48 = vadd.f32 %v4994_v24, %v4964_v61  ;;  %v4934_v47 = vadd.f32 %v4870_v28, %v10849_v40  ;;  %v10858_v16 = vld [vmem:[#allocation39_spill] sm:$0xff] }
 0x4ea   : > { %v4968_v46 = vmax.f32 %v4936_v59, 0.0 }
 0x4eb   : > { %v4996_v29 = vadd.f32 %v4995_v48, %v4965_v39  ;;  %v4966_v20 = vmax.f32 %v4934_v47, 0.0  ;;  %v7645_v54 = vpop.f32.mrb[56].mxu0 }
 0x4ec   : > { %v4891_v26 = vadd.f32 %v7645_v54, %v10154_v7  ;;  %v4882_v36 = vpop.f32.mrb[57].mxu0  ;;  %v10853_v7 = vld [vmem:[#allocation35_spill] sm:$0xff]  ;;  %v5029_v54 = vld [vmem:[%s10361_s7 + $0x68] sm:$0xff] }
 0x4ed   : > { %v4997_v53 = vadd.f32 %v4996_v29, %v4966_v20  ;;  %v4883_v56 = vadd.f32 %v4882_v36, %v10148_v42  ;;  %v7646_v58 = vpop.f32.mrb[58].mxu0  ;;  %v5025_v20 = vld [vmem:[%s10361_s7 + $0x48] sm:$0xff] }
 0x4ee   : > { %v4894_v10 = vadd.f32 %v7646_v58, %v10157_v17  ;;  %v4885_v31 = vpop.f32.mrb[59].mxu0  ;;  %v4939_v1 = vadd.f32 %v4891_v26, %v10852_v51  ;;  %v6483_v58 = vcombine.low %v5025_v20, %v5029_v54  ;;  %v5061_v51 = vld [vmem:[%s10361_s7 + $0x168] sm:$0xff] }
 0x4ef   : > { %v4998_v45 = vadd.f32 %v4997_v53, %v4967_v30  ;;  %v4937_v5 = vadd.f32 %v4883_v56, %v10851_v19  ;;  %v4886_v44 = vadd.f32 %v4885_v31, %v10151_v62  ;;  %v6484_v30 = vcombine.high %v5025_v20, %v5029_v54  ;;  %v5033_v53 = vld [vmem:[%s10361_s7 + $0x88] sm:$0xff]  ;;  %v5080_v54 = vld [vmem:[%s10362_s8] sm:$0xff] }
 0x4f0   : > { %v4940_v35 = vadd.f32 %v4894_v10, %v10854_v63  ;;  %v4971_v2 = vmax.f32 %v4939_v1, 0.0  ;;  %v5037_v56 = vld [vmem:[%s10361_s7 + $0xa8] sm:$0xff]  ;;  %v6507_v1 = vcombine.low %v5049_v22, %v5053_v43 }
 0x4f1   : > { %v4969_v13 = vmax.f32 %v4937_v5, 0.0  ;;  %v4999_v8 = vadd.f32 %v4998_v45, %v4968_v46  ;;  %v4938_v33 = vadd.f32 %v4886_v44, %v10853_v7  ;;  %v6492_v10 = vcombine.high %v5033_v53, %v5037_v56  ;;  %v5041_v31 = vld [vmem:[%s10361_s7 + $0xc8] sm:$0xff] }
 0x4f2   : > { %v4972_v55 = vmax.f32 %v4940_v35, 0.0  ;;  %v5045_v46 = vld [vmem:[%s10361_s7 + $0xe8] sm:$0xff]  ;;  %v6491_v45 = vcombine.low %v5033_v53, %v5037_v56  ;;  %v6508_v5 = vcombine.high %v5049_v22, %v5053_v43 }
 0x4f3   : > { %v5000_v18 = vadd.f32 %v4999_v8, %v4969_v13  ;;  %v4970_v42 = vmax.f32 %v4938_v33, 0.0  ;;  %v7649_v41 = vpop.f32.mrb[60].mxu0  ;;  %v6500_v19 = vcombine.high %v5041_v31, %v5045_v46  ;;  %v5057_v44 = vld [vmem:[%s10361_s7 + $0x148] sm:$0xff] }
 0x4f4   : > { %v4907_v17 = vadd.f32 %v7649_v41, %v10170_v21  ;;  %v4898_v25 = vpop.f32.mrb[61].mxu0  ;;  %v10857_v21 = vld [vmem:[#allocation40_spill] sm:$0xff]  ;;  %v6516_v13 = vcombine.high %v5057_v44, %v5061_v51  ;;  %v5065_v8 = vld [vmem:[%s10361_s7 + $0x188] sm:$0xff]  ;;  %v6515_v33 = vcombine.low %v5057_v44, %v5061_v51 }
 0x4f5   : > { %v5001_v49 = vadd.f32 %v5000_v18, %v4970_v42  ;;  %v4899_v27 = vadd.f32 %v4898_v25, %v10160_v14  ;;  %v7650_v38 = vpop.f32.mrb[62].mxu0  ;;  %v5069_v7 = vld [vmem:[%s10361_s7 + $0x1a8] sm:$0xff]  ;;  %v5023_v25 = vld [vmem:[%s10361_s7 + $0x38] sm:$0xff] }
 0x4f6   : > { %v4910_v62 = vadd.f32 %v7650_v38, %v10174_v32  ;;  %v4901_v11 = vpop.f32.mrb[63].mxu0  ;;  %v4943_v12 = vadd.f32 %v4907_v17, %v10856_v9  ;;  %v6524_v18 = vcombine.high %v5065_v8, %v5069_v7  ;;  %v5073_v63 = vld [vmem:[%s10361_s7 + $0x1c8] sm:$0xff]  ;;  %v6523_v42 = vcombine.low %v5065_v8, %v5069_v7  ;;  %v5019_v17 = vld [vmem:[%s10361_s7 + $0x18] sm:$0xff] }
 0x4f7   : > { %v5002_v50 = vadd.f32 %v5001_v49, %v4971_v2  ;;  %v4941_v37 = vadd.f32 %v4899_v27, %v10855_v4  ;;  %v4902_v57 = vadd.f32 %v4901_v11, %v10163_v0  ;;  %v5077_v35 = vld [vmem:[%s10361_s7 + $0x1e8] sm:$0xff]  ;;  %v6480_v49 = vcombine.high %v5019_v17, %v5023_v25  ;;  %v5027_v27 = vld [vmem:[%s10361_s7 + $0x58] sm:$0xff] }
 0x4f8   : > { %v4944_v28 = vadd.f32 %v4910_v62, %v10858_v16  ;;  %v4975_v6 = vmax.f32 %v4943_v12, 0.0  ;;  %v6532_v41 = vcombine.high %v5073_v63, %v5077_v35  ;;  %v6531_v2 = vcombine.low %v5073_v63, %v5077_v35  ;;  %v5031_v38 = vld [vmem:[%s10361_s7 + $0x78] sm:$0xff] }
 0x4f9   : > { %v4973_v60 = vmax.f32 %v4941_v37, 0.0  ;;  %v5003_v61 = vadd.f32 %v5002_v50, %v4972_v55  ;;  %v4942_v24 = vadd.f32 %v4902_v57, %v10857_v21  ;;  %v6479_v62 = vcombine.low %v5019_v17, %v5023_v25  ;;  %v5035_v55 = vld [vmem:[%s10361_s7 + $0x98] sm:$0xff] }
 0x4fa   : > { %v4976_v32 = vmax.f32 %v4944_v28, 0.0  ;;  %v6488_v11 = vcombine.high %v5027_v27, %v5031_v38  ;;  %v5039_v50 = vld [vmem:[%s10361_s7 + $0xb8] sm:$0xff]  ;;  %v6487_v4 = vcombine.low %v5027_v27, %v5031_v38 }
 0x4fb   : > { %v5004_v23 = vadd.f32 %v5003_v61, %v4973_v60  ;;  %v4974_v14 = vmax.f32 %v4942_v24, 0.0  ;;  %v6496_v37 = vcombine.high %v5035_v55, %v5039_v50  ;;  %v5043_v57 = vld [vmem:[%s10361_s7 + $0xd8] sm:$0xff]  ;;  %v6495_v12 = vcombine.low %v5035_v55, %v5039_v50 }
 0x4fc   : > { %v5047_v9 = vld [vmem:[%s10361_s7 + $0xf8] sm:$0xff] }
 0x4fd   : > { %v5005_v34 = vadd.f32 %v5004_v23, %v4974_v14  ;;  %v6504_v60 = vcombine.high %v5043_v57, %v5047_v9  ;;  %v5051_v61 = vld [vmem:[%s10361_s7 + $0x118] sm:$0xff]  ;;  %v6503_v21 = vcombine.low %v5043_v57, %v5047_v9 }
 0x4fe   : > { %v5059_v23 = vld [vmem:[%s10361_s7 + $0x158] sm:$0xff] }
 0x4ff   : > { %v5006_v39 = vadd.f32 %v5005_v34, %v4975_v6  ;;  %v5063_v16 = vld [vmem:[%s10361_s7 + $0x178] sm:$0xff] }
 0x500   : > { %v6520_v14 = vcombine.high %v5059_v23, %v5063_v16  ;;  %v5067_v6 = vld [vmem:[%s10361_s7 + $0x198] sm:$0xff] }
 0x501   : > { %v5007_v48 = vadd.f32 %v5006_v39, %v4976_v32  ;;  %v5071_v34 = vld [vmem:[%s10361_s7 + $0x1b8] sm:$0xff]  ;;  %v6519_v32 = vcombine.low %v5059_v23, %v5063_v16 }
 0x502   : > { %v6528_v39 = vcombine.high %v5067_v6, %v5071_v34 }
 0x503   : > { %v5008_v40 = vrot.slane %v5007_v48, 4 }
 0x505   : > { %v5009_v47 = vadd.f32 %v5008_v40, %v5007_v48  ;;  %v5075_v48 = vld [vmem:[%s10361_s7 + $0x1d8] sm:$0xff] }
 0x506   : > { %v5079_v40 = vld [vmem:[%s10361_s7 + $0x1f8] sm:$0xff] }
 0x507   : > { %v5010_v29 = vrot.slane %v5009_v47, 2 }
 0x509   : > { %v5011_v15 = vadd.f32 %v5010_v29, %v5009_v47  ;;  %v6527_v47 = vcombine.low %v5067_v6, %v5071_v34  ;;  %v6536_v29 = vcombine.high %v5075_v48, %v5079_v40 }
 0x50b   : > { %v5012_v0 = vrot.slane %v5011_v15, 1 }
 0x50d   : > { %v5013_v59 = vadd.f32 %v5012_v0, %v5011_v15  ;;  %v6535_v15 = vcombine.low %v5075_v48, %v5079_v40  ;;  %v10859_v0 = vld [vmem:[#allocation3_spill] sm:$0xff] }
 0x50e   : > { %v5420_v20 = vsub.s32 4, %v10859_v0  ;;  %v5412_v7 = vsub.s32 2, %v10859_v0  ;;  %v5416_v63 = vsub.s32 3, %v10859_v0  ;;  %v5432_v57 = vsub.s32 7, %v10859_v0 }
 0x50f   : > { %v5014_v26 = vmul.f32 0.00390625, %v5013_v59  ;;  %v5404_v59 = vsub.s32 0, %v10859_v0 }
 0x510   : > { %v5421_v56 = vrot.slane %v5080_v54, %v5420_v20  ;;  %v5413_v35 = vrot.slane %v5080_v54, %v5412_v7 }
 0x511   : > { %v10239_v36 = vpack.c.bf16 %v5014_v26, %v5014_v26  ;;  %v5408_v26 = vsub.s32 1, %v10859_v0  ;;  %v5405_v53 = vrot.slane %v5080_v54, %v5404_v59 }
 0x513   : > { %5475 = vmatmul.mubr.bf16.vlgmr.msra.gmra.mrb[32].mxu1 %v10239_v36  ;;  %5557 = vmatmul.mubr.bf16.vlgmr.msra.gmra.mrb[64].mxu0 %v10239_v36 }
 0x514   : > { %5484 = vmatpush1.bf16.msra.mxu1 %v6475_v52  ;;  %5515 = vmatprep.mubr.bf16.mxu1 %v7844_v3  ;;  %v6499_v52 = vcombine.low %v5041_v31, %v5045_v46 }
 0x515   : > { %5485 = vmatprep.subr.bf16.mxu1 %v6484_v30  ;;  %v5424_v30 = vsub.s32 5, %v10859_v0 }
 0x518   : > { %5486 = vmatpush1.bf16.msra.mxu1 %v6483_v58  ;;  %v5409_v58 = vrot.slane %v5080_v54, %v5408_v26 }
 0x519   : > { %5487 = vmatprep.subr.bf16.mxu1 %v6492_v10  ;;  %v5425_v10 = vrot.slane %v5080_v54, %v5424_v30 }
 0x51c   : > { %5488 = vmatpush1.bf16.msra.mxu1 %v6491_v45 }
 0x51d   : > { %5489 = vmatprep.subr.bf16.mxu1 %v6500_v19 }
 0x520   : > { %5490 = vmatpush1.bf16.msra.mxu1 %v6499_v52 }
 0x521   : > { %5491 = vmatprep.subr.bf16.mxu1 %v6508_v5 }
 0x524   : > { %5492 = vmatpush1.bf16.msra.mxu1 %v6507_v1 }
 0x525   : > { %5493 = vmatprep.subr.bf16.mxu1 %v6516_v13 }
 0x528   : > { %5494 = vmatpush1.bf16.msra.mxu1 %v6515_v33  ;;  %v7845_v33 = vmov 1966171168  }
 0x529   : > { %5495 = vmatprep.subr.bf16.mxu1 %v6524_v18  ;;  %v5619_v18 = vunpack.c.l.s4 %v7845_v33 }
 0x52c   : > { %5496 = vmatpush1.bf16.msra.mxu1 %v6523_v42  ;;  %v5620_v42 = vunpack.c.0.s8 %v5619_v18 }
 0x52d   : > { %5497 = vmatprep.subr.bf16.mxu1 %v6532_v41  ;;  %v5417_v41 = vrot.slane %v5080_v54, %v5416_v63 }
 0x530   : > { %5498 = vmatpush1.bf16.msra.mxu1 %v6531_v2 }
 0x531   : > { %5565 = vmatprep.subr.bf16.mxu1 %v6480_v49  ;;  %v5623_v49 = vsub.s32 %v5620_v42, %v10859_v0 }
 0x533   : > { %5516 = vmatmul.mubr.bf16.vlgmr.msra.gmra.mrb[36].mxu1 %v10239_v36 }
 0x534   : > { %5566 = vmatpush1.bf16.msra.mxu1 %v6479_v62  ;;  %5597 = vmatprep.mubr.bf16.mxu1 %v7844_v3  ;;  %v5055_v3 = vld [vmem:[%s10361_s7 + $0x138] sm:$0xff] }
 0x535   : > { %5567 = vmatprep.subr.bf16.mxu1 %v6488_v11  ;;  %v6512_v24 = vcombine.high %v5051_v61, %v5055_v3  ;;  %v6511_v28 = vcombine.low %v5051_v61, %v5055_v3 }
 0x538   : > { %5568 = vmatpush1.bf16.msra.mxu1 %v6487_v4 }
 0x539   : > { %5569 = vmatprep.subr.bf16.mxu1 %v6496_v37  ;;  %v5428_v37 = vsub.s32 6, %v10859_v0 }
 0x53b   : > { %v5429_v9 = vrot.slane %v5080_v54, %v5428_v37 }
 0x53c   : > { %5570 = vmatpush1.bf16.msra.mxu1 %v6495_v12  ;;  %v5433_v12 = vrot.slane %v5080_v54, %v5432_v57 }
 0x53d   : > { %5571 = vmatprep.subr.bf16.mxu1 %v6504_v60 }
 0x540   : > { %5572 = vmatpush1.bf16.msra.mxu1 %v6503_v21 }
 0x541   : > { %5573 = vmatprep.subr.bf16.mxu1 %v6512_v24 }
 0x544   : > { %5574 = vmatpush1.bf16.msra.mxu1 %v6511_v28 }
 0x545   : > { %5575 = vmatprep.subr.bf16.mxu1 %v6520_v14 }
 0x548   : > { %5576 = vmatpush1.bf16.msra.mxu1 %v6519_v32 }
 0x549   : > { %5577 = vmatprep.subr.bf16.mxu1 %v6528_v39 }
 0x54c   : > { %5578 = vmatpush1.bf16.msra.mxu1 %v6527_v47 }
 0x54d   : > { %5579 = vmatprep.subr.bf16.mxu1 %v6536_v29 }
 0x550   : > { %5580 = vmatpush1.bf16.msra.mxu1 %v6535_v15 }
 0x553   : > { %5598 = vmatmul.mubr.bf16.vlgmr.msra.gmra.mrb[40].mxu1 %v10239_v36 }
 0x5e6   : > { %v5476_v31 = vpop.f32.mrb[32].mxu1  ;;  %v5558_v46 = vpop.f32.mrb[64].mxu0 }
 0x5e7   : > { %v5477_v45 = vadd.f32 %v5476_v31, %v5405_v53  ;;  %v5559_v36 = vadd.f32 %v5558_v46, %v5421_v56  ;;  %v5478_v19 = vpop.f32.mrb[33].mxu1  ;;  %v5560_v22 = vpop.f32.mrb[65].mxu0 }
 0x5e8   : > { %v5479_v43 = vadd.f32 %v5478_v19, %v5409_v58  ;;  %v5561_v52 = vadd.f32 %v5560_v22, %v5425_v10  ;;  %v5480_v5 = vpop.f32.mrb[34].mxu1  ;;  %v5562_v44 = vpop.f32.mrb[66].mxu0 }
 0x5e9   : > { %v5481_v51 = vpop.f32.mrb[35].mxu1  ;;  %v5563_v1 = vpop.f32.mrb[67].mxu0 }
 0x5ea   : > { %v5614_v13 = vcombine.low %v5477_v45, %v5479_v43  ;;  %v5616_v8 = vcombine.low %v5559_v36, %v5561_v52 }
 0x5ec   : > { %v5624_v55 = vrot.slane %v5614_v13, %v5623_v49  ;;  %v5638_v28 = vrot.slane %v5616_v8, %v5623_v49 }
 0x606   : > { %v5517_v17 = vpop.f32.mrb[36].mxu1 }
 0x607   : > { %v5518_v25 = vadd.f32 %v5517_v17, %v5413_v35  ;;  %v5519_v2 = vpop.f32.mrb[37].mxu1 }
 0x608   : > { %v5520_v27 = vadd.f32 %v5519_v2, %v5417_v41  ;;  %v5521_v38 = vpop.f32.mrb[38].mxu1 }
 0x609   : > { %v5522_v62 = vpop.f32.mrb[39].mxu1 }
 0x60a   : > { %v5615_v11 = vcombine.low %v5518_v25, %v5520_v27 }
 0x60c   : > { %v5631_v50 = vrot.slane %v5615_v11, %v5623_v49 }
 0x60e   : > { %v5646_v4 = vcombine.low %v5624_v55, %v5631_v50 }
 0x610   : > { %v5654_v34 = vrot.slane %v5646_v4, %v5623_v49 }
 0x626   : > { %v5599_v60 = vpop.f32.mrb[40].mxu1 }
 0x627   : > { %v5600_v61 = vadd.f32 %v5599_v60, %v5429_v9  ;;  %v5601_v3 = vpop.f32.mrb[41].mxu1 }
 0x628   : > { %v5602_v21 = vadd.f32 %v5601_v3, %v5433_v12  ;;  %v5603_v24 = vpop.f32.mrb[42].mxu1 }
 0x629   : > { %v5604_v23 = vpop.f32.mrb[43].mxu1 }
 0x62a   : > { %v5617_v16 = vcombine.low %v5600_v61, %v5602_v21 }
 0x62c   : > { %v5645_v14 = vrot.slane %v5617_v16, %v5623_v49 }
 0x62e   : > { %v5647_v6 = vcombine.low %v5638_v28, %v5645_v14 }
 0x630   : > { %v5661_v32 = vrot.slane %v5647_v6, %v5623_v49 }
 0x632   : > { %v5662_v39 = vcombine.low %v5654_v34, %v5661_v32 }
 0x634   : > { %5664 = vst [vmem:[%s332_s24] sm:$0xff] %v5662_v39 }
 0x635 PF: > { %s19_s30 = sadd.s32 1, %s7839_s30  }
 0x636   : > { %p16_p5 = scmp.ge.s32.totalorder %s19_s30, 4  }
 0x638   :  { %18 = sbr.rel (!%p16_p5) target bundleno = 1 (0x1), region = 86 }

</bundles_post_ra>
